<compile_context>
chip_gen: v6e
topology: v6e:2x2x1
jax: 0.10.0
libtpu: 0.0.40
codegen_flags: <defaults>
</compile_context>

<pallas_src>
import jax
import jax.numpy as jnp
from jax.experimental import pallas as pl
from jax.experimental.pallas import tpu as pltpu

EPS = 1e-5


def bn_relu_conv1x1_kernel(x_ref, gamma_ref, beta_ref, w_ref, o_ref):
    # x_ref:     (Cin, P)        f32   channel-major activations
    # gamma_ref: (Cin, 1)        f32   BN scale
    # beta_ref:  (Cin, 1)        f32   BN shift
    # w_ref:     (Cout_t, Cin)   bf16  1x1 conv weight tile
    # o_ref:     (Cout_t, P)     f32 or bf16
    x = x_ref[...]
    p = x.shape[1]
    inv_p = 1.0 / p

    # Two-pass BN statistics (training mode, biased variance), lane-axis reduce.
    # Two passes over the VMEM-resident tile are cheap and avoid the
    # E[x^2]-E[x]^2 cancellation problem for non-zero-mean activations.
    mean = jnp.sum(x, axis=1, keepdims=True) * inv_p            # (Cin, 1)
    xc = x - mean                                               # (Cin, P)
    var = jnp.sum(xc * xc, axis=1, keepdims=True) * inv_p       # (Cin, 1)
    inv_std = jax.lax.rsqrt(var + EPS)                          # (Cin, 1)

    scale = inv_std * gamma_ref[...]                            # (Cin, 1)

    # Normalize + affine + ReLU in f32, then cast to bf16 for the MXU.
    y = jnp.maximum(xc * scale + beta_ref[...], 0.0).astype(jnp.bfloat16)

    # 1x1 conv == channel matmul; bf16 x bf16 -> f32 accumulate, cast at store.
    o_ref[...] = jnp.dot(
        w_ref[...], y, preferred_element_type=jnp.float32
    ).astype(o_ref.dtype)


def _num_tensorcores():
    """2-way Cout split only on v7x (2 TCs/chip); single step elsewhere."""
    try:
        kind = (getattr(jax.devices()[0], "device_kind", "") or "").lower()
        if "v7" in kind:
            return 2
    except Exception:  # pragma: no cover - conservative fallback
        pass
    return 1


def bn_relu_conv1x1(x_nchw, gamma, beta, w_mat_bf16, *, out_dtype=jnp.float32):
    """Fused train-mode BN -> ReLU -> 1x1 conv.

    x_nchw:     (N, Cin, H, W) f32
    gamma/beta: (Cin,) f32
    w_mat_bf16: (Cout, Cin) bf16 (pre-cast ONCE outside the per-call path)
    out_dtype:  jnp.float32 (matches PyTorch) or jnp.bfloat16 (halves HBM
                writeback; use only if the downstream consumer tolerates it).
    NOTE: the (1,Cin,H,W)->(Cin,P) reshape is free only for N == 1; for N > 1
    the wrapper transposes become real HBM round trips (still correct).
    """
    N, Cin, H, W = x_nchw.shape
    Cout = w_mat_bf16.shape[0]
    P = N * H * W

    x_cp = jnp.transpose(x_nchw, (1, 0, 2, 3)).reshape(Cin, P)
    gamma2d = gamma.reshape(Cin, 1)
    beta2d = beta.reshape(Cin, 1)

    num_tc = _num_tensorcores()
    if Cout % num_tc != 0:
        num_tc = 1
    cout_tile = Cout // num_tc
    grid = (num_tc,)

    out_bytes = Cout * P * jnp.dtype(out_dtype).itemsize
    cost = pl.CostEstimate(
        flops=2 * Cout * Cin * P + 8 * Cin * P,   # matmul + BN/ReLU elementwise
        transcendentals=0,
        bytes_accessed=Cin * P * 4 + 2 * Cin * 4 + Cout * Cin * 2 + out_bytes,
    )

    out_cp = pl.pallas_call(
        bn_relu_conv1x1_kernel,
        out_shape=jax.ShapeDtypeStruct((Cout, P), out_dtype),
        grid=grid,
        in_specs=[
            pl.BlockSpec((Cin, P), lambda j: (0, 0)),         # full x, constant across grid
            pl.BlockSpec((Cin, 1), lambda j: (0, 0)),
            pl.BlockSpec((Cin, 1), lambda j: (0, 0)),
            pl.BlockSpec((cout_tile, Cin), lambda j: (j, 0)),
        ],
        out_specs=pl.BlockSpec((cout_tile, P), lambda j: (j, 0)),
        compiler_params=pltpu.CompilerParams(
            dimension_semantics=("parallel",)   # shards across the 2 TCs on v7x
        ),
        cost_estimate=cost,
    )(x_cp, gamma2d, beta2d, w_mat_bf16)

    # (Cout, P) -> NCHW. Free for N == 1.
    return jnp.transpose(out_cp.reshape(Cout, N, H, W), (1, 0, 2, 3))


def reference(x_nchw, gamma, beta, conv_weight):
    """Pure-JAX f32 reference mirroring PyTorch training-mode BN -> ReLU -> 1x1 conv."""
    mean = jnp.mean(x_nchw, axis=(0, 2, 3), keepdims=True)
    var = jnp.mean((x_nchw - mean) ** 2, axis=(0, 2, 3), keepdims=True)
    y = (x_nchw - mean) / jnp.sqrt(var + EPS)
    y = y * gamma.reshape(1, -1, 1, 1) + beta.reshape(1, -1, 1, 1)
    y = jnp.maximum(y, 0.0)
    w = conv_weight.reshape(conv_weight.shape[0], conv_weight.shape[1])  # (Cout, Cin)
    return jnp.einsum("nchw,oc->nohw", y, w, precision=jax.lax.Precision.HIGHEST)


if __name__ == "__main__":
    key = jax.random.PRNGKey(0)
    k_x, k_w, k_g, k_b = jax.random.split(key, 4)

    # Shapes from the PyTorch module: x (1,128,28,28), Conv2d(128 -> 512, 1x1).
    N, Cin, H, W = 1, 128, 28, 28
    Cout = 512

    x = jax.random.normal(k_x, (N, Cin, H, W), dtype=jnp.float32)
    # Randomized affine params to exercise the full BN math (same formula as
    # the module; PyTorch default init would be gamma=1, beta=0).
    gamma = 1.0 + 0.1 * jax.random.normal(k_g, (Cin,), dtype=jnp.float32)
    beta = 0.1 * jax.random.normal(k_b, (Cin,), dtype=jnp.float32)
    conv_weight = jax.random.normal(k_w, (Cout, Cin, 1, 1), dtype=jnp.float32) * 0.05

    # Constant across calls: reshape + bf16 cast done ONCE, outside the call path.
    w_mat_bf16 = conv_weight.reshape(Cout, Cin).astype(jnp.bfloat16)

    # f32 output path (matches the PyTorch module's output dtype).
    out = bn_relu_conv1x1(x, gamma, beta, w_mat_bf16, out_dtype=jnp.float32)
    out = jax.block_until_ready(out)

    ref = reference(x, gamma, beta, conv_weight)
    assert out.shape == (N, Cout, H, W), out.shape
    max_err = float(jnp.max(jnp.abs(out - ref)))
    # bf16 MXU inputs + f32 accumulation, compared against a full-f32 reference.
    assert jnp.allclose(out, ref, atol=5e-3, rtol=5e-3), f"mismatch vs reference: {max_err}"

    # bf16 output path (HBM-traffic optimization when downstream tolerates bf16).
    out_bf16 = bn_relu_conv1x1(x, gamma, beta, w_mat_bf16, out_dtype=jnp.bfloat16)
    out_bf16 = jax.block_until_ready(out_bf16)
    assert out_bf16.dtype == jnp.bfloat16 and out_bf16.shape == (N, Cout, H, W)
    max_err_bf16 = float(jnp.max(jnp.abs(out_bf16.astype(jnp.float32) - ref)))
    assert max_err_bf16 < 5e-2, f"bf16-output mismatch vs reference: {max_err_bf16}"

    print("KERNEL_OK")
</pallas_src>

<mosaic_0001>
module attributes {stable_mosaic.version = 11 : i64} {
  func.func @bn_relu_conv1x1_kernel(%arg0: i32, %arg1: memref<128x784xf32, #tpu.memory_space<vmem>>, %arg2: memref<128x1xf32, #tpu.memory_space<vmem>>, %arg3: memref<128x1xf32, #tpu.memory_space<vmem>>, %arg4: memref<512x128xbf16, #tpu.memory_space<vmem>>, %arg5: memref<512x784xf32, #tpu.memory_space<vmem>>) attributes {dimension_semantics = [#tpu.dimension_semantics<parallel>], iteration_bounds = array<i64: 1>, scalar_prefetch = 0 : i64, scratch_operands = 0 : i64, tpu.core_type = #tpu.core_type<tc>, window_params = [{pipeline_mode = #tpu.pipeline_mode<synchronous>, transform_indices = @transform_0, window_bounds = array<i64: 128, 784>}, {pipeline_mode = #tpu.pipeline_mode<synchronous>, transform_indices = @transform_1, window_bounds = array<i64: 128, 1>}, {pipeline_mode = #tpu.pipeline_mode<synchronous>, transform_indices = @transform_2, window_bounds = array<i64: 128, 1>}, {transform_indices = @transform_3, window_bounds = array<i64: 512, 128>}, {transform_indices = @transform_4, window_bounds = array<i64: 512, 784>}]} {
    %c0 = arith.constant 0 : index
    %c0_0 = arith.constant 0 : index
    %0 = vector.load %arg1[%c0, %c0_0] : memref<128x784xf32, #tpu.memory_space<vmem>>, vector<128x784xf32>
    %cst = arith.constant dense<0.000000e+00> : vector<128xf32>
    %1 = vector.multi_reduction <add>, %0, %cst [1] : vector<128x784xf32> to vector<128xf32>
    %2 = vector.shape_cast %1 : vector<128xf32> to vector<128x1xf32>
    %cst_1 = arith.constant 0.00127551018 : f32
    %3 = vector.broadcast %cst_1 : f32 to vector<128x1xf32>
    %4 = arith.mulf %2, %3 : vector<128x1xf32>
    %5 = vector.broadcast %4 : vector<128x1xf32> to vector<128x784xf32>
    %6 = arith.subf %0, %5 : vector<128x784xf32>
    %7 = arith.mulf %6, %6 : vector<128x784xf32>
    %cst_2 = arith.constant dense<0.000000e+00> : vector<128xf32>
    %8 = vector.multi_reduction <add>, %7, %cst_2 [1] : vector<128x784xf32> to vector<128xf32>
    %9 = vector.shape_cast %8 : vector<128xf32> to vector<128x1xf32>
    %cst_3 = arith.constant 0.00127551018 : f32
    %10 = vector.broadcast %cst_3 : f32 to vector<128x1xf32>
    %11 = arith.mulf %9, %10 : vector<128x1xf32>
    %cst_4 = arith.constant 9.99999974E-6 : f32
    %12 = vector.broadcast %cst_4 : f32 to vector<128x1xf32>
    %13 = arith.addf %11, %12 : vector<128x1xf32>
    %14 = math.rsqrt %13 : vector<128x1xf32>
    %c0_5 = arith.constant 0 : index
    %c0_6 = arith.constant 0 : index
    %15 = vector.load %arg2[%c0_5, %c0_6] : memref<128x1xf32, #tpu.memory_space<vmem>>, vector<128x1xf32>
    %16 = arith.mulf %14, %15 : vector<128x1xf32>
    %17 = vector.broadcast %16 : vector<128x1xf32> to vector<128x784xf32>
    %18 = arith.mulf %6, %17 : vector<128x784xf32>
    %c0_7 = arith.constant 0 : index
    %c0_8 = arith.constant 0 : index
    %19 = vector.load %arg3[%c0_7, %c0_8] : memref<128x1xf32, #tpu.memory_space<vmem>>, vector<128x1xf32>
    %20 = vector.broadcast %19 : vector<128x1xf32> to vector<128x784xf32>
    %21 = arith.addf %18, %20 : vector<128x784xf32>
    %cst_9 = arith.constant 0.000000e+00 : f32
    %22 = vector.broadcast %cst_9 : f32 to vector<128x784xf32>
    %23 = arith.maximumf %21, %22 : vector<128x784xf32>
    %24 = arith.truncf %23 : vector<128x784xf32> to vector<128x784xbf16>
    %c0_10 = arith.constant 0 : index
    %c0_11 = arith.constant 0 : index
    %25 = vector.load %arg4[%c0_10, %c0_11] : memref<512x128xbf16, #tpu.memory_space<vmem>>, vector<512x128xbf16>
    %cst_12 = arith.constant dense<0.000000e+00> : vector<512x784xf32>
    %26 = tpu.matmul %25, %24, %cst_12 {dimension_numbers = #tpu.dot_dimension_numbers<[1], [0], [0], [1], [0, 0, 1, 1], [], []>} : vector<512x128xbf16>, vector<128x784xbf16>, vector<512x784xf32> -> vector<512x784xf32>
    %c0_13 = arith.constant 0 : index
    %c0_14 = arith.constant 0 : index
    %27 = vector.load %arg5[%c0_13, %c0_14] : memref<512x784xf32, #tpu.memory_space<vmem>>, vector<512x784xf32>
    tpu.vector_store %arg5[%c0_13, %c0_14], %26 {strides = array<i32>} : memref<512x784xf32, #tpu.memory_space<vmem>>, vector<512x784xf32>,
    return
  }
  func.func @transform_0(%arg0: i32) -> (i32, i32) {
    %c0_i32 = arith.constant 0 : i32
    %c0_i32_0 = arith.constant 0 : i32
    %c0_i32_1 = arith.constant 0 : i32
    return %c0_i32, %c0_i32_0 : i32, i32
  }
  func.func @transform_1(%arg0: i32) -> (i32, i32) {
    %c0_i32 = arith.constant 0 : i32
    %c0_i32_0 = arith.constant 0 : i32
    %c0_i32_1 = arith.constant 0 : i32
    return %c0_i32, %c0_i32_0 : i32, i32
  }
  func.func @transform_2(%arg0: i32) -> (i32, i32) {
    %c0_i32 = arith.constant 0 : i32
    %c0_i32_0 = arith.constant 0 : i32
    %c0_i32_1 = arith.constant 0 : i32
    return %c0_i32, %c0_i32_0 : i32, i32
  }
  func.func @transform_3(%arg0: i32) -> (i32, i32) {
    %c0_i32 = arith.constant 0 : i32
    %c0_i32_0 = arith.constant 0 : i32
    return %arg0, %c0_i32 : i32, i32
  }
  func.func @transform_4(%arg0: i32) -> (i32, i32) {
    %c0_i32 = arith.constant 0 : i32
    %c0_i32_0 = arith.constant 0 : i32
    return %arg0, %c0_i32 : i32, i32
  }
}

</mosaic_0001>

<bundles_post_ra>
// kernel: tpu_custom_call.1
= control target key start
LH: loop header
LB: loop body
LE: loop exit
PB: predicated region body
PF: predicated region fallthrough
CT: control target
= control target key end

     0   :  { %9 = vsyncpa [#allocation3], 0  ;;  %s3655_s15 = smov [#allocation2]   ;;  %s7351_s0 = inlined_call_operand.vmem [shape: f32[128,784], index: 0, kind: input, shape index: {}]   ;;  %s7352_s1 = inlined_call_operand.vmem [shape: f32[128,1], index: 1, kind: input, shape index: {}]   ;;  %s7353_s2 = inlined_call_operand.vmem [shape: f32[128,1], index: 2, kind: input, shape index: {}]   ;;  %s7354_s3 = inlined_call_operand.hbm [shape: bf16[512,128], index: 3, kind: input, shape index: {}]   ;;  %s7355_s4 = inlined_call_operand.vmem [shape: f32[512,784], index: 4, kind: output, shape index: {}]  }
   0x1   :  { %s21_s16 = sshll.u32 %s3655_s15, 4  ;;  %s22_s16 = int_to_ptr.vmem [resolvable:$true] %s21_s16 }
   0x2   :  { %s3641_s17 = scalar_lea.vmem %s22_s16, 4096  ;;  %p3646_p1 = scmp.lt.s32.totalorder %s22_s16, %s22_s16 }
   0x3   :  { %p3642_p0 = scmp.ne.s32.totalorder %s22_s16, %s3641_s17  ;;  %p3647_p2 = scmp.lt.s32.totalorder %s3641_s17, %s3641_s17 }
   0x5   :  { %p3648_p3 = por %p3647_p2, %p3646_p1 }
   0x7   :  { %p3649_p4 = pnand %p3648_p3, %p3642_p0 }
   0x9   :  { %3652 = shalt.err (!%p3649_p4)
}
   0xa   :  { %s3656_s18 = smov 64   ;;  %s3657_s19 = smov 4  }
   0xb   :  { %27 = dma.hbm_to_vmem [thread:$0]  %s7354_s3, 4096, %s22_s16, [#allocation3], %s3656_s18, %s3656_s18, %s3657_s19  }
   0xc   :  { %3653 = dma.done.wait [#allocation3], 4096  }
   0xd   :  { %3654 = vsyncadd [#allocation3], 4294963200  ;;  %v3690_v0 = vld [vmem:[%s7351_s0 + $0x310] sm:$0xff]  ;;  %v3695_v1 = vld [vmem:[%s7351_s0 + $0x318] sm:$0xff]  ;;  %vm149_vm0 = vcmask 130048  }
   0xe   :  { %v3700_v2 = vld [vmem:[%s7351_s0 + $0x320] sm:$0xff]  ;;  %v271_v3 = vadd.f32 %v3695_v1, %v3690_v0  ;;  %v3707_v4 = vld [vmem:[%s7351_s0 + $0x328] sm:$0xff]  ;;  %v3722_v7 = vld [vmem:[%s7351_s0 + $0x330] sm:$0xff] }
   0xf   :  { %v3712_v5 = vld [vmem:[%s7351_s0 + $0x2a0] sm:$0xff]  ;;  %v3717_v6 = vld [vmem:[%s7351_s0 + $0x2a8] sm:$0xff]  ;;  %v3728_v9 = vld [vmem:[%s7351_s0 + $0x2b0] sm:$0xff] }
  0x10   :  { %v272_v8 = vadd.f32 %v271_v3, %v3700_v2  ;;  %v253_v10 = vadd.f32 %v3717_v6, %v3712_v5  ;;  %v3735_v11 = vld [vmem:[%s7351_s0 + $0x338] sm:$0xff]  ;;  %v3745_v13 = vld [vmem:[%s7351_s0 + $0x348] sm:$0xff]  ;;  %v3750_v14 = vld [vmem:[%s7351_s0 + $0x340] sm:$0xff] }
  0x11   :  { %v3740_v12 = vld [vmem:[%s7351_s0 + $0x2b8] sm:$0xff]  ;;  %v3757_v17 = vld [vmem:[%s7351_s0 + $0x350] sm:$0xff]  ;;  %v3767_v19 = vld [vmem:[%s7351_s0 + $0x2c0] sm:$0xff]  ;;  %v276_v28 = vsel %vm149_vm0, %v3750_v14, 0.0 }
  0x12   :  { %v273_v15 = vadd.f32 %v272_v8, %v3707_v4  ;;  %v254_v16 = vadd.f32 %v253_v10, %v3728_v9  ;;  %v3762_v18 = vld [vmem:[%s7351_s0 + $0x358] sm:$0xff]  ;;  %v3772_v20 = vld [vmem:[%s7351_s0 + $0x2d0] sm:$0xff]  ;;  %v3777_v21 = vld [vmem:[%s7351_s0 + $0x360] sm:$0xff]  ;;  %v280_v22 = vadd.f32 %v3757_v17, %v3745_v13 }
  0x13   :  { %v3786_v25 = vld [vmem:[%s7351_s0 + $0x2d8] sm:$0xff]  ;;  %v3791_v26 = vld [vmem:[%s7351_s0 + $0x2e0] sm:$0xff]  ;;  %v3796_v27 = vld [vmem:[%s7351_s0 + $0x2e8] sm:$0xff]  ;;  %v258_v39 = vsel %vm149_vm0, %v3772_v20, 0.0 }
  0x14   :  { %v274_v23 = vadd.f32 %v273_v15, %v3722_v7  ;;  %v255_v24 = vadd.f32 %v254_v16, %v3740_v12  ;;  %v3803_v29 = vld [vmem:[%s7351_s0 + $0x2c8] sm:$0xff]  ;;  %v281_v31 = vadd.f32 %v280_v22, %v3762_v18  ;;  %v262_v32 = vadd.f32 %v3791_v26, %v3786_v25  ;;  %v3818_v35 = vld [vmem:[%s7351_s0 + $0x370] sm:$0xff]  ;;  %v3840_v40 = vld [vmem:[%s7351_s0 + $0x378] sm:$0xff] }
  0x15   :  { %v3808_v30 = vld [vmem:[%s7351_s0 + $0x368] sm:$0xff]  ;;  %v3823_v36 = vld [vmem:[%s7351_s0 + $0x2f0] sm:$0xff]  ;;  %v3846_v42 = vld [vmem:[%s7351_s0 + $0x2f8] sm:$0xff]  ;;  %v285_v58 = vsel %vm149_vm0, %v3840_v40, 0.0 }
  0x16   :  { %v275_v33 = vadd.f32 %v274_v23, %v3735_v11  ;;  %v256_v34 = vadd.f32 %v255_v24, %v3767_v19  ;;  %v3828_v37 = vld [vmem:[%s7351_s0 + $0x268] sm:$0xff]  ;;  %v3833_v38 = vld [vmem:[%s7351_s0 + $0x270] sm:$0xff]  ;;  %v282_v41 = vadd.f32 %v281_v31, %v3777_v21  ;;  %v263_v43 = vadd.f32 %v262_v32, %v3796_v27  ;;  %v3852_v44 = vld [vmem:[%s7351_s0 + $0x278] sm:$0xff] }
  0x17   :  { %v244_v45 = vadd.f32 %v3833_v38, %v3828_v37  ;;  %v3860_v48 = vld [vmem:[%s7351_s0 + $0x300] sm:$0xff]  ;;  %v3870_v50 = vld [vmem:[%s7351_s0 + $0x1f8] sm:$0xff]  ;;  %v3876_v52 = vld [vmem:[%s7351_s0 + $0x308] sm:$0xff] }
  0x18   :  { %v277_v46 = vadd.f32 %v276_v28, %v275_v33  ;;  %v257_v47 = vadd.f32 %v256_v34, %v3803_v29  ;;  %v3865_v49 = vld [vmem:[%s7351_s0 + $0x280] sm:$0xff]  ;;  %v283_v51 = vadd.f32 %v282_v41, %v3808_v30  ;;  %v264_v53 = vadd.f32 %v263_v43, %v3823_v36  ;;  %v3888_v56 = vld [vmem:[%s7351_s0 + $0x208] sm:$0xff]  ;;  %v3900_v60 = vld [vmem:[%s7351_s0 + $0x298] sm:$0xff] }
  0x19   :  { %v245_v54 = vadd.f32 %v244_v45, %v3852_v44  ;;  %v3883_v55 = vld [vmem:[%s7351_s0 + $0x200] sm:$0xff]  ;;  %v3895_v59 = vld [vmem:[%s7351_s0 + $0x288] sm:$0xff]  ;;  %v3905_v61 = vld [vmem:[%s7351_s0 + $0x210] sm:$0xff]  ;;  %v267_v22 = vsel %vm149_vm0, %v3876_v52, 0.0  ;;  %v249_v45 = vsel %vm149_vm0, %v3900_v60, 0.0 }
  0x1a   :  { %278 = vadd.xlane.f32.xlu0 %v277_v46  ;;  %v259_v57 = vadd.f32 %v258_v39, %v257_v47  ;;  %v226_v62 = vadd.f32 %v3883_v55, %v3870_v50  ;;  %v284_v63 = vadd.f32 %v283_v51, %v3818_v35  ;;  %v265_v3 = vadd.f32 %v264_v53, %v3846_v42  ;;  %v3915_v10 = vld [vmem:[%s7351_s0 + $0x230] sm:$0xff]  ;;  %v3920_v15 = vld [vmem:[%s7351_s0 + $0x238] sm:$0xff]  ;;  %v3925_v16 = vld [vmem:[%s7351_s0 + $0x240] sm:$0xff] }
  0x1b   :  { %v246_v8 = vadd.f32 %v245_v54, %v3865_v49  ;;  %7507 = vst [vmem:[#allocation5_spill] sm:$0xff] %v3915_v10  ;;  %7508 = vst [vmem:[#allocation6_spill] sm:$0xff] %v3920_v15  ;;  %v3932_v23 = vld [vmem:[%s7351_s0 + $0x290] sm:$0xff]  ;;  %v3937_v24 = vld [vmem:[%s7351_s0 + $0x218] sm:$0xff]  ;;  %v235_v31 = vadd.f32 %v3920_v15, %v3915_v10 }
  0x1c   :  { %7509 = vst [vmem:[#allocation7_spill] sm:$0xff] %v3925_v16  ;;  %260 = vadd.xlane.f32.xlu1 %v259_v57  ;;  %7510 = vst [vmem:[#allocation8_spill] sm:$0xff] %v3937_v24  ;;  %v227_v28 = vadd.f32 %v226_v62, %v3888_v56  ;;  %v286_v32 = vadd.f32 %v285_v58, %v284_v63  ;;  %v266_v33 = vadd.f32 %v265_v3, %v3860_v48  ;;  %v3947_v39 = vld [vmem:[%s7351_s0 + $0x248] sm:$0xff]  ;;  %v3957_v43 = vld [vmem:[%s7351_s0 + $0x190] sm:$0xff] }
  0x1d   :  { %v247_v34 = vadd.f32 %v246_v8, %v3895_v59  ;;  %7511 = vst [vmem:[#allocation9_spill] sm:$0xff] %v3947_v39  ;;  %v3952_v41 = vld [vmem:[%s7351_s0 + $0x188] sm:$0xff]  ;;  %7513 = vst [vmem:[#allocation11_spill] sm:$0xff] %v3957_v43  ;;  %v3964_v46 = vld [vmem:[%s7351_s0 + $0x220] sm:$0xff]  ;;  %v236_v53 = vadd.f32 %v235_v31, %v3925_v16 }
  0x1e   :  { %7512 = vst [vmem:[#allocation10_spill] sm:$0xff] %v3952_v41  ;;  %7514 = vst [vmem:[#allocation12_spill] sm:$0xff] %v3964_v46  ;;  %v3969_v47 = vld [vmem:[%s7351_s0 + $0x228] sm:$0xff]  ;;  %v228_v51 = vadd.f32 %v227_v28, %v3905_v61  ;;  %v3976_v54 = vld [vmem:[%s7351_s0 + $0x198] sm:$0xff]  ;;  %v208_v57 = vadd.f32 %v3957_v43, %v3952_v41  ;;  %287 = vadd.xlane.f32.xlu0 %v286_v32  ;;  %v268_v58 = vadd.f32 %v267_v22, %v266_v33 }
  0x1f   :  { %7515 = vst [vmem:[#allocation13_spill] sm:$0xff] %v3969_v47  ;;  %7516 = vst [vmem:[#allocation14_spill] sm:$0xff] %v3976_v54  ;;  %v248_v62 = vadd.f32 %v247_v34, %v3932_v23  ;;  %v3984_v63 = vld [vmem:[%s7351_s0 + $0x250] sm:$0xff]  ;;  %v3989_v3 = vld [vmem:[%s7351_s0 + $0x1a0] sm:$0xff]  ;;  %v237_v31 = vadd.f32 %v236_v53, %v3947_v39 }
  0x20   :  { %7517 = vst [vmem:[#allocation15_spill] sm:$0xff] %v3984_v63  ;;  %7518 = vst [vmem:[#allocation16_spill] sm:$0xff] %v3989_v3  ;;  %v3994_v8 = vld [vmem:[%s7351_s0 + $0x1c0] sm:$0xff]  ;;  %v229_v28 = vadd.f32 %v228_v51, %v3937_v24  ;;  %v209_v32 = vadd.f32 %v208_v57, %v3976_v54  ;;  %v4007_v33 = vld [vmem:[%s7351_s0 + $0x1c8] sm:$0xff]  ;;  %269 = vadd.xlane.f32.xlu1 %v268_v58  ;;  %v231_v58 = vsel %vm149_vm0, %v3969_v47, 0.0 }
  0x21   :  { %7519 = vst [vmem:[#allocation17_spill] sm:$0xff] %v3994_v8  ;;  %v4000_v22 = vld [vmem:[%s7351_s0 + $0x260] sm:$0xff]  ;;  %7521 = vst [vmem:[#allocation19_spill] sm:$0xff] %v4007_v33  ;;  %v4012_v34 = vld [vmem:[%s7351_s0 + $0x1d0] sm:$0xff]  ;;  %v250_v51 = vadd.f32 %v249_v45, %v248_v62  ;;  %v217_v54 = vadd.f32 %v4007_v33, %v3994_v8  ;;  %v238_v62 = vadd.f32 %v237_v31, %v3984_v63 }
  0x22   :  { %7520 = vst [vmem:[#allocation18_spill] sm:$0xff] %v4000_v22  ;;  %7522 = vst [vmem:[#allocation20_spill] sm:$0xff] %v4012_v34  ;;  %v4017_v43 = vld [vmem:[%s7351_s0 + $0x258] sm:$0xff]  ;;  %v4022_v53 = vld [vmem:[%s7351_s0 + $0x1a8] sm:$0xff]  ;;  %v230_v45 = vadd.f32 %v229_v28, %v3964_v46  ;;  %v210_v41 = vadd.f32 %v209_v32, %v3989_v3  ;;  %v240_v31 = vsel %vm149_vm0, %v4000_v22, 0.0 }
  0x23   :  { %7523 = vst [vmem:[#allocation21_spill] sm:$0xff] %v4017_v43  ;;  %7524 = vst [vmem:[#allocation22_spill] sm:$0xff] %v4022_v53  ;;  %v4027_v57 = vld [vmem:[%s7351_s0 + $0x1d8] sm:$0xff]  ;;  %v4044_v16 = vld [vmem:[%s7351_s0 + $0x120] sm:$0xff]  ;;  %v218_v3 = vadd.f32 %v217_v54, %v4012_v34  ;;  %v239_v63 = vadd.f32 %v238_v62, %v4017_v43 }
  0x24   :  { %7525 = vst [vmem:[#allocation23_spill] sm:$0xff] %v4027_v57  ;;  %v4039_v39 = vld [vmem:[%s7351_s0 + $0x118] sm:$0xff]  ;;  %7527 = vst [vmem:[#allocation25_spill] sm:$0xff] %v4044_v16  ;;  %v4049_v28 = vld [vmem:[%s7351_s0 + $0x128] sm:$0xff]  ;;  %v211_v15 = vadd.f32 %v210_v41, %v4022_v53  ;;  %251 = vadd.xlane.f32.xlu1 %v250_v51  ;;  %v232_v41 = vadd.f32 %v231_v58, %v230_v45 }
  0x25   :  { %7526 = vst [vmem:[#allocation24_spill] sm:$0xff] %v4039_v39  ;;  %7528 = vst [vmem:[#allocation26_spill] sm:$0xff] %v4049_v28  ;;  %v4056_v32 = vld [vmem:[%s7351_s0 + $0x1b0] sm:$0xff]  ;;  %v4061_v33 = vld [vmem:[%s7351_s0 + $0x1b8] sm:$0xff]  ;;  %v190_v22 = vadd.f32 %v4044_v16, %v4039_v39  ;;  %v219_v39 = vadd.f32 %v218_v3, %v4027_v57  ;;  %v241_v45 = vadd.f32 %v240_v31, %v239_v63 }
  0x26   :  { %7529 = vst [vmem:[#allocation27_spill] sm:$0xff] %v4056_v32  ;;  %7530 = vst [vmem:[#allocation28_spill] sm:$0xff] %v4061_v33  ;;  %v4066_v8 = vld [vmem:[%s7351_s0 + $0x1e0] sm:$0xff]  ;;  %v4076_v10 = vld [vmem:[%s7351_s0 + $0x1e8] sm:$0xff]  ;;  %v212_v58 = vadd.f32 %v211_v15, %v4056_v32  ;;  %v213_v3 = vsel %vm149_vm0, %v4061_v33, 0.0 }
  0x27   :  { %7531 = vst [vmem:[#allocation29_spill] sm:$0xff] %v4066_v8  ;;  %v4081_v46 = vld [vmem:[%s7351_s0 + $0x130] sm:$0xff]  ;;  %v4091_v62 = vld [vmem:[%s7351_s0 + $0x158] sm:$0xff]  ;;  %v191_v53 = vadd.f32 %v190_v22, %v4049_v28  ;;  %v4108_v43 = vld [vmem:[%s7351_s0 + $0x160] sm:$0xff]  ;;  %v220_v15 = vadd.f32 %v219_v39, %v4066_v8  ;;  %242 = vadd.xlane.f32.xlu0 %v241_v45 }
  0x28   :  { %7532 = vst [vmem:[#allocation30_spill] sm:$0xff] %v4081_v46  ;;  %v4086_v54 = vld [vmem:[%s7351_s0 + $0x150] sm:$0xff]  ;;  %7534 = vst [vmem:[#allocation32_spill] sm:$0xff] %v4091_v62  ;;  %v4102_v34 = vld [vmem:[%s7351_s0 + $0x138] sm:$0xff]  ;;  %233 = vadd.xlane.f32.xlu1 %v232_v41 }
  0x29   :  { %7533 = vst [vmem:[#allocation31_spill] sm:$0xff] %v4086_v54  ;;  %v4096_v16 = vld [vmem:[%s7351_s0 + $0x1f0] sm:$0xff]  ;;  %7536 = vst [vmem:[#allocation34_spill] sm:$0xff] %v4102_v34  ;;  %v199_v51 = vadd.f32 %v4091_v62, %v4086_v54  ;;  %v4118_v57 = vld [vmem:[%s7351_s0 + $0x140] sm:$0xff]  ;;  %v192_v31 = vadd.f32 %v191_v53, %v4081_v46  ;;  %v214_v46 = vadd.f32 %v213_v3, %v212_v58 }
  0x2a   :  { %7535 = vst [vmem:[#allocation33_spill] sm:$0xff] %v4096_v16  ;;  %7537 = vst [vmem:[#allocation35_spill] sm:$0xff] %v4108_v43  ;;  %v4123_v22 = vld [vmem:[%s7351_s0 + $0x168] sm:$0xff]  ;;  %v4141_v28 = vld [vmem:[%s7351_s0 + $0xb0] sm:$0xff]  ;;  %v222_v39 = vsel %vm149_vm0, %v4096_v16, 0.0  ;;  %v221_v16 = vadd.f32 %v220_v15, %v4076_v10 }
  0x2b   :  { %7538 = vst [vmem:[#allocation36_spill] sm:$0xff] %v4118_v57  ;;  %7539 = vst [vmem:[#allocation37_spill] sm:$0xff] %v4123_v22  ;;  %v4128_v62 = vld [vmem:[%s7351_s0 + $0xa8] sm:$0xff]  ;;  %v200_v54 = vadd.f32 %v199_v51, %v4108_v43  ;;  %v4146_v32 = vld [vmem:[%s7351_s0 + $0xb8] sm:$0xff]  ;;  %v193_v8 = vadd.f32 %v192_v31, %v4102_v34 }
  0x2c   :  { %7540 = vst [vmem:[#allocation38_spill] sm:$0xff] %v4128_v62  ;;  %v4134_v63 = vld [vmem:[%s7351_s0 + $0x148] sm:$0xff]  ;;  %7542 = vst [vmem:[#allocation40_spill] sm:$0xff] %v4141_v28  ;;  %v4153_v53 = vld [vmem:[%s7351_s0 + $0x170] sm:$0xff]  ;;  %v172_v45 = vadd.f32 %v4141_v28, %v4128_v62  ;;  %v223_v28 = vadd.f32 %v222_v39, %v221_v16  ;;  %215 = vadd.xlane.f32.xlu1 %v214_v46 }
  0x2d   :  { %7541 = vst [vmem:[#allocation39_spill] sm:$0xff] %v4134_v63  ;;  %7543 = vst [vmem:[#allocation41_spill] sm:$0xff] %v4146_v32  ;;  %v4158_v51 = vld [vmem:[%s7351_s0 + $0x180] sm:$0xff]  ;;  %v201_v33 = vadd.f32 %v200_v54, %v4123_v22  ;;  %v4178_v47 = vld [vmem:[%s7351_s0 + $0xe8] sm:$0xff]  ;;  %v195_v58 = vsel %vm149_vm0, %v4134_v63, 0.0  ;;  %v194_v62 = vadd.f32 %v193_v8, %v4118_v57 }
  0x2e   :  { %7544 = vst [vmem:[#allocation42_spill] sm:$0xff] %v4153_v53  ;;  %7545 = vst [vmem:[#allocation43_spill] sm:$0xff] %v4158_v51  ;;  %v4163_v43 = vld [vmem:[%s7351_s0 + $0xc0] sm:$0xff]  ;;  %v4183_v41 = vld [vmem:[%s7351_s0 + $0xf0] sm:$0xff]  ;;  %v173_v15 = vadd.f32 %v172_v45, %v4146_v32  ;;  %v204_v8 = vsel %vm149_vm0, %v4158_v51, 0.0  ;;  %224 = vadd.xlane.f32.xlu0 %v223_v28 }
  0x2f   :  { %7546 = vst [vmem:[#allocation44_spill] sm:$0xff] %v4163_v43  ;;  %v4173_v24 = vld [vmem:[%s7351_s0 + $0xe0] sm:$0xff]  ;;  %7548 = vst [vmem:[#allocation46_spill] sm:$0xff] %v4178_v47  ;;  %v4190_v54 = vld [vmem:[%s7351_s0 + $0x178] sm:$0xff]  ;;  %v202_v22 = vadd.f32 %v201_v33, %v4153_v53  ;;  %v196_v53 = vadd.f32 %v195_v58, %v194_v62 }
  0x30   :  { %7547 = vst [vmem:[#allocation45_spill] sm:$0xff] %v4173_v24  ;;  %7549 = vst [vmem:[#allocation47_spill] sm:$0xff] %v4183_v41  ;;  %v4195_v3 = vld [vmem:[%s7351_s0 + $0xc8] sm:$0xff]  ;;  %v181_v31 = vadd.f32 %v4178_v47, %v4173_v24  ;;  %v4205_v63 = vld [vmem:[%s7351_s0 + $0xd0] sm:$0xff]  ;;  %v174_v39 = vadd.f32 %v173_v15, %v4163_v43 }
  0x31   :  { %7550 = vst [vmem:[#allocation48_spill] sm:$0xff] %v4190_v54  ;;  %7551 = vst [vmem:[#allocation49_spill] sm:$0xff] %v4195_v3  ;;  %v4210_v34 = vld [vmem:[%s7351_s0 + $0xf8] sm:$0xff]  ;;  %v4215_v45 = vld [vmem:[%s7351_s0 + $0x70] sm:$0xff]  ;;  %v203_v15 = vadd.f32 %v202_v22, %v4190_v54  ;;  %197 = vadd.xlane.f32.xlu1 %v196_v53 }
  0x32   :  { %7552 = vst [vmem:[#allocation50_spill] sm:$0xff] %v4205_v63  ;;  %7553 = vst [vmem:[#allocation51_spill] sm:$0xff] %v4210_v34  ;;  %v4220_v16 = vld [vmem:[%s7351_s0 + $0x78] sm:$0xff]  ;;  %v4233_v47 = vld [vmem:[%s7351_s0 + $0x100] sm:$0xff]  ;;  %v182_v24 = vadd.f32 %v181_v31, %v4183_v41  ;;  %v175_v28 = vadd.f32 %v174_v39, %v4195_v3 }
  0x33   :  { %7554 = vst [vmem:[#allocation52_spill] sm:$0xff] %v4215_v45  ;;  %7555 = vst [vmem:[#allocation53_spill] sm:$0xff] %v4220_v16  ;;  %v4227_v33 = vld [vmem:[%s7351_s0 + $0xd8] sm:$0xff]  ;;  %v4239_v32 = vld [vmem:[%s7351_s0 + $0x80] sm:$0xff]  ;;  %v163_v51 = vadd.f32 %v4220_v16, %v4215_v45  ;;  %v205_v39 = vadd.f32 %v204_v8, %v203_v15 }
  0x34   :  { %7556 = vst [vmem:[#allocation54_spill] sm:$0xff] %v4227_v33  ;;  %7557 = vst [vmem:[#allocation55_spill] sm:$0xff] %v4233_v47  ;;  %v4247_v43 = vld [vmem:[%s7351_s0 + $0x108] sm:$0xff]  ;;  %v4252_v31 = vld [vmem:[%s7351_s0 + $0x110] sm:$0xff]  ;;  %v183_v62 = vadd.f32 %v182_v24, %v4210_v34  ;;  %v177_v24 = vsel %vm149_vm0, %v4227_v33, 0.0  ;;  %v176_v15 = vadd.f32 %v175_v28, %v4205_v63 }
  0x35   :  { %7558 = vst [vmem:[#allocation56_spill] sm:$0xff] %v4239_v32  ;;  %7559 = vst [vmem:[#allocation57_spill] sm:$0xff] %v4252_v31  ;;  %v4257_v41 = vld [vmem:[%s7351_s0 + $0x88] sm:$0xff]  ;;  %v4262_v46 = vld [vmem:[%s7351_s0] sm:$0xff]  ;;  %v164_v58 = vadd.f32 %v163_v51, %v4239_v32  ;;  %206 = vadd.xlane.f32.xlu0 %v205_v39  ;;  %v186_v28 = vsel %vm149_vm0, %v4252_v31, 0.0 }
  0x36   :  { %7560 = vst [vmem:[#allocation58_spill] sm:$0xff] %v4257_v41  ;;  %7561 = vst [vmem:[#allocation59_spill] sm:$0xff] %v4262_v46  ;;  %v4269_v22 = vld [vmem:[%s7351_s0 + $0xa0] sm:$0xff]  ;;  %v4275_v16 = vld [vmem:[%s7351_s0 + $0x8] sm:$0xff]  ;;  %v184_v33 = vadd.f32 %v183_v62, %v4233_v47  ;;  %v178_v31 = vadd.f32 %v177_v24, %v176_v15 }
  0x37   :  { %7562 = vst [vmem:[#allocation60_spill] sm:$0xff] %v4269_v22  ;;  %7563 = vst [vmem:[#allocation61_spill] sm:$0xff] %v4275_v16  ;;  %v4280_v45 = vld [vmem:[%s7351_s0 + $0x10] sm:$0xff]  ;;  %v4292_v51 = vld [vmem:[%s7351_s0 + $0x18] sm:$0xff]  ;;  %v144_v8 = vadd.f32 %v4275_v16, %v4262_v46  ;;  %v165_v3 = vadd.f32 %v164_v58, %v4257_v41  ;;  %v168_v58 = vsel %vm149_vm0, %v4269_v22, 0.0 }
  0x38   :  { %7564 = vst [vmem:[#allocation62_spill] sm:$0xff] %v4280_v45  ;;  %v4287_v34 = vld [vmem:[%s7351_s0 + $0x90] sm:$0xff]  ;;  %7566 = vst [vmem:[#allocation64_spill] sm:$0xff] %v4292_v51  ;;  %v4307_v54 = vld [vmem:[%s7351_s0 + $0x38] sm:$0xff]  ;;  %v185_v47 = vadd.f32 %v184_v33, %v4247_v43  ;;  %179 = vadd.xlane.f32.xlu1 %v178_v31 }
  0x39   :  { %7565 = vst [vmem:[#allocation63_spill] sm:$0xff] %v4287_v34  ;;  %v4297_v32 = vld [vmem:[%s7351_s0 + $0x30] sm:$0xff]  ;;  %7568 = vst [vmem:[#allocation66_spill] sm:$0xff] %v4307_v54  ;;  %v4312_v57 = vld [vmem:[%s7351_s0 + $0x40] sm:$0xff]  ;;  %v145_v41 = vadd.f32 %v144_v8, %v4280_v45  ;;  %v166_v22 = vadd.f32 %v165_v3, %v4287_v34 }
  0x3a   :  { %7567 = vst [vmem:[#allocation65_spill] sm:$0xff] %v4297_v32  ;;  %7569 = vst [vmem:[#allocation67_spill] sm:$0xff] %v4312_v57  ;;  %v4317_v16 = vld [vmem:[%s7351_s0 + $0x48] sm:$0xff]  ;;  %v4324_v62 = vld [vmem:[%s7351_s0 + $0x98] sm:$0xff]  ;;  %v154_v39 = vadd.f32 %v4312_v57, %v4307_v54  ;;  %v150_v8 = vsel %vm149_vm0, %v4297_v32, 0.0  ;;  %v187_v15 = vadd.f32 %v186_v28, %v185_v47 }
  0x3b   :  { %7570 = vst [vmem:[#allocation68_spill] sm:$0xff] %v4317_v16  ;;  %v4331_v46 = vld [vmem:[%s7351_s0 + $0x20] sm:$0xff]  ;;  %v4337_v53 = vld [vmem:[%s7351_s0 + $0x50] sm:$0xff]  ;;  %v4346_v63 = vld [vmem:[%s7351_s0 + $0x28] sm:$0xff]  ;;  %v146_v57 = vadd.f32 %v145_v41, %v4292_v51  ;;  %v167_v54 = vadd.f32 %v166_v22, %v4324_v62 }
  0x3c   :  { %v4353_v45 = vld [vmem:[%s7351_s0 + $0x68] sm:$0xff]  ;;  %v4359_v33 = vld [vmem:[%s7351_s0 + $0x58] sm:$0xff]  ;;  %v155_v3 = vadd.f32 %v154_v39, %v4317_v16  ;;  %v4368_v32 = vld [vmem:[%s7351_s0 + $0x60] sm:$0xff]  ;;  %188 = vadd.xlane.f32.xlu0 %v187_v15 }
  0x3d   :  { %7571 = vst [vmem:[#allocation69_spill] sm:$0xff] %v4353_v45  ;;  %v159_v24 = vsel %vm149_vm0, %v4353_v45, 0.0  ;;  %v147_v41 = vadd.f32 %v146_v57, %v4331_v46  ;;  %v169_v34 = vadd.f32 %v168_v58, %v167_v54  ;;  %v7421_v45 = vmov 0  }
  0x3e   :  { %v156_v51 = vadd.f32 %v155_v3, %v4337_v53  ;;  %3550 = vset.pattern.permute.xlu1 %v7421_v45  ;;  %3551 = vset.pattern.permute.xlu0 %v7421_v45 }
  0x3f   :  { %v148_v39 = vadd.f32 %v147_v41, %v4346_v63  ;;  %1609 = vmatprep.mubr.bf16.mxu0 %v7421_v45  ;;  %1849 = vmatprep.mubr.bf16.mxu1 %v7421_v45 }
  0x40   :  { %v157_v16 = vadd.f32 %v156_v51, %v4359_v33  ;;  %170 = vadd.xlane.f32.xlu0 %v169_v34 }
  0x41   :  { %v151_v22 = vadd.f32 %v150_v8, %v148_v39 }
  0x42   :  { %v158_v47 = vadd.f32 %v157_v16, %v4368_v32 }
  0x44   :  { %v160_v28 = vadd.f32 %v159_v24, %v158_v47  ;;  %152 = vadd.xlane.f32.xlu0 %v151_v22 }
  0x46   :  { %161 = vadd.xlane.f32.xlu1 %v160_v28 }
  0xa3   :  { %v279_v57 = vpop.xlane.xlu0 %278 }
  0xa4   :  { %v303_v54 = vmul.f32 0.0012755102, %v279_v57 }
  0xa5   :  { %v261_v31 = vpop.xlane.xlu1 %260 }
  0xa6   :  { %v301_v51 = vmul.f32 0.0012755102, %v261_v31  ;;  %v4380_v16 = vsub.f32 %v3690_v0, %v303_v54  ;;  %v4383_v34 = vsub.f32 %v3695_v1, %v303_v54  ;;  %v4386_v58 = vsub.f32 %v3700_v2, %v303_v54 }
  0xa7   :  { %v4389_v8 = vsub.f32 %v3707_v4, %v303_v54  ;;  %v4392_v3 = vsub.f32 %v3722_v7, %v303_v54  ;;  %v4395_v24 = vsub.f32 %v3750_v14, %v303_v54  ;;  %v288_v15 = vpop.xlane.xlu0 %287  ;;  %v4398_v41 = vsub.f32 %v3735_v11, %v303_v54 }
  0xa8   :  { %v515_v0 = vmul.f32 %v4380_v16, %v4380_v16  ;;  %v516_v1 = vmul.f32 %v4383_v34, %v4383_v34  ;;  %v304_v2 = vmul.f32 0.0012755102, %v288_v15  ;;  %v517_v4 = vmul.f32 %v4386_v58, %v4386_v58 }
  0xa9   :  { %7572 = vst [vmem:[#allocation70_spill] sm:$0xff] %v4395_v24  ;;  %v270_v39 = vpop.xlane.xlu1 %269  ;;  %v518_v7 = vmul.f32 %v4389_v8, %v4389_v8  ;;  %v519_v14 = vmul.f32 %v4392_v3, %v4392_v3  ;;  %v4411_v11 = vsub.f32 %v3712_v5, %v301_v51  ;;  %v521_v22 = vmul.f32 %v4395_v24, %v4395_v24 }
  0xaa   :  { %v655_v47 = vadd.f32 %v516_v1, %v515_v0  ;;  %v4416_v28 = vsub.f32 %v3745_v13, %v304_v2  ;;  %v4419_v57 = vsub.f32 %v3757_v17, %v304_v2  ;;  %v4422_v54 = vsub.f32 %v3762_v18, %v304_v2 }
  0xab   :  { %7573 = vst [vmem:[#allocation71_spill] sm:$0xff] %v4411_v11  ;;  %v520_v31 = vmul.f32 %v4398_v41, %v4398_v41  ;;  %v4427_v0 = vsub.f32 %v3777_v21, %v304_v2  ;;  %v4430_v5 = vsub.f32 %v3808_v30, %v304_v2  ;;  %v4433_v1 = vsub.f32 %v3840_v40, %v304_v2 }
  0xac   :  { %7574 = vst [vmem:[#allocation72_spill] sm:$0xff] %v4416_v28  ;;  %7575 = vst [vmem:[#allocation73_spill] sm:$0xff] %v4419_v57  ;;  %v656_v15 = vadd.f32 %v655_v47, %v517_v4  ;;  %v522_v13 = vmul.f32 %v4416_v28, %v4416_v28  ;;  %v523_v17 = vmul.f32 %v4419_v57, %v4419_v57  ;;  %v302_v45 = vmul.f32 0.0012755102, %v270_v39 }
  0xad   :  { %7576 = vst [vmem:[#allocation74_spill] sm:$0xff] %v4430_v5  ;;  %7577 = vst [vmem:[#allocation75_spill] sm:$0xff] %v4433_v1  ;;  %v4440_v18 = vsub.f32 %v3717_v6, %v301_v51  ;;  %v252_v4 = vpop.xlane.xlu1 %251  ;;  %v4443_v21 = vsub.f32 %v3818_v35, %v304_v2  ;;  %v4446_v30 = vsub.f32 %v3728_v9, %v301_v51  ;;  %v660_v40 = vsel %vm149_vm0, %v521_v22, 0.0 }
  0xae   :  { %v657_v47 = vadd.f32 %v656_v15, %v518_v7  ;;  %v524_v28 = vmul.f32 %v4422_v54, %v4422_v54  ;;  %v528_v57 = vmul.f32 %v4433_v1, %v4433_v1  ;;  %v664_v24 = vadd.f32 %v523_v17, %v522_v13 }
  0xaf   :  { %7578 = vst [vmem:[#allocation76_spill] sm:$0xff] %v4440_v18  ;;  %7579 = vst [vmem:[#allocation77_spill] sm:$0xff] %v4446_v30  ;;  %v525_v39 = vmul.f32 %v4427_v0, %v4427_v0  ;;  %v526_v35 = vmul.f32 %v4430_v5, %v4430_v5  ;;  %v4458_v2 = vsub.f32 %v3740_v12, %v301_v51  ;;  %v4460_v9 = vmul.f32 0.0012755102, %v252_v4 }
  0xb0   :  { %v658_v6 = vadd.f32 %v657_v47, %v519_v14  ;;  %v243_v7 = vpop.xlane.xlu0 %242  ;;  %v665_v22 = vadd.f32 %v664_v24, %v524_v28  ;;  %v4463_v15 = vsub.f32 %v3772_v20, %v301_v51  ;;  %v501_v13 = vmul.f32 %v4411_v11, %v4411_v11 }
  0xb1   :  { %v234_v14 = vpop.xlane.xlu1 %233  ;;  %v527_v47 = vmul.f32 %v4443_v21, %v4443_v21  ;;  %v502_v1 = vmul.f32 %v4440_v18, %v4440_v18  ;;  %v503_v12 = vmul.f32 %v4446_v30, %v4446_v30  ;;  %v669_v24 = vsel %vm149_vm0, %v528_v57, 0.0 }
  0xb2   :  { %7580 = vst [vmem:[#allocation78_spill] sm:$0xff] %v4463_v15  ;;  %v659_v17 = vadd.f32 %v658_v6, %v520_v31  ;;  %v666_v4 = vadd.f32 %v665_v22, %v525_v39  ;;  %v4475_v20 = vsub.f32 %v3767_v19, %v301_v51  ;;  %v4478_v28 = vsub.f32 %v3803_v29, %v301_v51 }
  0xb3   :  { %v504_v31 = vmul.f32 %v4458_v2, %v4458_v2  ;;  %v507_v6 = vmul.f32 %v4463_v15, %v4463_v15  ;;  %v637_v18 = vadd.f32 %v502_v1, %v501_v13  ;;  %v4485_v30 = vsub.f32 %v3786_v25, %v302_v45 }
  0xb4   :  { %v661_v11 = vadd.f32 %v660_v40, %v659_v17  ;;  %v667_v5 = vadd.f32 %v666_v4, %v526_v35  ;;  %v4488_v57 = vsub.f32 %v3791_v26, %v302_v45  ;;  %v4491_v19 = vsub.f32 %v3796_v27, %v302_v45 }
  0xb5   :  { %v4493_v29 = vmul.f32 0.0012755102, %v234_v14  ;;  %v4495_v51 = vmul.f32 0.0012755102, %v243_v7  ;;  %v216_v40 = vpop.xlane.xlu1 %215  ;;  %v638_v22 = vadd.f32 %v637_v18, %v503_v12  ;;  %v4498_v1 = vsub.f32 %v3823_v36, %v302_v45 }
  0xb6   :  { %662 = vadd.xlane.f32.xlu0 %v661_v11  ;;  %v668_v35 = vadd.f32 %v667_v5, %v527_v47  ;;  %v505_v25 = vmul.f32 %v4475_v20, %v4475_v20  ;;  %v506_v26 = vmul.f32 %v4478_v28, %v4478_v28  ;;  %v4505_v27 = vsub.f32 %v3846_v42, %v302_v45 }
  0xb7   :  { %v225_v39 = vpop.xlane.xlu0 %224  ;;  %v639_v13 = vadd.f32 %v638_v22, %v504_v31  ;;  %v4508_v7 = vsub.f32 %v3876_v52, %v302_v45  ;;  %v508_v11 = vmul.f32 %v4485_v30, %v4485_v30  ;;  %v509_v36 = vmul.f32 %v4488_v57, %v4488_v57 }
  0xb8   :  { %v670_v5 = vadd.f32 %v669_v24, %v668_v35  ;;  %v642_v18 = vsel %vm149_vm0, %v507_v6, 0.0  ;;  %v4516_v14 = vsub.f32 %v3860_v48, %v302_v45  ;;  %v510_v42 = vmul.f32 %v4491_v19, %v4491_v19 }
  0xb9   :  { %7581 = vst [vmem:[#allocation79_spill] sm:$0xff] %v4508_v7  ;;  %v4520_v17 = vmul.f32 0.0012755102, %v216_v40  ;;  %v640_v52 = vadd.f32 %v639_v13, %v505_v25  ;;  %v511_v4 = vmul.f32 %v4498_v1, %v4498_v1  ;;  %v646_v31 = vadd.f32 %v509_v36, %v508_v11 }
  0xba   :  { %v198_v47 = vpop.xlane.xlu1 %197  ;;  %v4524_v22 = vmul.f32 0.0012755102, %v225_v39  ;;  %671 = vadd.xlane.f32.xlu1 %v670_v5  ;;  %v514_v24 = vmul.f32 %v4508_v7, %v4508_v7  ;;  %v4530_v48 = vsub.f32 %v3828_v37, %v4460_v9  ;;  %v4534_v45 = vsub.f32 %v3833_v38, %v4460_v9 }
  0xbb   :  { %v641_v6 = vadd.f32 %v640_v52, %v506_v26  ;;  %v512_v40 = vmul.f32 %v4505_v27, %v4505_v27  ;;  %v647_v35 = vadd.f32 %v646_v31, %v510_v42  ;;  %v4540_v39 = vsub.f32 %v3852_v44, %v4460_v9 }
  0xbc   :  { %v4542_v25 = vmul.f32 0.0012755102, %v198_v47  ;;  %v513_v13 = vmul.f32 %v4516_v14, %v4516_v14  ;;  %v4548_v37 = vsub.f32 %v3865_v49, %v4460_v9  ;;  %v4552_v38 = vsub.f32 %v3895_v59, %v4460_v9 }
  0xbd   :  { %v643_v26 = vadd.f32 %v642_v18, %v641_v6  ;;  %v648_v36 = vadd.f32 %v647_v35, %v511_v4  ;;  %v494_v44 = vmul.f32 %v4530_v48, %v4530_v48  ;;  %v495_v5 = vmul.f32 %v4534_v45, %v4534_v45 }
  0xbe   :  { %v207_v12 = vpop.xlane.xlu0 %206  ;;  %v651_v47 = vsel %vm149_vm0, %v514_v24, 0.0  ;;  %v4563_v49 = vsub.f32 %v3932_v23, %v4460_v9  ;;  %v496_v59 = vmul.f32 %v4540_v39, %v4540_v39  ;;  %v4571_v31 = vsub.f32 %v3900_v60, %v4460_v9 }
  0xbf   :  { %v4558_v42 = vmul.f32 0.0012755102, %v207_v12  ;;  %644 = vadd.xlane.f32.xlu0 %v643_v26  ;;  %v649_v4 = vadd.f32 %v648_v36, %v512_v40  ;;  %v497_v12 = vmul.f32 %v4548_v37, %v4548_v37  ;;  %v628_v24 = vadd.f32 %v495_v5, %v494_v44 }
  0xc0   :  { %7582 = vst [vmem:[#allocation80_spill] sm:$0xff] %v4571_v31  ;;  %v4577_v6 = vsub.f32 %v3870_v50, %v4493_v29  ;;  %v4581_v23 = vsub.f32 %v3883_v55, %v4493_v29  ;;  %v4585_v35 = vsub.f32 %v3888_v56, %v4493_v29  ;;  %v498_v60 = vmul.f32 %v4552_v38, %v4552_v38  ;;  %v7587_v55 = vld [vmem:[#allocation13_spill] sm:$0xff] }
  0xc1   :  { %v180_v11 = vpop.xlane.xlu1 %179  ;;  %v650_v40 = vadd.f32 %v649_v4, %v513_v13  ;;  %v4593_v9 = vsub.f32 %v3905_v61, %v4493_v29  ;;  %v499_v50 = vmul.f32 %v4563_v49, %v4563_v49  ;;  %v4599_v36 = vsub.f32 %v7587_v55, %v4493_v29 }
  0xc2   :  { %v4567_v18 = vmul.f32 0.0012755102, %v180_v11  ;;  %7583 = vst [vmem:[#allocation81_spill] sm:$0xff] %v4577_v6  ;;  %7584 = vst [vmem:[#allocation82_spill] sm:$0xff] %v4581_v23  ;;  %v629_v11 = vadd.f32 %v628_v24, %v496_v59  ;;  %v480_v56 = vmul.f32 %v4577_v6, %v4577_v6  ;;  %v500_v44 = vmul.f32 %v4571_v31, %v4571_v31  ;;  %v7589_v59 = vld [vmem:[#allocation8_spill] sm:$0xff]  ;;  %v7592_v6 = vld [vmem:[#allocation5_spill] sm:$0xff] }
  0xc3   :  { %7585 = vst [vmem:[#allocation83_spill] sm:$0xff] %v4585_v35  ;;  %7586 = vst [vmem:[#allocation84_spill] sm:$0xff] %v4593_v9  ;;  %v652_v13 = vadd.f32 %v651_v47, %v650_v40  ;;  %v481_v5 = vmul.f32 %v4581_v23, %v4581_v23  ;;  %v482_v61 = vmul.f32 %v4585_v35, %v4585_v35  ;;  %v7591_v24 = vld [vmem:[#allocation12_spill] sm:$0xff]  ;;  %v7601_v23 = vld [vmem:[#allocation21_spill] sm:$0xff] }
  0xc4   :  { %7588 = vst [vmem:[#allocation13_spill] sm:$0xff] %v4599_v36  ;;  %v4611_v4 = vsub.f32 %v7589_v59, %v4493_v29  ;;  %v4615_v55 = vsub.f32 %v7591_v24, %v4493_v29  ;;  %v483_v47 = vmul.f32 %v4593_v9, %v4593_v9  ;;  %v486_v40 = vmul.f32 %v4599_v36, %v4599_v36  ;;  %v7596_v29 = vld [vmem:[#allocation7_spill] sm:$0xff]  ;;  %v7598_v9 = vld [vmem:[#allocation9_spill] sm:$0xff] }
  0xc5   :  { %v189_v52 = vpop.xlane.xlu0 %188  ;;  %653 = vadd.xlane.f32.xlu1 %v652_v13  ;;  %v610_v31 = vadd.f32 %v481_v5, %v480_v56  ;;  %v4623_v35 = vsub.f32 %v7592_v6, %v4495_v51  ;;  %v4631_v24 = vsub.f32 %v7596_v29, %v4495_v51  ;;  %v4635_v13 = vsub.f32 %v7598_v9, %v4495_v51  ;;  %v7599_v36 = vld [vmem:[#allocation15_spill] sm:$0xff] }
  0xc6   :  { %v4587_v26 = vmul.f32 0.0012755102, %v189_v52  ;;  %v630_v52 = vadd.f32 %v629_v11, %v497_v12  ;;  %7590 = vst [vmem:[#allocation8_spill] sm:$0xff] %v4611_v4  ;;  %v7594_v12 = vld [vmem:[#allocation6_spill] sm:$0xff]  ;;  %v4639_v56 = vsub.f32 %v7599_v36, %v4495_v51  ;;  %v633_v6 = vsel %vm149_vm0, %v500_v44, 0.0 }
  0xc7   :  { %7593 = vst [vmem:[#allocation12_spill] sm:$0xff] %v4623_v35  ;;  %v4627_v11 = vsub.f32 %v7594_v12, %v4495_v51  ;;  %7597 = vst [vmem:[#allocation6_spill] sm:$0xff] %v4631_v24  ;;  %v611_v5 = vadd.f32 %v610_v31, %v482_v61  ;;  %v4644_v12 = vsub.f32 %v7601_v23, %v4495_v51 }
  0xc8   :  { %v631_v59 = vadd.f32 %v630_v52, %v498_v60  ;;  %7600 = vst [vmem:[#allocation7_spill] sm:$0xff] %v4639_v56  ;;  %v7603_v60 = vld [vmem:[#allocation18_spill] sm:$0xff]  ;;  %v487_v9 = vmul.f32 %v4623_v35, %v4623_v35  ;;  %v489_v36 = vmul.f32 %v4631_v24, %v4631_v24  ;;  %v484_v31 = vmul.f32 %v4611_v4, %v4611_v4  ;;  %v7607_v4 = vld [vmem:[#allocation11_spill] sm:$0xff] }
  0xc9   :  { %7595 = vst [vmem:[#allocation5_spill] sm:$0xff] %v4627_v11  ;;  %7602 = vst [vmem:[#allocation9_spill] sm:$0xff] %v4644_v12  ;;  %v4648_v52 = vsub.f32 %v7603_v60, %v4495_v51  ;;  %v488_v7 = vmul.f32 %v4627_v11, %v4627_v11  ;;  %v485_v23 = vmul.f32 %v4615_v55, %v4615_v55  ;;  %v615_v51 = vsel %vm149_vm0, %v486_v40, 0.0  ;;  %v7605_v24 = vld [vmem:[#allocation10_spill] sm:$0xff] }
  0xca   :  { %v632_v29 = vadd.f32 %v631_v59, %v499_v50  ;;  %v612_v44 = vadd.f32 %v611_v5, %v483_v47  ;;  %v490_v50 = vmul.f32 %v4635_v13, %v4635_v13  ;;  %v491_v59 = vmul.f32 %v4639_v56, %v4639_v56  ;;  %v7609_v47 = vld [vmem:[#allocation14_spill] sm:$0xff] }
  0xcb   :  { %7604 = vst [vmem:[#allocation15_spill] sm:$0xff] %v4648_v52  ;;  %v619_v60 = vadd.f32 %v488_v7, %v487_v9  ;;  %v4667_v11 = vsub.f32 %v7605_v24, %v4520_v17  ;;  %v4671_v15 = vsub.f32 %v7607_v4, %v4520_v17  ;;  %v4675_v40 = vsub.f32 %v7609_v47, %v4520_v17  ;;  %v7611_v24 = vld [vmem:[#allocation16_spill] sm:$0xff]  ;;  %v7613_v4 = vld [vmem:[#allocation22_spill] sm:$0xff] }
  0xcc   :  { %v634_v61 = vadd.f32 %v633_v6, %v632_v29  ;;  %v613_v35 = vadd.f32 %v612_v44, %v484_v31  ;;  %v171_v6 = vpop.xlane.xlu0 %170  ;;  %v492_v5 = vmul.f32 %v4644_v12, %v4644_v12  ;;  %v493_v7 = vmul.f32 %v4648_v52, %v4648_v52  ;;  %v7615_v47 = vld [vmem:[#allocation28_spill] sm:$0xff]  ;;  %v7617_v52 = vld [vmem:[#allocation27_spill] sm:$0xff] }
  0xcd   :  { %7606 = vst [vmem:[#allocation21_spill] sm:$0xff] %v4667_v11  ;;  %7608 = vst [vmem:[#allocation18_spill] sm:$0xff] %v4671_v15  ;;  %v620_v29 = vadd.f32 %v619_v60, %v489_v36  ;;  %v4683_v9 = vsub.f32 %v7611_v24, %v4520_v17  ;;  %v4687_v44 = vsub.f32 %v7613_v4, %v4520_v17 }
  0xce   :  { %7610 = vst [vmem:[#allocation10_spill] sm:$0xff] %v4675_v40  ;;  %635 = vadd.xlane.f32.xlu1 %v634_v61  ;;  %v614_v31 = vadd.f32 %v613_v35, %v485_v23  ;;  %v4691_v61 = vsub.f32 %v7615_v47, %v4520_v17  ;;  %v466_v56 = vmul.f32 %v4667_v11, %v4667_v11  ;;  %v4703_v23 = vmul.f32 0.0012755102, %v171_v6  ;;  %v7621_v11 = vld [vmem:[#allocation19_spill] sm:$0xff] }
  0xcf   :  { %7612 = vst [vmem:[#allocation11_spill] sm:$0xff] %v4683_v9  ;;  %7614 = vst [vmem:[#allocation14_spill] sm:$0xff] %v4687_v44  ;;  %v621_v12 = vadd.f32 %v620_v29, %v490_v50  ;;  %v4697_v36 = vsub.f32 %v7617_v52, %v4520_v17  ;;  %v467_v60 = vmul.f32 %v4671_v15, %v4671_v15  ;;  %v7619_v17 = vld [vmem:[#allocation17_spill] sm:$0xff]  ;;  %v624_v6 = vsel %vm149_vm0, %v493_v7, 0.0 }
  0xd0   :  { %7616 = vst [vmem:[#allocation16_spill] sm:$0xff] %v4691_v61  ;;  %v468_v35 = vmul.f32 %v4675_v40, %v4675_v40  ;;  %v616_v24 = vadd.f32 %v615_v51, %v614_v31  ;;  %v469_v4 = vmul.f32 %v4683_v9, %v4683_v9  ;;  %v472_v47 = vmul.f32 %v4691_v61, %v4691_v61  ;;  %v7623_v31 = vld [vmem:[#allocation20_spill] sm:$0xff]  ;;  %v7628_v7 = vld [vmem:[#allocation33_spill] sm:$0xff] }
  0xd1   :  { %7618 = vst [vmem:[#allocation22_spill] sm:$0xff] %v4697_v36  ;;  %v622_v50 = vadd.f32 %v621_v12, %v491_v59  ;;  %v592_v29 = vadd.f32 %v467_v60, %v466_v56  ;;  %v4711_v52 = vsub.f32 %v7619_v17, %v4524_v22  ;;  %v4715_v15 = vsub.f32 %v7621_v11, %v4524_v22  ;;  %v7625_v56 = vld [vmem:[#allocation23_spill] sm:$0xff] }
  0xd2   :  { %617 = vadd.xlane.f32.xlu1 %v616_v24  ;;  %v470_v51 = vmul.f32 %v4687_v44, %v4687_v44  ;;  %v4722_v40 = vsub.f32 %v7623_v31, %v4524_v22  ;;  %v4726_v12 = vsub.f32 %v7625_v56, %v4524_v22  ;;  %v471_v60 = vmul.f32 %v4697_v36, %v4697_v36  ;;  %v7626_v24 = vld [vmem:[#allocation29_spill] sm:$0xff] }
  0xd3   :  { %7620 = vst [vmem:[#allocation28_spill] sm:$0xff] %v4711_v52  ;;  %7622 = vst [vmem:[#allocation27_spill] sm:$0xff] %v4715_v15  ;;  %v623_v59 = vadd.f32 %v622_v50, %v492_v5  ;;  %v593_v11 = vadd.f32 %v592_v29, %v468_v35  ;;  %v4732_v17 = vsub.f32 %v7626_v24, %v4524_v22  ;;  %v597_v35 = vsel %vm149_vm0, %v472_v47, 0.0 }
  0xd4   :  { %7624 = vst [vmem:[#allocation17_spill] sm:$0xff] %v4722_v40  ;;  %v4736_v61 = vsub.f32 %v7628_v7, %v4524_v22  ;;  %v473_v31 = vmul.f32 %v4711_v52, %v4711_v52  ;;  %v474_v56 = vmul.f32 %v4715_v15, %v4715_v15  ;;  %v475_v5 = vmul.f32 %v4722_v40, %v4722_v40  ;;  %v7630_v52 = vld [vmem:[#allocation24_spill] sm:$0xff]  ;;  %v7632_v15 = vld [vmem:[#allocation25_spill] sm:$0xff] }
  0xd5   :  { %7627 = vst [vmem:[#allocation19_spill] sm:$0xff] %v4732_v17  ;;  %v625_v50 = vadd.f32 %v624_v6, %v623_v59  ;;  %v594_v44 = vadd.f32 %v593_v11, %v469_v4  ;;  %v4747_v29 = vsub.f32 %v4076_v10, %v4524_v22  ;;  %v476_v24 = vmul.f32 %v4726_v12, %v4726_v12  ;;  %v7634_v10 = vld [vmem:[#allocation26_spill] sm:$0xff]  ;;  %v7645_v40 = vld [vmem:[#allocation32_spill] sm:$0xff] }
  0xd6   :  { %7629 = vst [vmem:[#allocation20_spill] sm:$0xff] %v4736_v61  ;;  %v601_v7 = vadd.f32 %v474_v56, %v473_v31  ;;  %v4753_v36 = vsub.f32 %v7630_v52, %v4542_v25  ;;  %v4757_v9 = vsub.f32 %v7632_v15, %v4542_v25  ;;  %v477_v47 = vmul.f32 %v4732_v17, %v4732_v17  ;;  %v7636_v6 = vld [vmem:[#allocation30_spill] sm:$0xff] }
  0xd7   :  { %626 = vadd.xlane.f32.xlu0 %v625_v50  ;;  %v595_v4 = vadd.f32 %v594_v44, %v470_v51  ;;  %v4763_v22 = vsub.f32 %v7634_v10, %v4542_v25  ;;  %v4767_v59 = vsub.f32 %v7636_v6, %v4542_v25  ;;  %v479_v52 = vmul.f32 %v4736_v61, %v4736_v61  ;;  %v7638_v15 = vld [vmem:[#allocation34_spill] sm:$0xff]  ;;  %v7640_v44 = vld [vmem:[#allocation39_spill] sm:$0xff] }
  0xd8   :  { %7631 = vst [vmem:[#allocation23_spill] sm:$0xff] %v4753_v36  ;;  %7633 = vst [vmem:[#allocation29_spill] sm:$0xff] %v4757_v9  ;;  %v602_v11 = vadd.f32 %v601_v7, %v475_v5  ;;  %v4773_v31 = vsub.f32 %v7638_v15, %v4542_v25  ;;  %v4777_v51 = vsub.f32 %v7640_v44, %v4542_v25  ;;  %v7642_v15 = vld [vmem:[#allocation36_spill] sm:$0xff] }
  0xd9   :  { %7635 = vst [vmem:[#allocation33_spill] sm:$0xff] %v4763_v22  ;;  %7637 = vst [vmem:[#allocation24_spill] sm:$0xff] %v4767_v59  ;;  %v596_v56 = vadd.f32 %v595_v4, %v471_v60  ;;  %v452_v50 = vmul.f32 %v4753_v36, %v4753_v36  ;;  %v453_v10 = vmul.f32 %v4757_v9, %v4757_v9  ;;  %v7643_v9 = vld [vmem:[#allocation31_spill] sm:$0xff] }
  0xda   :  { %7639 = vst [vmem:[#allocation25_spill] sm:$0xff] %v4773_v31  ;;  %7641 = vst [vmem:[#allocation26_spill] sm:$0xff] %v4777_v51  ;;  %v454_v6 = vmul.f32 %v4763_v22, %v4763_v22  ;;  %v478_v5 = vmul.f32 %v4747_v29, %v4747_v29  ;;  %v603_v7 = vadd.f32 %v602_v11, %v476_v24 }
  0xdb   :  { %v4789_v61 = vsub.f32 %v7642_v15, %v4542_v25  ;;  %v455_v60 = vmul.f32 %v4767_v59, %v4767_v59  ;;  %v598_v4 = vadd.f32 %v597_v35, %v596_v56  ;;  %v458_v44 = vmul.f32 %v4777_v51, %v4777_v51  ;;  %v7647_v25 = vld [vmem:[#allocation35_spill] sm:$0xff]  ;;  %v7649_v15 = vld [vmem:[#allocation37_spill] sm:$0xff] }
  0xdc   :  { %v574_v36 = vadd.f32 %v453_v10, %v452_v50  ;;  %v4797_v17 = vsub.f32 %v7643_v9, %v4558_v42  ;;  %v604_v22 = vadd.f32 %v603_v7, %v477_v47  ;;  %v4801_v24 = vsub.f32 %v7645_v40, %v4558_v42  ;;  %v7651_v47 = vld [vmem:[#allocation42_spill] sm:$0xff]  ;;  %v7653_v7 = vld [vmem:[#allocation48_spill] sm:$0xff] }
  0xdd   :  { %v4805_v11 = vsub.f32 %v7647_v25, %v4558_v42  ;;  %v4809_v35 = vsub.f32 %v7649_v15, %v4558_v42  ;;  %599 = vadd.xlane.f32.xlu1 %v598_v4  ;;  %v606_v56 = vsel %vm149_vm0, %v479_v52, 0.0  ;;  %v456_v9 = vmul.f32 %v4773_v31, %v4773_v31 }
  0xde   :  { %7644 = vst [vmem:[#allocation30_spill] sm:$0xff] %v4797_v17  ;;  %7646 = vst [vmem:[#allocation34_spill] sm:$0xff] %v4801_v24  ;;  %v575_v50 = vadd.f32 %v574_v36, %v454_v6  ;;  %v4816_v10 = vsub.f32 %v7651_v47, %v4558_v42  ;;  %v605_v40 = vadd.f32 %v604_v22, %v478_v5  ;;  %v7655_v36 = vld [vmem:[#allocation43_spill] sm:$0xff]  ;;  %v579_v47 = vsel %vm149_vm0, %v458_v44, 0.0 }
  0xdf   :  { %7648 = vst [vmem:[#allocation39_spill] sm:$0xff] %v4805_v11  ;;  %7650 = vst [vmem:[#allocation36_spill] sm:$0xff] %v4809_v35  ;;  %v4820_v25 = vsub.f32 %v7653_v7, %v4558_v42  ;;  %v459_v15 = vmul.f32 %v4797_v17, %v4797_v17  ;;  %v460_v4 = vmul.f32 %v4801_v24, %v4801_v24  ;;  %v7657_v24 = vld [vmem:[#allocation38_spill] sm:$0xff] }
  0xe0   :  { %7652 = vst [vmem:[#allocation31_spill] sm:$0xff] %v4816_v10  ;;  %v457_v52 = vmul.f32 %v4789_v61, %v4789_v61  ;;  %v576_v51 = vadd.f32 %v575_v50, %v455_v60  ;;  %v4830_v6 = vsub.f32 %v7655_v36, %v4558_v42  ;;  %v461_v22 = vmul.f32 %v4805_v11, %v4805_v11  ;;  %v7659_v60 = vld [vmem:[#allocation40_spill] sm:$0xff]  ;;  %v7661_v42 = vld [vmem:[#allocation41_spill] sm:$0xff]  ;;  %v7666_v11 = vld [vmem:[#allocation50_spill] sm:$0xff] }
  0xe1   :  { %7654 = vst [vmem:[#allocation32_spill] sm:$0xff] %v4820_v25  ;;  %v607_v5 = vadd.f32 %v606_v56, %v605_v40  ;;  %v462_v7 = vmul.f32 %v4809_v35, %v4809_v35  ;;  %v583_v31 = vadd.f32 %v460_v4, %v459_v15  ;;  %v4839_v59 = vsub.f32 %v7657_v24, %v4567_v18  ;;  %v153_v56 = vpop.xlane.xlu0 %152  ;;  %v7663_v24 = vld [vmem:[#allocation44_spill] sm:$0xff] }
  0xe2   :  { %7656 = vst [vmem:[#allocation35_spill] sm:$0xff] %v4830_v6  ;;  %v577_v17 = vadd.f32 %v576_v51, %v456_v9  ;;  %v4843_v50 = vsub.f32 %v7659_v60, %v4567_v18  ;;  %v4847_v36 = vsub.f32 %v7661_v42, %v4567_v18  ;;  %v463_v44 = vmul.f32 %v4816_v10, %v4816_v10  ;;  %v7664_v60 = vld [vmem:[#allocation49_spill] sm:$0xff] }
  0xe3   :  { %7658 = vst [vmem:[#allocation37_spill] sm:$0xff] %v4839_v59  ;;  %608 = vadd.xlane.f32.xlu0 %v607_v5  ;;  %v464_v51 = vmul.f32 %v4820_v25, %v4820_v25  ;;  %v584_v9 = vadd.f32 %v583_v31, %v461_v22  ;;  %v4855_v40 = vsub.f32 %v7663_v24, %v4567_v18  ;;  %v7667_v24 = vld [vmem:[#allocation54_spill] sm:$0xff] }
  0xe4   :  { %7660 = vst [vmem:[#allocation42_spill] sm:$0xff] %v4843_v50  ;;  %7662 = vst [vmem:[#allocation48_spill] sm:$0xff] %v4847_v36  ;;  %v578_v15 = vadd.f32 %v577_v17, %v457_v52  ;;  %v465_v4 = vmul.f32 %v4830_v6, %v4830_v6  ;;  %v4861_v42 = vsub.f32 %v7664_v60, %v4567_v18  ;;  %v4873_v52 = vmul.f32 0.0012755102, %v153_v56  ;;  %v7673_v56 = vld [vmem:[#allocation47_spill] sm:$0xff] }
  0xe5   :  { %v438_v5 = vmul.f32 %v4839_v59, %v4839_v59  ;;  %v585_v10 = vadd.f32 %v584_v9, %v462_v7  ;;  %v4867_v25 = vsub.f32 %v7666_v11, %v4567_v18  ;;  %v439_v31 = vmul.f32 %v4843_v50, %v4843_v50  ;;  %v7669_v11 = vld [vmem:[#allocation45_spill] sm:$0xff]  ;;  %v7671_v50 = vld [vmem:[#allocation46_spill] sm:$0xff] }
  0xe6   :  { %7665 = vst [vmem:[#allocation43_spill] sm:$0xff] %v4861_v42  ;;  %v440_v17 = vmul.f32 %v4847_v36, %v4847_v36  ;;  %v580_v22 = vadd.f32 %v579_v47, %v578_v15  ;;  %v4877_v60 = vsub.f32 %v7667_v24, %v4567_v18  ;;  %v441_v7 = vmul.f32 %v4855_v40, %v4855_v40 }
  0xe7   :  { %v586_v9 = vadd.f32 %v585_v10, %v463_v44  ;;  %v556_v6 = vadd.f32 %v439_v31, %v438_v5  ;;  %v4883_v59 = vsub.f32 %v7669_v11, %v4587_v26  ;;  %v4887_v35 = vsub.f32 %v7671_v50, %v4587_v26  ;;  %v7675_v10 = vld [vmem:[#allocation51_spill] sm:$0xff] }
  0xe8   :  { %7668 = vst [vmem:[#allocation38_spill] sm:$0xff] %v4877_v60  ;;  %581 = vadd.xlane.f32.xlu1 %v580_v22  ;;  %v588_v47 = vsel %vm149_vm0, %v465_v4, 0.0  ;;  %v442_v18 = vmul.f32 %v4861_v42, %v4861_v42  ;;  %v4894_v15 = vsub.f32 %v7673_v56, %v4587_v26  ;;  %v4898_v44 = vsub.f32 %v7675_v10, %v4587_v26  ;;  %v7676_v22 = vld [vmem:[#allocation55_spill] sm:$0xff]  ;;  %v7678_v4 = vld [vmem:[#allocation57_spill] sm:$0xff] }
  0xe9   :  { %7670 = vst [vmem:[#allocation40_spill] sm:$0xff] %v4883_v59  ;;  %7672 = vst [vmem:[#allocation41_spill] sm:$0xff] %v4887_v35  ;;  %v587_v5 = vadd.f32 %v586_v9, %v464_v51  ;;  %v443_v31 = vmul.f32 %v4867_v25, %v4867_v25  ;;  %v557_v50 = vadd.f32 %v556_v6, %v440_v17 }
  0xea   :  { %7674 = vst [vmem:[#allocation44_spill] sm:$0xff] %v4894_v15  ;;  %v4904_v24 = vsub.f32 %v7676_v22, %v4587_v26  ;;  %v4908_v11 = vsub.f32 %v7678_v4, %v4587_v26  ;;  %v445_v56 = vmul.f32 %v4883_v59, %v4883_v59  ;;  %v446_v10 = vmul.f32 %v4887_v35, %v4887_v35  ;;  %v7681_v59 = vld [vmem:[#allocation52_spill] sm:$0xff]  ;;  %v7683_v35 = vld [vmem:[#allocation53_spill] sm:$0xff] }
  0xeb   :  { %v447_v51 = vmul.f32 %v4894_v15, %v4894_v15  ;;  %v589_v9 = vadd.f32 %v588_v47, %v587_v5  ;;  %v444_v6 = vmul.f32 %v4877_v60, %v4877_v60  ;;  %v558_v17 = vadd.f32 %v557_v50, %v441_v7  ;;  %v7687_v5 = vld [vmem:[#allocation58_spill] sm:$0xff] }
  0xec   :  { %7677 = vst [vmem:[#allocation49_spill] sm:$0xff] %v4904_v24  ;;  %7679 = vst [vmem:[#allocation50_spill] sm:$0xff] %v4908_v11  ;;  %v4920_v22 = vsub.f32 %v4247_v43, %v4587_v26  ;;  %v448_v4 = vmul.f32 %v4898_v44, %v4898_v44  ;;  %v565_v42 = vadd.f32 %v446_v10, %v445_v56  ;;  %v7685_v43 = vld [vmem:[#allocation56_spill] sm:$0xff] }
  0xed   :  { %v4926_v36 = vsub.f32 %v7681_v59, %v4703_v23  ;;  %v4930_v15 = vsub.f32 %v7683_v35, %v4703_v23  ;;  %590 = vadd.xlane.f32.xlu0 %v589_v9  ;;  %v559_v47 = vadd.f32 %v558_v17, %v442_v18  ;;  %v449_v7 = vmul.f32 %v4904_v24, %v4904_v24  ;;  %v7689_v35 = vld [vmem:[#allocation63_spill] sm:$0xff]  ;;  %v7691_v18 = vld [vmem:[#allocation60_spill] sm:$0xff] }
  0xee   :  { %7680 = vst [vmem:[#allocation54_spill] sm:$0xff] %v4920_v22  ;;  %v4936_v26 = vsub.f32 %v7685_v43, %v4703_v23  ;;  %v4940_v50 = vsub.f32 %v7687_v5, %v4703_v23  ;;  %v451_v59 = vmul.f32 %v4908_v11, %v4908_v11  ;;  %v566_v56 = vadd.f32 %v565_v42, %v447_v51 }
  0xef   :  { %7682 = vst [vmem:[#allocation45_spill] sm:$0xff] %v4926_v36  ;;  %7684 = vst [vmem:[#allocation46_spill] sm:$0xff] %v4930_v15  ;;  %v4946_v10 = vsub.f32 %v7689_v35, %v4703_v23  ;;  %v4950_v9 = vsub.f32 %v7691_v18, %v4703_v23  ;;  %v560_v17 = vadd.f32 %v559_v47, %v443_v31  ;;  %v561_v42 = vsel %vm149_vm0, %v444_v6, 0.0  ;;  %v7696_v6 = vld [vmem:[#allocation61_spill] sm:$0xff] }
  0xf0   :  { %7686 = vst [vmem:[#allocation47_spill] sm:$0xff] %v4936_v26  ;;  %7688 = vst [vmem:[#allocation51_spill] sm:$0xff] %v4940_v50  ;;  %v431_v43 = vmul.f32 %v4926_v36, %v4926_v36  ;;  %v432_v5 = vmul.f32 %v4930_v15, %v4930_v15  ;;  %v433_v60 = vmul.f32 %v4936_v26, %v4936_v26  ;;  %v7694_v36 = vld [vmem:[#allocation59_spill] sm:$0xff] }
  0xf1   :  { %7690 = vst [vmem:[#allocation55_spill] sm:$0xff] %v4946_v10  ;;  %7692 = vst [vmem:[#allocation57_spill] sm:$0xff] %v4950_v9  ;;  %v450_v51 = vmul.f32 %v4920_v22, %v4920_v22  ;;  %v567_v35 = vadd.f32 %v566_v56, %v448_v4  ;;  %v4963_v18 = vsub.f32 %v4324_v62, %v4703_v23  ;;  %v7698_v4 = vld [vmem:[#allocation62_spill] sm:$0xff]  ;;  %v7700_v62 = vld [vmem:[#allocation64_spill] sm:$0xff] }
  0xf2   :  { %v562_v31 = vadd.f32 %v561_v42, %v560_v17  ;;  %v434_v47 = vmul.f32 %v4940_v50, %v4940_v50  ;;  %v547_v11 = vadd.f32 %v432_v5, %v431_v43  ;;  %v4969_v15 = vsub.f32 %v7694_v36, %v4873_v52 }
  0xf3   :  { %7693 = vst [vmem:[#allocation52_spill] sm:$0xff] %v4963_v18  ;;  %v568_v26 = vadd.f32 %v567_v35, %v449_v7  ;;  %v4973_v24 = vsub.f32 %v7696_v6, %v4873_v52  ;;  %v4977_v56 = vsub.f32 %v7698_v4, %v4873_v52  ;;  %v4981_v23 = vsub.f32 %v7700_v62, %v4873_v52  ;;  %v7703_v4 = vld [vmem:[#allocation65_spill] sm:$0xff] }
  0xf4   :  { %7695 = vst [vmem:[#allocation53_spill] sm:$0xff] %v4969_v15  ;;  %563 = vadd.xlane.f32.xlu1 %v562_v31  ;;  %v570_v17 = vsel %vm149_vm0, %v451_v59, 0.0  ;;  %v435_v36 = vmul.f32 %v4946_v10, %v4946_v10  ;;  %v437_v7 = vmul.f32 %v4950_v9, %v4950_v9  ;;  %v548_v43 = vadd.f32 %v547_v11, %v433_v60 }
  0xf5   :  { %7697 = vst [vmem:[#allocation56_spill] sm:$0xff] %v4973_v24  ;;  %7699 = vst [vmem:[#allocation58_spill] sm:$0xff] %v4977_v56  ;;  %v569_v5 = vadd.f32 %v568_v26, %v450_v51  ;;  %v4990_v42 = vsub.f32 %v4331_v46, %v4873_v52  ;;  %v417_v35 = vmul.f32 %v4969_v15, %v4969_v15 }
  0xf6   :  { %7701 = vst [vmem:[#allocation63_spill] sm:$0xff] %v4981_v23  ;;  %v418_v31 = vmul.f32 %v4973_v24, %v4973_v24  ;;  %v436_v59 = vmul.f32 %v4963_v18, %v4963_v18  ;;  %v549_v6 = vadd.f32 %v548_v43, %v434_v47  ;;  %v5000_v62 = vsub.f32 %v7703_v4, %v4873_v52 }
  0xf7   :  { %7702 = vst [vmem:[#allocation60_spill] sm:$0xff] %v4990_v42  ;;  %v419_v60 = vmul.f32 %v4977_v56, %v4977_v56  ;;  %v571_v11 = vadd.f32 %v570_v17, %v569_v5  ;;  %v5006_v46 = vsub.f32 %v4346_v63, %v4873_v52  ;;  %v420_v26 = vmul.f32 %v4981_v23, %v4981_v23 }
  0xf8   :  { %7704 = vst [vmem:[#allocation59_spill] sm:$0xff] %v5000_v62  ;;  %v529_v51 = vadd.f32 %v418_v31, %v417_v35  ;;  %v550_v15 = vadd.f32 %v549_v6, %v435_v36  ;;  %v552_v47 = vsel %vm149_vm0, %v437_v7, 0.0  ;;  %v421_v43 = vmul.f32 %v4990_v42, %v4990_v42  ;;  %v959_v7 = vld [vmem:[%s7353_s2 + $0x70] sm:$0xff] }
  0xf9   :  { %7705 = vst [vmem:[#allocation61_spill] sm:$0xff] %v5006_v46  ;;  %572 = vadd.xlane.f32.xlu0 %v571_v11  ;;  %v423_v17 = vmul.f32 %v5000_v62, %v5000_v62  ;;  %v422_v63 = vmul.f32 %v5006_v46, %v5006_v46  ;;  %v7706_v11 = vld [vmem:[#allocation66_spill] sm:$0xff] }
  0xfa   :  { %v530_v4 = vadd.f32 %v529_v51, %v419_v60  ;;  %v551_v24 = vadd.f32 %v550_v15, %v436_v59  ;;  %v960_v15 = vld [vmem:[%s7353_s2 + $0x78] sm:$0xff]  ;;  %v162_v59 = vpop.xlane.xlu1 %161  ;;  %v7708_v51 = vld [vmem:[#allocation67_spill] sm:$0xff] }
  0xfb   :  { %v534_v36 = vsel %vm149_vm0, %v423_v17, 0.0  ;;  %v290_v6 = vmul.f32 0.0012755102, %v162_v59  ;;  %v956_v60 = vld [vmem:[%s7353_s2 + $0x58] sm:$0xff] }
  0xfc   :  { %v531_v52 = vadd.f32 %v530_v4, %v420_v26  ;;  %v553_v5 = vadd.f32 %v552_v47, %v551_v24  ;;  %v957_v24 = vld [vmem:[%s7353_s2 + $0x60] sm:$0xff]  ;;  %v7710_v4 = vld [vmem:[#allocation68_spill] sm:$0xff] }
  0xfd   :  { %v5034_v26 = vsub.f32 %v7706_v11, %v290_v6  ;;  %v5037_v47 = vsub.f32 %v7708_v51, %v290_v6  ;;  %v5043_v17 = vsub.f32 %v7710_v4, %v290_v6  ;;  %v7715_v11 = vld [vmem:[#allocation69_spill] sm:$0xff] }
  0xfe   :  { %v532_v56 = vadd.f32 %v531_v52, %v421_v43  ;;  %554 = vadd.xlane.f32.xlu0 %v553_v5  ;;  %v954_v43 = vld [vmem:[%s7353_s2 + $0x48] sm:$0xff]  ;;  %v952_v5 = vld [vmem:[%s7353_s2 + $0x38] sm:$0xff]  ;;  %v5071_v51 = vsub.f32 %v7715_v11, %v290_v6 }
  0xff   :  { %7707 = vst [vmem:[#allocation62_spill] sm:$0xff] %v5034_v26  ;;  %7709 = vst [vmem:[#allocation64_spill] sm:$0xff] %v5037_v47  ;;  %v425_v52 = vmul.f32 %v5037_v47, %v5037_v47 }
 0x100   :  { %v533_v35 = vadd.f32 %v532_v56, %v422_v63  ;;  %v958_v56 = vld [vmem:[%s7353_s2 + $0x68] sm:$0xff]  ;;  %7711 = vst [vmem:[#allocation65_spill] sm:$0xff] %v5043_v17  ;;  %v424_v63 = vmul.f32 %v5034_v26, %v5034_v26  ;;  %7716 = vst [vmem:[#allocation69_spill] sm:$0xff] %v5071_v51  ;;  %v430_v4 = vmul.f32 %v5071_v51, %v5071_v51 }
 0x101   :  { %v7719_v51 = vld [vmem:[#allocation70_spill] sm:$0xff] }
 0x102   :  { %v535_v31 = vadd.f32 %v534_v36, %v533_v35  ;;  %v5053_v36 = vsub.f32 %v4337_v53, %v290_v6  ;;  %v426_v35 = vmul.f32 %v5043_v17, %v5043_v17  ;;  %v5066_v53 = vsub.f32 %v4368_v32, %v290_v6 }
 0x104   :  { %536 = vadd.xlane.f32.xlu0 %v535_v31  ;;  %7712 = vst [vmem:[#allocation66_spill] sm:$0xff] %v5053_v36  ;;  %v538_v31 = vadd.f32 %v425_v52, %v424_v63  ;;  %7714 = vst [vmem:[#allocation68_spill] sm:$0xff] %v5066_v53  ;;  %v543_v52 = vsel %vm149_vm0, %v430_v4, 0.0  ;;  %v949_v4 = vld [vmem:[%s7353_s2 + $0x20] sm:$0xff] }
 0x105   :  { %1033 = vperm.xlu1 %3550, %v959_v7   ;;  %v950_v7 = vld [vmem:[%s7353_s2 + $0x28] sm:$0xff] }
 0x109   :  { %1038 = vperm.xlu1 %3550, %v960_v15   ;;  %v5061_v15 = vsub.f32 %v4359_v33, %v290_v6 }
 0x10b   :  { %7713 = vst [vmem:[#allocation67_spill] sm:$0xff] %v5061_v15  ;;  %v428_v59 = vmul.f32 %v5061_v15, %v5061_v15 }
 0x10d   :  { %1023 = vperm.xlu1 %3550, %v957_v24   ;;  %v427_v24 = vmul.f32 %v5053_v36, %v5053_v36 }
 0x111   :  { %1028 = vperm.xlu1 %3550, %v958_v56   ;;  %v539_v56 = vadd.f32 %v538_v31, %v426_v35  ;;  %v955_v31 = vld [vmem:[%s7353_s2 + $0x50] sm:$0xff] }
 0x11a   :  { %1018 = vperm.xlu0 %3551, %v956_v60   ;;  %v540_v60 = vadd.f32 %v539_v56, %v427_v24  ;;  %v953_v24 = vld [vmem:[%s7353_s2 + $0x40] sm:$0xff] }
 0x11c   :  { %v541_v33 = vadd.f32 %v540_v60, %v428_v59  ;;  %v951_v60 = vld [vmem:[%s7353_s2 + $0x30] sm:$0xff] }
 0x11e   :  { %1008 = vperm.xlu0 %3551, %v954_v43   ;;  %v429_v43 = vmul.f32 %v5066_v53, %v5066_v53 }
 0x120   :  { %v542_v63 = vadd.f32 %v541_v33, %v429_v43 }
 0x122   :  { %998 = vperm.xlu0 %3551, %v952_v5   ;;  %v544_v5 = vadd.f32 %v543_v52, %v542_v63  ;;  %v735_v52 = vld [vmem:[%s7352_s1 + $0x70] sm:$0xff] }
 0x126   :  { %988 = vperm.xlu0 %3551, %v950_v7  }
 0x135   :  { %545 = vadd.xlane.f32.xlu1 %v544_v5 }
 0x13f   :  { %v663_v32 = vpop.xlane.xlu0 %662 }
 0x140   :  { %v687_v35 = vmul.f32 0.0012755102, %v663_v32 }
 0x142   :  { %v703_v6 = vadd.f32 1e-05, %v687_v35  ;;  %v947_v35 = vld [vmem:[%s7353_s2 + $0x10] sm:$0xff] }
 0x143   :  { %v672_v7 = vpop.xlane.xlu1 %671 }
 0x144   :  { %3584 = vrsqrt.f32 %v703_v6  ;;  %v688_v56 = vmul.f32 0.0012755102, %v672_v7  ;;  %v736_v7 = vld [vmem:[%s7352_s1 + $0x78] sm:$0xff] }
 0x146   :  { %1013 = vperm.xlu1 %3550, %v955_v31   ;;  %v704_v59 = vadd.f32 1e-05, %v688_v56 }
 0x148   :  { %3586 = vrsqrt.f32 %v704_v59  ;;  %v645_v11 = vpop.xlane.xlu0 %644 }
 0x149   :  { %v685_v43 = vmul.f32 0.0012755102, %v645_v11 }
 0x14a   :  { %1003 = vperm.xlu1 %3550, %v953_v24   ;;  %v948_v24 = vld [vmem:[%s7353_s2 + $0x18] sm:$0xff] }
 0x14b   :  { %v701_v33 = vadd.f32 1e-05, %v685_v43 }
 0x14d   :  { %3588 = vrsqrt.f32 %v701_v33  ;;  %v733_v33 = vld [vmem:[%s7352_s1 + $0x60] sm:$0xff] }
 0x14e   :  { %993 = vperm.xlu1 %3550, %v951_v60   ;;  %v654_v63 = vpop.xlane.xlu1 %653 }
 0x14f   :  { %v686_v5 = vmul.f32 0.0012755102, %v654_v63 }
 0x151   :  { %v3585_v32 = vpop.eup %3584  ;;  %v702_v31 = vadd.f32 1e-05, %v686_v5 }
 0x152   :  { %983 = vperm.xlu1 %3550, %v949_v4   ;;  %v751_v6 = vmul.f32 %v3585_v32, %v735_v52 }
 0x153   :  { %3590 = vrsqrt.f32 %v702_v31 }
 0x154   :  { %825 = vperm.xlu0 %3551, %v751_v6  }
 0x155   :  { %v3587_v56 = vpop.eup %3586 }
 0x156   :  { %973 = vperm.xlu1 %3550, %v947_v35   ;;  %v752_v11 = vmul.f32 %v3587_v56, %v736_v7  ;;  %v734_v35 = vld [vmem:[%s7352_s1 + $0x68] sm:$0xff] }
 0x157   :  { %v636_v59 = vpop.xlane.xlu1 %635 }
 0x158   :  { %v684_v60 = vmul.f32 0.0012755102, %v636_v59  ;;  %978 = vperm.xlu0 %3551, %v948_v24  }
 0x15a   :  { %v700_v43 = vadd.f32 1e-05, %v684_v60  ;;  %830 = vperm.xlu1 %3550, %v752_v11   ;;  %v3589_v4 = vpop.eup %3588  ;;  %v732_v60 = vld [vmem:[%s7352_s1 + $0x58] sm:$0xff] }
 0x15b   :  { %v618_v63 = vpop.xlane.xlu1 %617  ;;  %v749_v5 = vmul.f32 %v3589_v4, %v733_v33 }
 0x15c   :  { %3592 = vrsqrt.f32 %v700_v43  ;;  %v682_v52 = vmul.f32 0.0012755102, %v618_v63 }
 0x15e   :  { %v698_v32 = vadd.f32 1e-05, %v682_v52  ;;  %815 = vperm.xlu1 %3550, %v749_v5   ;;  %v730_v52 = vld [vmem:[%s7352_s1 + $0x48] sm:$0xff] }
 0x160   :  { %3594 = vrsqrt.f32 %v698_v32  ;;  %v627_v31 = vpop.xlane.xlu0 %626  ;;  %v3591_v6 = vpop.eup %3590 }
 0x161   :  { %v683_v7 = vmul.f32 0.0012755102, %v627_v31  ;;  %v750_v24 = vmul.f32 %v3591_v6, %v734_v35 }
 0x163   :  { %v699_v56 = vadd.f32 1e-05, %v683_v7  ;;  %820 = vperm.xlu1 %3550, %v750_v24   ;;  %v731_v7 = vld [vmem:[%s7352_s1 + $0x50] sm:$0xff] }
 0x165   :  { %3596 = vrsqrt.f32 %v699_v56 }
 0x166   :  { %v600_v59 = vpop.xlane.xlu1 %599 }
 0x167   :  { %v680_v11 = vmul.f32 0.0012755102, %v600_v59 }
 0x169   :  { %v3593_v43 = vpop.eup %3592  ;;  %v696_v33 = vadd.f32 1e-05, %v680_v11 }
 0x16a   :  { %v748_v4 = vmul.f32 %v3593_v43, %v732_v60 }
 0x16b   :  { %3598 = vrsqrt.f32 %v696_v33  ;;  %v728_v33 = vld [vmem:[%s7352_s1 + $0x38] sm:$0xff] }
 0x16c   :  { %v609_v63 = vpop.xlane.xlu0 %608  ;;  %810 = vperm.xlu0 %3551, %v748_v4  }
 0x16d   :  { %v681_v5 = vmul.f32 0.0012755102, %v609_v63  ;;  %v3595_v32 = vpop.eup %3594 }
 0x16e   :  { %v746_v31 = vmul.f32 %v3595_v32, %v730_v52  ;;  %v729_v32 = vld [vmem:[%s7352_s1 + $0x40] sm:$0xff] }
 0x16f   :  { %v697_v35 = vadd.f32 1e-05, %v681_v5 }
 0x170   :  { %800 = vperm.xlu0 %3551, %v746_v31  }
 0x171   :  { %3600 = vrsqrt.f32 %v697_v35  ;;  %v582_v6 = vpop.xlane.xlu1 %581 }
 0x172   :  { %v678_v24 = vmul.f32 0.0012755102, %v582_v6  ;;  %v3597_v56 = vpop.eup %3596 }
 0x173   :  { %v747_v60 = vmul.f32 %v3597_v56, %v731_v7  ;;  %v726_v56 = vld [vmem:[%s7352_s1 + $0x28] sm:$0xff] }
 0x174   :  { %v694_v59 = vadd.f32 1e-05, %v678_v24 }
 0x175   :  { %805 = vperm.xlu1 %3550, %v747_v60  }
 0x176   :  { %3602 = vrsqrt.f32 %v694_v59  ;;  %v591_v11 = vpop.xlane.xlu0 %590 }
 0x177   :  { %v679_v43 = vmul.f32 0.0012755102, %v591_v11 }
 0x178   :  { %v3599_v4 = vpop.eup %3598 }
 0x179   :  { %v695_v63 = vadd.f32 1e-05, %v679_v43  ;;  %v744_v52 = vmul.f32 %v3599_v4, %v728_v33  ;;  %v727_v4 = vld [vmem:[%s7352_s1 + $0x30] sm:$0xff] }
 0x17b   :  { %3604 = vrsqrt.f32 %v695_v63  ;;  %790 = vperm.xlu0 %3551, %v744_v52  }
 0x17d   :  { %v564_v5 = vpop.xlane.xlu1 %563 }
 0x17e   :  { %v676_v35 = vmul.f32 0.0012755102, %v564_v5  ;;  %v3601_v31 = vpop.eup %3600 }
 0x17f   :  { %v745_v7 = vmul.f32 %v3601_v31, %v729_v32 }
 0x180   :  { %v692_v6 = vadd.f32 1e-05, %v676_v35 }
 0x181   :  { %795 = vperm.xlu1 %3550, %v745_v7  }
 0x182   :  { %3606 = vrsqrt.f32 %v692_v6  ;;  %v573_v24 = vpop.xlane.xlu0 %572  ;;  %v724_v6 = vld [vmem:[%s7352_s1 + $0x18] sm:$0xff] }
 0x183   :  { %v677_v59 = vmul.f32 0.0012755102, %v573_v24  ;;  %v3603_v60 = vpop.eup %3602 }
 0x184   :  { %v742_v43 = vmul.f32 %v3603_v60, %v726_v56 }
 0x185   :  { %v693_v11 = vadd.f32 1e-05, %v677_v59  ;;  %v725_v59 = vld [vmem:[%s7352_s1 + $0x20] sm:$0xff] }
 0x186   :  { %780 = vperm.xlu0 %3551, %v742_v43   ;;  %v723_v43 = vld [vmem:[%s7352_s1 + $0x10] sm:$0xff] }
 0x187   :  { %3608 = vrsqrt.f32 %v693_v11  ;;  %v555_v33 = vpop.xlane.xlu0 %554 }
 0x188   :  { %v675_v63 = vmul.f32 0.0012755102, %v555_v33  ;;  %v3605_v52 = vpop.eup %3604 }
 0x189   :  { %v743_v32 = vmul.f32 %v3605_v52, %v727_v4 }
 0x18a   :  { %v691_v5 = vadd.f32 1e-05, %v675_v63  ;;  %v721_v63 = vld [vmem:[%s7352_s1] sm:$0xff] }
 0x18b   :  { %785 = vperm.xlu1 %3550, %v743_v32   ;;  %v945_v32 = vld [vmem:[%s7353_s2] sm:$0xff] }
 0x18c   :  { %3610 = vrsqrt.f32 %v691_v5 }
 0x18d   :  { %v537_v35 = vpop.xlane.xlu0 %536 }
 0x18e   :  { %v673_v31 = vmul.f32 0.0012755102, %v537_v35  ;;  %v1034_v35 = vpop.permute.xlu1 %1033 }
 0x18f   :  { %v3607_v7 = vpop.eup %3606 }
 0x190   :  { %v689_v24 = vadd.f32 1e-05, %v673_v31  ;;  %v740_v56 = vmul.f32 %v3607_v7, %v724_v6 }
 0x192   :  { %3612 = vrsqrt.f32 %v689_v24  ;;  %770 = vperm.xlu0 %3551, %v740_v56   ;;  %v5144_v31 = vpop.permute.xlu1 %1038 }
 0x194   :  { %v3609_v60 = vpop.eup %3608 }
 0x195   :  { %v741_v11 = vmul.f32 %v3609_v60, %v725_v59  ;;  %v5148_v7 = vpop.permute.xlu0 %1018 }
 0x196   :  { %v5146_v6 = vpop.permute.xlu1 %1023 }
 0x197   :  { %775 = vperm.xlu1 %3550, %v741_v11  }
 0x199   :  { %v3611_v33 = vpop.eup %3610  ;;  %v5152_v60 = vpop.permute.xlu0 %1008 }
 0x19a   :  { %v739_v4 = vmul.f32 %v3611_v33, %v723_v43  ;;  %v5150_v24 = vpop.permute.xlu1 %1028 }
 0x19c   :  { %765 = vperm.xlu1 %3550, %v739_v4  }
 0x19d   :  { %v5156_v33 = vpop.permute.xlu0 %998 }
 0x19f   :  { %v3613_v52 = vpop.eup %3612 }
 0x1a0   :  { %v737_v5 = vmul.f32 %v3613_v52, %v721_v63 }
 0x1a1   :  { %v5162_v52 = vpop.permute.xlu0 %988 }
 0x1a2   :  { %755 = vperm.xlu1 %3550, %v737_v5  }
 0x1a6   :  { %963 = vperm.xlu1 %3550, %v945_v32   ;;  %v722_v32 = vld [vmem:[%s7352_s1 + $0x8] sm:$0xff] }
 0x1be   :  { %v546_v56 = vpop.xlane.xlu1 %545 }
 0x1bf   :  { %v674_v59 = vmul.f32 0.0012755102, %v546_v56 }
 0x1c1   :  { %v690_v11 = vadd.f32 1e-05, %v674_v59 }
 0x1c2   :  { %v5154_v43 = vpop.permute.xlu1 %1013 }
 0x1c3   :  { %3614 = vrsqrt.f32 %v690_v11 }
 0x1c6   :  { %v5158_v4 = vpop.permute.xlu1 %1003 }
 0x1ca   :  { %v5160_v63 = vpop.permute.xlu1 %993 }
 0x1ce   :  { %v5164_v5 = vpop.permute.xlu1 %983 }
 0x1cf   :  { %7717 = vst [vmem:[#allocation85_spill] sm:$0xff] %v5164_v5  ;;  %v826_v59 = vpop.permute.xlu0 %825 }
 0x1d0   :  { %v3615_v56 = vpop.eup %3614  ;;  %v932_v11 = vmul.f32 %v826_v59, %v4383_v34  ;;  %v931_v17 = vmul.f32 %v826_v59, %v4380_v16  ;;  %v934_v46 = vmul.f32 %v826_v59, %v4389_v8  ;;  %v936_v23 = vmul.f32 %v826_v59, %v4398_v41 }
 0x1d1   :  { %v738_v42 = vmul.f32 %v3615_v56, %v722_v32  ;;  %v933_v53 = vmul.f32 %v826_v59, %v4386_v58  ;;  %v935_v36 = vmul.f32 %v826_v59, %v4392_v3  ;;  %v937_v26 = vmul.f32 %v826_v59, %v7719_v51  ;;  %v946_v32 = vld [vmem:[%s7353_s2 + $0x8] sm:$0xff]  ;;  %v7720_v58 = vld [vmem:[#allocation73_spill] sm:$0xff]  ;;  %v7721_v51 = vld [vmem:[#allocation72_spill] sm:$0xff] }
 0x1d2   :  { %v5169_v15 = vpop.permute.xlu1 %973  ;;  %v1140_v56 = vadd.f32 %v1034_v35, %v932_v11  ;;  %v1139_v47 = vadd.f32 %v1034_v35, %v931_v17  ;;  %v1142_v34 = vadd.f32 %v1034_v35, %v934_v46  ;;  %v1144_v62 = vadd.f32 %v1034_v35, %v936_v23 }
 0x1d3   :  { %7718 = vst [vmem:[#allocation86_spill] sm:$0xff] %v5169_v15  ;;  %760 = vperm.xlu0 %3551, %v738_v42   ;;  %v1141_v16 = vadd.f32 %v1034_v35, %v933_v53  ;;  %v1143_v9 = vadd.f32 %v1034_v35, %v935_v36  ;;  %v5181_v18 = vadd.f32 %v1034_v35, %v937_v26  ;;  %v7722_v36 = vld [vmem:[#allocation74_spill] sm:$0xff]  ;;  %v7725_v15 = vld [vmem:[#allocation71_spill] sm:$0xff] }
 0x1d4   :  { %v1252_v10 = vmax.f32 %v1140_v56, 0.0  ;;  %v1251_v41 = vmax.f32 %v1139_v47, 0.0  ;;  %v1254_v42 = vmax.f32 %v1142_v34, 0.0  ;;  %v1256_v17 = vmax.f32 %v1144_v62, 0.0 }
 0x1d5   :  { %v1253_v46 = vmax.f32 %v1141_v16, 0.0  ;;  %v1255_v34 = vmax.f32 %v1143_v9, 0.0 }
 0x1d6   :  { %v831_v8 = vpop.permute.xlu1 %830 }
 0x1d7   :  { %968 = vperm.xlu0 %3551, %v946_v32   ;;  %v939_v3 = vmul.f32 %v831_v8, %v7720_v58  ;;  %v938_v59 = vmul.f32 %v831_v8, %v7721_v51  ;;  %v941_v50 = vmul.f32 %v831_v8, %v4427_v0  ;;  %v943_v11 = vmul.f32 %v831_v8, %v4443_v21  ;;  %v7723_v21 = vld [vmem:[#allocation75_spill] sm:$0xff] }
 0x1d8   :  { %v940_v23 = vmul.f32 %v831_v8, %v4422_v54  ;;  %v942_v53 = vmul.f32 %v831_v8, %v7722_v36  ;;  %v944_v62 = vmul.f32 %v831_v8, %v7723_v21  ;;  %v5225_v21 = vpop.permute.xlu0 %978 }
 0x1d9   :  { %v1147_v47 = vadd.f32 %v5144_v31, %v939_v3  ;;  %v1146_v26 = vadd.f32 %v5144_v31, %v938_v59  ;;  %v1149_v35 = vadd.f32 %v5144_v31, %v941_v50  ;;  %v1151_v32 = vadd.f32 %v5144_v31, %v943_v11  ;;  %v7724_v3 = vld [vmem:[#allocation76_spill] sm:$0xff] }
 0x1da   :  { %v1148_v56 = vadd.f32 %v5144_v31, %v940_v23  ;;  %v1150_v0 = vadd.f32 %v5144_v31, %v942_v53  ;;  %v5196_v58 = vpop.permute.xlu1 %815 }
 0x1db   :  { %v1259_v54 = vmax.f32 %v1147_v47, 0.0  ;;  %v1258_v16 = vmax.f32 %v1146_v26, 0.0  ;;  %v1261_v51 = vmax.f32 %v1149_v35, 0.0  ;;  %v1263_v36 = vmax.f32 %v1151_v32, 0.0 }
 0x1dc   :  { %v918_v59 = vmul.f32 %v5196_v58, %v7724_v3  ;;  %v917_v50 = vmul.f32 %v5196_v58, %v7725_v15  ;;  %v1260_v11 = vmax.f32 %v1148_v56, 0.0  ;;  %v1262_v5 = vmax.f32 %v1150_v0, 0.0 }
 0x1dd   :  { %v1315_v23 = vpack.c.bf16 %v1259_v54, %v1252_v10  ;;  %v1314_v22 = vpack.c.bf16 %v1258_v16, %v1251_v41  ;;  %v5202_v53 = vpack.c.bf16 %v1261_v51, %v1254_v42  ;;  %v5204_v9 = vpack.c.bf16 %v1263_v36, %v1256_v17  ;;  %v7726_v41 = vld [vmem:[#allocation77_spill] sm:$0xff] }
 0x1de   :  { %v1126_v8 = vadd.f32 %v5146_v6, %v918_v59  ;;  %v1125_v47 = vadd.f32 %v5146_v6, %v917_v50  ;;  %v5208_v26 = vpack.c.bf16 %v1260_v11, %v1253_v46  ;;  %v5210_v35 = vpack.c.bf16 %v1262_v5, %v1255_v34  ;;  %v821_v56 = vpop.permute.xlu1 %820 }
 0x1df   :  { %1577 = vmatprep.subr.bf16.mxu0 %v1315_v23  ;;  %3530 = vmatprep.subr.bf16.mxu1 %v1315_v23  ;;  %v920_v15 = vmul.f32 %v5196_v58, %v4458_v2  ;;  %v922_v10 = vmul.f32 %v5196_v58, %v4478_v28  ;;  %v919_v42 = vmul.f32 %v5196_v58, %v7726_v41  ;;  %v1257_v5 = vmax.f32 %v5181_v18, 0.0 }
 0x1e0   :  { %1578 = vmatpush1.bf16.msra.mxu0 %v1314_v22  ;;  %3538 = vmatpush1.bf16.msra.mxu1 %v1314_v22  ;;  %v1238_v17 = vmax.f32 %v1126_v8, 0.0  ;;  %v1237_v32 = vmax.f32 %v1125_v47, 0.0  ;;  %v921_v46 = vmul.f32 %v5196_v58, %v4475_v20  ;;  %v1152_v28 = vadd.f32 %v5144_v31, %v944_v62 }
 0x1e1   :  { %v1128_v0 = vadd.f32 %v5146_v6, %v920_v15  ;;  %v1130_v2 = vadd.f32 %v5146_v6, %v922_v10  ;;  %v1127_v34 = vadd.f32 %v5146_v6, %v919_v42  ;;  %v925_v22 = vmul.f32 %v821_v56, %v4488_v57 }
 0x1e2   :  { %v924_v54 = vmul.f32 %v821_v56, %v4485_v30  ;;  %v927_v16 = vmul.f32 %v821_v56, %v4498_v1  ;;  %v929_v20 = vmul.f32 %v821_v56, %v4516_v14  ;;  %v926_v36 = vmul.f32 %v821_v56, %v4491_v19 }
 0x1e3   :  { %v1240_v18 = vmax.f32 %v1128_v0, 0.0  ;;  %v1242_v51 = vmax.f32 %v1130_v2, 0.0  ;;  %v1239_v3 = vmax.f32 %v1127_v34, 0.0  ;;  %v1133_v59 = vadd.f32 %v5150_v24, %v925_v22 }
 0x1e4   :  { %v1132_v50 = vadd.f32 %v5150_v24, %v924_v54  ;;  %v1135_v31 = vadd.f32 %v5150_v24, %v927_v16  ;;  %v1137_v62 = vadd.f32 %v5150_v24, %v929_v20  ;;  %v1134_v57 = vadd.f32 %v5150_v24, %v926_v36 }
 0x1e5   :  { %v928_v30 = vmul.f32 %v821_v56, %v4505_v27  ;;  %v1129_v1 = vadd.f32 %v5146_v6, %v921_v46  ;;  %v1264_v14 = vmax.f32 %v1152_v28, 0.0  ;;  %v1245_v11 = vmax.f32 %v1133_v59, 0.0 }
 0x1e6   :  { %v1244_v23 = vmax.f32 %v1132_v50, 0.0  ;;  %v1247_v8 = vmax.f32 %v1135_v31, 0.0  ;;  %v1249_v19 = vmax.f32 %v1137_v62, 0.0  ;;  %v1246_v47 = vmax.f32 %v1134_v57, 0.0  ;;  %v7730_v50 = vld [vmem:[#allocation82_spill] sm:$0xff]  ;;  %v7731_v62 = vld [vmem:[#allocation81_spill] sm:$0xff] }
 0x1e7   :  { %v1136_v15 = vadd.f32 %v5150_v24, %v928_v30  ;;  %v1241_v10 = vmax.f32 %v1129_v1, 0.0  ;;  %v5240_v41 = vpack.c.bf16 %v1264_v14, %v1257_v5  ;;  %v5242_v42 = vpop.permute.xlu0 %810  ;;  %v1308_v0 = vpack.c.bf16 %v1245_v11, %v1238_v17 }
 0x1e8   :  { %v1307_v2 = vpack.c.bf16 %v1244_v23, %v1237_v32  ;;  %v5244_v34 = vpack.c.bf16 %v1247_v8, %v1240_v18  ;;  %v5246_v27 = vpack.c.bf16 %v1249_v19, %v1242_v51  ;;  %v911_v46 = vmul.f32 %v5242_v42, %v4534_v45 }
 0x1e9   :  { %7727 = vst [vmem:[#allocation70_spill] sm:$0xff] %v5240_v41  ;;  %v910_v28 = vmul.f32 %v5242_v42, %v4530_v48  ;;  %v5252_v22 = vpack.c.bf16 %v1246_v47, %v1239_v3  ;;  %v1248_v54 = vmax.f32 %v1136_v15, 0.0  ;;  %1579 = vmatprep.subr.bf16.mxu0 %v1308_v0  ;;  %3531 = vmatprep.subr.bf16.mxu1 %v1308_v0  ;;  %v7729_v3 = vld [vmem:[#allocation79_spill] sm:$0xff] }
 0x1ea   :  { %v913_v5 = vmul.f32 %v5242_v42, %v4548_v37  ;;  %v915_v17 = vmul.f32 %v5242_v42, %v4563_v49  ;;  %v912_v32 = vmul.f32 %v5242_v42, %v4540_v39  ;;  %1580 = vmatpush1.bf16.msra.mxu0 %v1307_v2  ;;  %3539 = vmatpush1.bf16.msra.mxu1 %v1307_v2  ;;  %v7728_v37 = vld [vmem:[#allocation78_spill] sm:$0xff] }
 0x1eb   :  { %v1119_v45 = vadd.f32 %v5148_v7, %v911_v46  ;;  %v1118_v48 = vadd.f32 %v5148_v7, %v910_v28  ;;  %v5262_v16 = vpack.c.bf16 %v1248_v54, %v1241_v10  ;;  %v914_v18 = vmul.f32 %v5242_v42, %v4552_v38  ;;  %v5269_v49 = vpop.permute.xlu0 %800  ;;  %v7733_v46 = vld [vmem:[#allocation83_spill] sm:$0xff]  ;;  %v7734_v54 = vld [vmem:[#allocation8_spill] sm:$0xff] }
 0x1ec   :  { %v1121_v20 = vadd.f32 %v5148_v7, %v913_v5  ;;  %v923_v51 = vmul.f32 %v5196_v58, %v7728_v37  ;;  %v1123_v39 = vadd.f32 %v5148_v7, %v915_v17  ;;  %v1120_v36 = vadd.f32 %v5148_v7, %v912_v32  ;;  %v7732_v58 = vld [vmem:[#allocation84_spill] sm:$0xff]  ;;  %v7739_v37 = vld [vmem:[#allocation7_spill] sm:$0xff] }
 0x1ed   :  { %v930_v59 = vmul.f32 %v821_v56, %v7729_v3  ;;  %v897_v31 = vmul.f32 %v5269_v49, %v7730_v50  ;;  %v896_v57 = vmul.f32 %v5269_v49, %v7731_v62  ;;  %v1231_v30 = vmax.f32 %v1119_v45, 0.0  ;;  %v7736_v17 = vld [vmem:[#allocation12_spill] sm:$0xff]  ;;  %v7737_v45 = vld [vmem:[#allocation9_spill] sm:$0xff] }
 0x1ee   :  { %v1230_v1 = vmax.f32 %v1118_v48, 0.0  ;;  %v1122_v38 = vadd.f32 %v5148_v7, %v914_v18  ;;  %v1233_v14 = vmax.f32 %v1121_v20, 0.0  ;;  %v899_v11 = vmul.f32 %v5269_v49, %v7732_v58  ;;  %v7738_v20 = vld [vmem:[#allocation6_spill] sm:$0xff] }
 0x1ef   :  { %v901_v23 = vmul.f32 %v5269_v49, %v4615_v55  ;;  %v1131_v8 = vadd.f32 %v5146_v6, %v923_v51  ;;  %v5285_v56 = vadd.f32 %v5152_v60, %v897_v31  ;;  %v1235_v19 = vmax.f32 %v1123_v39, 0.0  ;;  %v7735_v6 = vld [vmem:[#allocation5_spill] sm:$0xff] }
 0x1f0   :  { %v1232_v47 = vmax.f32 %v1120_v36, 0.0  ;;  %v1138_v15 = vadd.f32 %v5150_v24, %v930_v59  ;;  %v5288_v10 = vpop.permute.xlu1 %805  ;;  %v5291_v0 = vadd.f32 %v5152_v60, %v896_v57  ;;  %v1234_v2 = vmax.f32 %v1122_v38, 0.0 }
 0x1f1   :  { %v898_v28 = vmul.f32 %v5269_v49, %v7733_v46  ;;  %v900_v55 = vmul.f32 %v5269_v49, %v7734_v54  ;;  %v904_v5 = vmul.f32 %v5288_v10, %v7735_v6  ;;  %v903_v32 = vmul.f32 %v5288_v10, %v7736_v17 }
 0x1f2   :  { %v906_v24 = vmul.f32 %v5288_v10, %v4635_v13  ;;  %v908_v48 = vmul.f32 %v5288_v10, %v7737_v45  ;;  %v905_v18 = vmul.f32 %v5288_v10, %v7738_v20  ;;  %v907_v51 = vmul.f32 %v5288_v10, %v7739_v37 }
 0x1f3   :  { %v5310_v39 = vadd.f32 %v5152_v60, %v899_v11  ;;  %v5313_v36 = vadd.f32 %v5152_v60, %v901_v23  ;;  %v1112_v3 = vadd.f32 %v5154_v43, %v904_v5  ;;  %v1111_v59 = vadd.f32 %v5154_v43, %v903_v32 }
 0x1f4   :  { %v1114_v13 = vadd.f32 %v5154_v43, %v906_v24  ;;  %v1116_v50 = vadd.f32 %v5154_v43, %v908_v48  ;;  %v1217_v31 = vmax.f32 %v5285_v56, 0.0  ;;  %v1113_v62 = vadd.f32 %v5154_v43, %v905_v18  ;;  %v7740_v48 = vld [vmem:[#allocation18_spill] sm:$0xff]  ;;  %v7741_v18 = vld [vmem:[#allocation21_spill] sm:$0xff] }
 0x1f5   :  { %v1115_v57 = vadd.f32 %v5154_v43, %v907_v51  ;;  %v5323_v38 = vadd.f32 %v5152_v60, %v898_v28  ;;  %v1224_v58 = vmax.f32 %v1112_v3, 0.0  ;;  %v1223_v11 = vmax.f32 %v1111_v59, 0.0 }
 0x1f6   :  { %v1226_v23 = vmax.f32 %v1114_v13, 0.0  ;;  %v1228_v46 = vmax.f32 %v1116_v50, 0.0  ;;  %v5325_v54 = vpop.permute.xlu0 %790  ;;  %v1225_v6 = vmax.f32 %v1113_v62, 0.0  ;;  %v1108_v17 = vadd.f32 %v5152_v60, %v900_v55 }
 0x1f7   :  { %v1227_v5 = vmax.f32 %v1115_v57, 0.0  ;;  %v1250_v32 = vmax.f32 %v1138_v15, 0.0  ;;  %v1301_v24 = vpack.c.bf16 %v1231_v30, %v1224_v58  ;;  %v1300_v45 = vpack.c.bf16 %v1230_v1, %v1223_v11  ;;  %v7743_v1 = vld [vmem:[#allocation11_spill] sm:$0xff]  ;;  %v7745_v57 = vld [vmem:[#allocation10_spill] sm:$0xff] }
 0x1f8   :  { %v883_v20 = vmul.f32 %v5325_v54, %v7740_v48  ;;  %v882_v28 = vmul.f32 %v5325_v54, %v7741_v18  ;;  %v5332_v37 = vpack.c.bf16 %v1233_v14, %v1226_v23  ;;  %v5334_v51 = vpack.c.bf16 %v1235_v19, %v1228_v46  ;;  %v7747_v11 = vld [vmem:[#allocation27_spill] sm:$0xff]  ;;  %v7751_v48 = vld [vmem:[#allocation14_spill] sm:$0xff] }
 0x1f9   :  { %v5336_v3 = vpack.c.bf16 %v1232_v47, %v1225_v6  ;;  %v5338_v59 = vpack.c.bf16 %v1234_v2, %v1227_v5  ;;  %1581 = vmatprep.subr.bf16.mxu0 %v1301_v24  ;;  %3532 = vmatprep.subr.bf16.mxu1 %v1301_v24  ;;  %v1216_v15 = vmax.f32 %v5291_v0, 0.0  ;;  %v1219_v30 = vmax.f32 %v5310_v39, 0.0  ;;  %v7744_v39 = vld [vmem:[#allocation22_spill] sm:$0xff]  ;;  %v7749_v5 = vld [vmem:[#allocation17_spill] sm:$0xff]  ;;  %v7750_v24 = vld [vmem:[#allocation19_spill] sm:$0xff] }
 0x1fa   :  { %v885_v55 = vmul.f32 %v5325_v54, %v7743_v1  ;;  %v1243_v13 = vmax.f32 %v1131_v8, 0.0  ;;  %1582 = vmatpush1.bf16.msra.mxu0 %v1300_v45  ;;  %3540 = vmatpush1.bf16.msra.mxu1 %v1300_v45  ;;  %v5345_v14 = vadd.f32 %v5156_v33, %v883_v20  ;;  %v1221_v19 = vmax.f32 %v5313_v36, 0.0  ;;  %v7748_v36 = vld [vmem:[#allocation28_spill] sm:$0xff] }
 0x1fb   :  { %7742 = vst [vmem:[#allocation73_spill] sm:$0xff] %v5338_v59  ;;  %v1218_v47 = vmax.f32 %v5323_v38, 0.0  ;;  %v1220_v2 = vmax.f32 %v1108_v17, 0.0  ;;  %v5352_v0 = vadd.f32 %v5156_v33, %v882_v28  ;;  %v887_v62 = vmul.f32 %v5325_v54, %v7744_v39 }
 0x1fc   :  { %v5349_v50 = vpop.permute.xlu1 %795  ;;  %v884_v8 = vmul.f32 %v5325_v54, %v7745_v57  ;;  %v5358_v58 = vpack.c.bf16 %v1250_v32, %v1243_v13  ;;  %v5373_v32 = vadd.f32 %v5156_v33, %v885_v55  ;;  %v886_v20 = vmul.f32 %v5325_v54, %v7751_v48 }
 0x1fd   :  { %v890_v23 = vmul.f32 %v5349_v50, %v7747_v11  ;;  %v889_v38 = vmul.f32 %v5349_v50, %v7748_v36  ;;  %v892_v46 = vmul.f32 %v5349_v50, %v4726_v12  ;;  %v894_v6 = vmul.f32 %v5349_v50, %v4747_v29 }
 0x1fe   :  { %7746 = vst [vmem:[#allocation72_spill] sm:$0xff] %v5358_v58  ;;  %v891_v17 = vmul.f32 %v5349_v50, %v7749_v5  ;;  %v893_v45 = vmul.f32 %v5349_v50, %v7750_v24  ;;  %v5384_v39 = vadd.f32 %v5156_v33, %v887_v62  ;;  %v5387_v55 = vadd.f32 %v5156_v33, %v884_v8  ;;  %v7752_v5 = vld [vmem:[#allocation29_spill] sm:$0xff] }
 0x1ff   :  { %v1098_v18 = vadd.f32 %v5158_v4, %v890_v23  ;;  %v1097_v28 = vadd.f32 %v5158_v4, %v889_v38  ;;  %v1100_v12 = vadd.f32 %v5158_v4, %v892_v46  ;;  %v1102_v29 = vadd.f32 %v5158_v4, %v894_v6  ;;  %v7753_v6 = vld [vmem:[#allocation23_spill] sm:$0xff] }
 0x200   :  { %v1099_v1 = vadd.f32 %v5158_v4, %v891_v17  ;;  %v1101_v13 = vadd.f32 %v5158_v4, %v893_v45 }
 0x201   :  { %v5389_v57 = vpop.permute.xlu0 %780  ;;  %v1210_v11 = vmax.f32 %v1098_v18, 0.0  ;;  %v1209_v23 = vmax.f32 %v1097_v28, 0.0  ;;  %v1212_v36 = vmax.f32 %v1100_v12, 0.0  ;;  %v1214_v38 = vmax.f32 %v1102_v29, 0.0 }
 0x202   :  { %v869_v46 = vmul.f32 %v5389_v57, %v7752_v5  ;;  %v868_v17 = vmul.f32 %v5389_v57, %v7753_v6  ;;  %v1211_v24 = vmax.f32 %v1099_v1, 0.0  ;;  %v1213_v45 = vmax.f32 %v1101_v13, 0.0  ;;  %v7759_v13 = vld [vmem:[#allocation34_spill] sm:$0xff]  ;;  %v7763_v5 = vld [vmem:[#allocation39_spill] sm:$0xff] }
 0x203   :  { %v1294_v62 = vpack.c.bf16 %v1217_v31, %v1210_v11  ;;  %v1293_v48 = vpack.c.bf16 %v1216_v15, %v1209_v23  ;;  %v5397_v8 = vpack.c.bf16 %v1219_v30, %v1212_v36  ;;  %v5399_v58 = vpack.c.bf16 %v1221_v19, %v1214_v38  ;;  %v7761_v23 = vld [vmem:[#allocation36_spill] sm:$0xff] }
 0x204   :  { %v1203_v18 = vmax.f32 %v5345_v14, 0.0  ;;  %v1202_v28 = vmax.f32 %v5352_v0, 0.0  ;;  %v5403_v12 = vpack.c.bf16 %v1218_v47, %v1211_v24  ;;  %v5405_v29 = vpack.c.bf16 %v1220_v2, %v1213_v45  ;;  %v7758_v47 = vld [vmem:[#allocation24_spill] sm:$0xff]  ;;  %v7766_v24 = vld [vmem:[#allocation25_spill] sm:$0xff] }
 0x205   :  { %7754 = vst [vmem:[#allocation74_spill] sm:$0xff] %v5397_v8  ;;  %7755 = vst [vmem:[#allocation75_spill] sm:$0xff] %v5399_v58  ;;  %1583 = vmatprep.subr.bf16.mxu0 %v1294_v62  ;;  %3533 = vmatprep.subr.bf16.mxu1 %v1294_v62  ;;  %v5408_v1 = vadd.f32 %v5162_v52, %v869_v46  ;;  %v5411_v56 = vadd.f32 %v5162_v52, %v868_v17  ;;  %v1205_v31 = vmax.f32 %v5373_v32, 0.0  ;;  %v7760_v32 = vld [vmem:[#allocation30_spill] sm:$0xff]  ;;  %v7762_v38 = vld [vmem:[#allocation32_spill] sm:$0xff] }
 0x206   :  { %7756 = vst [vmem:[#allocation76_spill] sm:$0xff] %v5403_v12  ;;  %7757 = vst [vmem:[#allocation71_spill] sm:$0xff] %v5405_v29  ;;  %v1207_v15 = vmax.f32 %v5384_v39, 0.0  ;;  %v5415_v30 = vpop.permute.xlu1 %785  ;;  %1584 = vmatpush1.bf16.msra.mxu0 %v1293_v48  ;;  %3541 = vmatpush1.bf16.msra.mxu1 %v1293_v48  ;;  %v1204_v14 = vmax.f32 %v5387_v55, 0.0  ;;  %v1094_v19 = vadd.f32 %v5156_v33, %v886_v20  ;;  %v7764_v46 = vld [vmem:[#allocation31_spill] sm:$0xff]  ;;  %v7765_v17 = vld [vmem:[#allocation33_spill] sm:$0xff] }
 0x207   :  { %v871_v2 = vmul.f32 %v5389_v57, %v7758_v47  ;;  %v873_v0 = vmul.f32 %v5389_v57, %v4789_v61  ;;  %v876_v11 = vmul.f32 %v5415_v30, %v7759_v13  ;;  %v875_v39 = vmul.f32 %v5415_v30, %v7760_v32  ;;  %v7767_v58 = vld [vmem:[#allocation42_spill] sm:$0xff] }
 0x208   :  { %v878_v36 = vmul.f32 %v5415_v30, %v7761_v23  ;;  %v880_v55 = vmul.f32 %v5415_v30, %v7762_v38  ;;  %v877_v20 = vmul.f32 %v5415_v30, %v7763_v5  ;;  %v879_v6 = vmul.f32 %v5415_v30, %v7764_v46 }
 0x209   :  { %v870_v61 = vmul.f32 %v5389_v57, %v7765_v17  ;;  %v872_v45 = vmul.f32 %v5389_v57, %v7766_v24  ;;  %v1084_v62 = vadd.f32 %v5160_v63, %v876_v11  ;;  %v1083_v48 = vadd.f32 %v5160_v63, %v875_v39 }
 0x20a   :  { %v1086_v47 = vadd.f32 %v5160_v63, %v878_v36  ;;  %v1088_v13 = vadd.f32 %v5160_v63, %v880_v55  ;;  %v1085_v32 = vadd.f32 %v5160_v63, %v877_v20  ;;  %v1087_v23 = vadd.f32 %v5160_v63, %v879_v6  ;;  %v7768_v6 = vld [vmem:[#allocation37_spill] sm:$0xff] }
 0x20b   :  { %v1206_v38 = vmax.f32 %v1094_v19, 0.0  ;;  %v5446_v5 = vadd.f32 %v5162_v52, %v871_v2  ;;  %v1196_v46 = vmax.f32 %v1084_v62, 0.0  ;;  %v1195_v17 = vmax.f32 %v1083_v48, 0.0 }
 0x20c   :  { %v1198_v41 = vmax.f32 %v1086_v47, 0.0  ;;  %v1200_v24 = vmax.f32 %v1088_v13, 0.0  ;;  %v1197_v11 = vmax.f32 %v1085_v32, 0.0  ;;  %v1199_v39 = vmax.f32 %v1087_v23, 0.0  ;;  %v7774_v23 = vld [vmem:[#allocation41_spill] sm:$0xff] }
 0x20d   :  { %v5448_v29 = vpop.permute.xlu0 %770  ;;  %v1081_v36 = vadd.f32 %v5162_v52, %v873_v0  ;;  %v1078_v55 = vadd.f32 %v5162_v52, %v870_v61  ;;  %v1287_v12 = vpack.c.bf16 %v1203_v18, %v1196_v46  ;;  %v1286_v20 = vpack.c.bf16 %v1202_v28, %v1195_v17  ;;  %v7775_v46 = vld [vmem:[#allocation40_spill] sm:$0xff] }
 0x20e   :  { %v855_v19 = vmul.f32 %v5448_v29, %v7767_v58  ;;  %v854_v2 = vmul.f32 %v5448_v29, %v7768_v6  ;;  %v5456_v62 = vpack.c.bf16 %v1205_v31, %v1198_v41  ;;  %v5458_v48 = vpack.c.bf16 %v1207_v15, %v1200_v24  ;;  %v7776_v24 = vld [vmem:[#allocation54_spill] sm:$0xff]  ;;  %v7780_v6 = vld [vmem:[#allocation85_spill] sm:$0xff] }
 0x20f   :  { %v5460_v47 = vpack.c.bf16 %v1204_v14, %v1197_v11  ;;  %v5462_v13 = vpack.c.bf16 %v1206_v38, %v1199_v39  ;;  %1585 = vmatprep.subr.bf16.mxu0 %v1287_v12  ;;  %3534 = vmatprep.subr.bf16.mxu1 %v1287_v12  ;;  %v1189_v0 = vmax.f32 %v5408_v1, 0.0  ;;  %v1188_v18 = vmax.f32 %v5411_v56, 0.0  ;;  %v7773_v56 = vld [vmem:[#allocation48_spill] sm:$0xff] }
 0x210   :  { %7769 = vst [vmem:[#allocation77_spill] sm:$0xff] %v5456_v62  ;;  %7770 = vst [vmem:[#allocation78_spill] sm:$0xff] %v5458_v48  ;;  %v1063_v28 = vadd.f32 %v5225_v21, %v855_v19  ;;  %v1080_v58 = vadd.f32 %v5162_v52, %v872_v45  ;;  %1586 = vmatpush1.bf16.msra.mxu0 %v1286_v20  ;;  %3542 = vmatpush1.bf16.msra.mxu1 %v1286_v20  ;;  %v1191_v31 = vmax.f32 %v5446_v5, 0.0  ;;  %v7777_v39 = vld [vmem:[#allocation44_spill] sm:$0xff]  ;;  %v7779_v20 = vld [vmem:[#allocation43_spill] sm:$0xff] }
 0x211   :  { %7771 = vst [vmem:[#allocation79_spill] sm:$0xff] %v5460_v47  ;;  %7772 = vst [vmem:[#allocation82_spill] sm:$0xff] %v5462_v13  ;;  %v1062_v41 = vadd.f32 %v5225_v21, %v854_v2  ;;  %v1193_v15 = vmax.f32 %v1081_v36, 0.0  ;;  %v1190_v14 = vmax.f32 %v1078_v55, 0.0  ;;  %v857_v12 = vmul.f32 %v5448_v29, %v4855_v40  ;;  %v7778_v36 = vld [vmem:[#allocation49_spill] sm:$0xff]  ;;  %v7781_v47 = vld [vmem:[#allocation46_spill] sm:$0xff] }
 0x212   :  { %v5470_v61 = vpop.permute.xlu1 %775  ;;  %v1175_v32 = vmax.f32 %v1063_v28, 0.0  ;;  %v859_v1 = vmul.f32 %v5448_v29, %v4867_v25  ;;  %v856_v45 = vmul.f32 %v5448_v29, %v7773_v56  ;;  %v1192_v55 = vmax.f32 %v1080_v58, 0.0 }
 0x213   :  { %v862_v38 = vmul.f32 %v5470_v61, %v7774_v23  ;;  %v861_v5 = vmul.f32 %v5470_v61, %v7775_v46  ;;  %v864_v17 = vmul.f32 %v5470_v61, %v4898_v44  ;;  %v866_v11 = vmul.f32 %v5470_v61, %v7776_v24 }
 0x214   :  { %v863_v40 = vmul.f32 %v5470_v61, %v7777_v39  ;;  %v865_v25 = vmul.f32 %v5470_v61, %v7778_v36  ;;  %v858_v19 = vmul.f32 %v5448_v29, %v7779_v20  ;;  %v1065_v24 = vadd.f32 %v5225_v21, %v857_v12 }
 0x215   :  { %v1070_v2 = vadd.f32 %v7780_v6, %v862_v38  ;;  %v1069_v28 = vadd.f32 %v7780_v6, %v861_v5  ;;  %v1072_v56 = vadd.f32 %v7780_v6, %v864_v17  ;;  %v1074_v44 = vadd.f32 %v7780_v6, %v866_v11  ;;  %v7782_v17 = vld [vmem:[#allocation45_spill] sm:$0xff] }
 0x216   :  { %v1071_v23 = vadd.f32 %v7780_v6, %v863_v40  ;;  %v1073_v46 = vadd.f32 %v7780_v6, %v865_v25  ;;  %v1067_v39 = vadd.f32 %v5225_v21, %v859_v1  ;;  %v7783_v1 = vld [vmem:[#allocation86_spill] sm:$0xff] }
 0x217   :  { %v5500_v58 = vpop.permute.xlu1 %765  ;;  %v1182_v36 = vmax.f32 %v1070_v2, 0.0  ;;  %v1181_v20 = vmax.f32 %v1069_v28, 0.0  ;;  %v1184_v13 = vmax.f32 %v1072_v56, 0.0  ;;  %v1186_v38 = vmax.f32 %v1074_v44, 0.0  ;;  %v7784_v44 = vld [vmem:[#allocation51_spill] sm:$0xff] }
 0x218   :  { %v848_v5 = vmul.f32 %v5500_v58, %v7781_v47  ;;  %v847_v11 = vmul.f32 %v5500_v58, %v7782_v17  ;;  %v1183_v48 = vmax.f32 %v1071_v23, 0.0  ;;  %v1185_v40 = vmax.f32 %v1073_v46, 0.0 }
 0x219   :  { %v1280_v62 = vpack.c.bf16 %v1189_v0, %v1182_v36  ;;  %v1279_v25 = vpack.c.bf16 %v1188_v18, %v1181_v20  ;;  %v5506_v8 = vpack.c.bf16 %v1191_v31, %v1184_v13  ;;  %v5508_v12 = vpack.c.bf16 %v1193_v15, %v1186_v38  ;;  %v7785_v0 = vld [vmem:[#allocation52_spill] sm:$0xff]  ;;  %v7786_v18 = vld [vmem:[#allocation47_spill] sm:$0xff] }
 0x21a   :  { %v1056_v59 = vadd.f32 %v7783_v1, %v848_v5  ;;  %v1055_v2 = vadd.f32 %v7783_v1, %v847_v11  ;;  %v5512_v28 = vpack.c.bf16 %v1190_v14, %v1183_v48  ;;  %v5514_v56 = vpack.c.bf16 %v1192_v55, %v1185_v40  ;;  %v7787_v14 = vld [vmem:[#allocation55_spill] sm:$0xff] }
 0x21b   :  { %1587 = vmatprep.subr.bf16.mxu0 %v1280_v62  ;;  %3535 = vmatprep.subr.bf16.mxu1 %v1280_v62  ;;  %v1174_v47 = vmax.f32 %v1062_v41, 0.0  ;;  %v850_v23 = vmul.f32 %v5500_v58, %v7784_v44  ;;  %v852_v13 = vmul.f32 %v5500_v58, %v7785_v0  ;;  %v849_v31 = vmul.f32 %v5500_v58, %v7786_v18 }
 0x21c   :  { %1588 = vmatpush1.bf16.msra.mxu0 %v1279_v25  ;;  %3543 = vmatpush1.bf16.msra.mxu1 %v1279_v25  ;;  %v1168_v15 = vmax.f32 %v1056_v59, 0.0  ;;  %v1167_v46 = vmax.f32 %v1055_v2, 0.0  ;;  %v1064_v48 = vadd.f32 %v5225_v21, %v856_v45  ;;  %v851_v55 = vmul.f32 %v5500_v58, %v7787_v14  ;;  %v7791_v14 = vld [vmem:[#allocation13_spill] sm:$0xff] }
 0x21d   :  { %v1058_v62 = vadd.f32 %v7783_v1, %v850_v23  ;;  %v1060_v41 = vadd.f32 %v7783_v1, %v852_v13  ;;  %v1177_v38 = vmax.f32 %v1065_v24, 0.0  ;;  %v1057_v5 = vadd.f32 %v7783_v1, %v849_v31  ;;  %v7788_v13 = vld [vmem:[#allocation15_spill] sm:$0xff]  ;;  %v5540_v18 = vpop.permute.xlu1 %755 }
 0x21e   :  { %v1273_v36 = vpack.c.bf16 %v1175_v32, %v1168_v15  ;;  %v1272_v20 = vpack.c.bf16 %v1174_v47, %v1167_v46  ;;  %v1059_v40 = vadd.f32 %v7783_v1, %v851_v55  ;;  %v1066_v59 = vadd.f32 %v5225_v21, %v858_v19  ;;  %v7790_v15 = vld [vmem:[#allocation20_spill] sm:$0xff] }
 0x21f   :  { %v1170_v17 = vmax.f32 %v1058_v62, 0.0  ;;  %v1172_v11 = vmax.f32 %v1060_v41, 0.0  ;;  %v1179_v45 = vmax.f32 %v1067_v39, 0.0  ;;  %v1169_v25 = vmax.f32 %v1057_v5, 0.0  ;;  %v7789_v39 = vld [vmem:[#allocation80_spill] sm:$0xff]  ;;  %v7792_v62 = vld [vmem:[#allocation35_spill] sm:$0xff] }
 0x220   :  { %1589 = vmatprep.subr.bf16.mxu0 %v1273_v36  ;;  %3536 = vmatprep.subr.bf16.mxu1 %v1273_v36  ;;  %v1176_v2 = vmax.f32 %v1064_v48, 0.0  ;;  %v1171_v32 = vmax.f32 %v1059_v40, 0.0  ;;  %v1178_v23 = vmax.f32 %v1066_v59, 0.0  ;;  %v909_v19 = vmul.f32 %v5288_v10, %v7788_v13  ;;  %v7794_v5 = vld [vmem:[#allocation50_spill] sm:$0xff] }
 0x221   :  { %1590 = vmatpush1.bf16.msra.mxu0 %v1272_v20  ;;  %3544 = vmatpush1.bf16.msra.mxu1 %v1272_v20  ;;  %v5530_v44 = vpack.c.bf16 %v1177_v38, %v1170_v17  ;;  %v5532_v47 = vpack.c.bf16 %v1179_v45, %v1172_v11  ;;  %v916_v31 = vmul.f32 %v5242_v42, %v7789_v39  ;;  %v7793_v20 = vld [vmem:[#allocation16_spill] sm:$0xff] }
 0x222   :  { %v5534_v24 = vpack.c.bf16 %v1176_v2, %v1169_v25  ;;  %v5536_v0 = vpack.c.bf16 %v1178_v23, %v1171_v32  ;;  %v895_v46 = vmul.f32 %v5349_v50, %v7790_v15  ;;  %v1117_v48 = vadd.f32 %v5154_v43, %v909_v19  ;;  %v7797_v32 = vld [vmem:[#allocation38_spill] sm:$0xff]  ;;  %v7798_v19 = vld [vmem:[#allocation59_spill] sm:$0xff] }
 0x223   :  { %v902_v55 = vmul.f32 %v5269_v49, %v7791_v14  ;;  %v881_v41 = vmul.f32 %v5415_v30, %v7792_v62  ;;  %v1124_v36 = vadd.f32 %v5148_v7, %v916_v31  ;;  %v888_v38 = vmul.f32 %v5325_v54, %v7793_v20  ;;  %v7795_v30 = vld [vmem:[#allocation26_spill] sm:$0xff]  ;;  %v7796_v54 = vld [vmem:[#allocation57_spill] sm:$0xff] }
 0x224   :  { %v1103_v10 = vadd.f32 %v5158_v4, %v895_v46  ;;  %v867_v42 = vmul.f32 %v5470_v61, %v7794_v5  ;;  %v1229_v17 = vmax.f32 %v1117_v48, 0.0  ;;  %v874_v7 = vmul.f32 %v5389_v57, %v7795_v30  ;;  %v5565_v61 = vpop.permute.xlu1 %963  ;;  %v7800_v62 = vld [vmem:[#allocation53_spill] sm:$0xff]  ;;  %v7802_v20 = vld [vmem:[#allocation62_spill] sm:$0xff] }
 0x225   :  { %v1110_v50 = vadd.f32 %v5152_v60, %v902_v55  ;;  %v1089_v43 = vadd.f32 %v5160_v63, %v881_v41  ;;  %v1236_v11 = vmax.f32 %v1124_v36, 0.0  ;;  %v1096_v40 = vadd.f32 %v5156_v33, %v888_v38  ;;  %v7799_v55 = vld [vmem:[#allocation56_spill] sm:$0xff] }
 0x226   :  { %v1215_v49 = vmax.f32 %v1103_v10, 0.0  ;;  %v1075_v45 = vadd.f32 %v7780_v6, %v867_v42  ;;  %v853_v25 = vmul.f32 %v5500_v58, %v7796_v54  ;;  %v1082_v63 = vadd.f32 %v5162_v52, %v874_v7  ;;  %v7801_v36 = vld [vmem:[#allocation64_spill] sm:$0xff] }
 0x227   :  { %v1222_v59 = vmax.f32 %v1110_v50, 0.0  ;;  %v1201_v4 = vmax.f32 %v1089_v43, 0.0  ;;  %v5567_v2 = vpack.c.bf16 %v1236_v11, %v1229_v17  ;;  %v1208_v60 = vmax.f32 %v1096_v40, 0.0  ;;  %v7803_v17 = vld [vmem:[#allocation69_spill] sm:$0xff] }
 0x228   :  { %v860_v33 = vmul.f32 %v5448_v29, %v7797_v32  ;;  %v1187_v57 = vmax.f32 %v1075_v45, 0.0  ;;  %v1061_v13 = vadd.f32 %v7783_v1, %v853_v25  ;;  %v839_v6 = vmul.f32 %v5540_v18, %v7798_v19  ;;  %v5608_v32 = vld [vmem:[#allocation2 + $0xc0] sm:$0xff]   ;;  %v7813_v19 = vld [vmem:[#allocation68_spill] sm:$0xff] }
 0x229   :  { %v5572_v23 = vpack.c.bf16 %v1222_v59, %v1215_v49  ;;  %v5577_v39 = vpack.c.bf16 %v1208_v60, %v1201_v4  ;;  %v1194_v58 = vmax.f32 %v1082_v63, 0.0  ;;  %v834_v1 = vmul.f32 %v5540_v18, %v7799_v55  ;;  %v5606_v63 = vld [vmem:[#allocation2] sm:$0xff]  }
 0x22a   :  { %v1068_v31 = vadd.f32 %v5225_v21, %v860_v33  ;;  %v1173_v15 = vmax.f32 %v1061_v13, 0.0  ;;  %v1047_v46 = vadd.f32 %v5565_v61, %v839_v6  ;;  %v833_v41 = vmul.f32 %v5540_v18, %v7800_v62  ;;  %v7817_v62 = vld [vmem:[#allocation82_spill] sm:$0xff] }
 0x22b   :  { %v5581_v52 = vpack.c.bf16 %v1194_v58, %v1187_v57  ;;  %v1042_v21 = vadd.f32 %v5565_v61, %v834_v1  ;;  %v7804_v33 = vmov 0   ;;  %v5620_v57 = vld [vmem:[#allocation2 + $0x8] sm:$0xff]   ;;  %v7814_v58 = vld [vmem:[#allocation63_spill] sm:$0xff] }
 0x22c   :  { %v1180_v48 = vmax.f32 %v1068_v31, 0.0  ;;  %v1041_v5 = vadd.f32 %v5565_v61, %v833_v41  ;;  %v1159_v4 = vmax.f32 %v1047_v46, 0.0  ;;  %v836_v31 = vmul.f32 %v5540_v18, %v7814_v58  ;;  %v7815_v46 = vld [vmem:[#allocation61_spill] sm:$0xff]  ;;  %v7816_v1 = vld [vmem:[#allocation79_spill] sm:$0xff]  ;;  %v5804_v58 = vld [vmem:[#allocation2 + $0x98] sm:$0xff]  }
 0x22d   :  { %v1154_v40 = vmax.f32 %v1042_v21, 0.0  ;;  %v7818_v41 = vld [vmem:[#allocation65_spill] sm:$0xff] }
 0x22e   :  { %v5583_v29 = vpack.c.bf16 %v1180_v48, %v1173_v15  ;;  %v1153_v7 = vmax.f32 %v1041_v5, 0.0  ;;  %v838_v48 = vmul.f32 %v5540_v18, %v7815_v46  ;;  %v7820_v5 = vld [vmem:[#allocation58_spill] sm:$0xff]  ;;  %v5822_v46 = vld [vmem:[#allocation2 + $0xb0] sm:$0xff]  }
 0x24e   :  { %v5585_v14 = vpop.permute.xlu0 %760 }
 0x24f   :  { %v841_v10 = vmul.f32 %v5585_v14, %v7801_v36  ;;  %v840_v38 = vmul.f32 %v5585_v14, %v7802_v20  ;;  %v846_v50 = vmul.f32 %v5585_v14, %v7803_v17  ;;  %v845_v6 = vmul.f32 %v5585_v14, %v7813_v19  ;;  %v5792_v19 = vld [vmem:[#allocation2 + $0x88] sm:$0xff]  }
 0x250   :  { %v842_v36 = vmul.f32 %v5585_v14, %v7818_v41  ;;  %v1044_v20 = vadd.f32 %v5565_v61, %v836_v31  ;;  %v835_v17 = vmul.f32 %v5540_v18, %v7820_v5  ;;  %v5810_v31 = vld [vmem:[#allocation2 + $0xa0] sm:$0xff]  }
 0x252   :  { %v5597_v42 = vpop.permute.xlu0 %968 }
 0x253   :  { %v1049_v43 = vadd.f32 %v5597_v42, %v841_v10  ;;  %v1048_v11 = vadd.f32 %v5597_v42, %v840_v38  ;;  %v1054_v49 = vadd.f32 %v5597_v42, %v846_v50  ;;  %v1053_v55 = vadd.f32 %v5597_v42, %v845_v6  ;;  %v7819_v10 = vld [vmem:[#allocation67_spill] sm:$0xff] }
 0x254   :  { %v844_v21 = vmul.f32 %v5585_v14, %v7819_v10  ;;  %v1046_v38 = vadd.f32 %v5565_v61, %v838_v48  ;;  %v1050_v50 = vadd.f32 %v5597_v42, %v842_v36  ;;  %v5798_v6 = vld [vmem:[#allocation2 + $0x90] sm:$0xff]   ;;  %v5828_v48 = vld [vmem:[#allocation2 + $0xb8] sm:$0xff]  }
 0x255   :  { %v1161_v30 = vmax.f32 %v1049_v43, 0.0  ;;  %v1160_v59 = vmax.f32 %v1048_v11, 0.0  ;;  %v1166_v45 = vmax.f32 %v1054_v49, 0.0  ;;  %v7821_v43 = vld [vmem:[#allocation60_spill] sm:$0xff] }
 0x256   :  { %v5674_v11 = vld [vmem:[#allocation2 + $0x18] sm:$0xff]  }
 0x257   :  { %v1266_v54 = vpack.c.bf16 %v1161_v30, %v1154_v40  ;;  %v1265_v25 = vpack.c.bf16 %v1160_v59, %v1153_v7  ;;  %v5604_v60 = vpack.c.bf16 %v1166_v45, %v1159_v4  ;;  %v1165_v40 = vmax.f32 %v1053_v55, 0.0 }
 0x258   :  { %v1043_v30 = vadd.f32 %v5565_v61, %v835_v17  ;;  %v1162_v59 = vmax.f32 %v1050_v50, 0.0 }
 0x259   :  { %1591 = vmatprep.subr.bf16.mxu0 %v1266_v54  ;;  %3537 = vmatprep.subr.bf16.mxu1 %v1266_v54  ;;  %v5690_v54 = vld [vmem:[#allocation2 + $0x20] sm:$0xff]  }
 0x25a   :  { %1592 = vmatpush1.bf16.msra.mxu0 %v1265_v25  ;;  %3545 = vmatpush1.bf16.msra.mxu1 %v1265_v25  ;;  %v5692_v25 = vld [vmem:[#allocation2 + $0xe0] sm:$0xff]  }
 0x25b   :  { %1930 = vmatprep.subr.bf16.mxu1 %v5202_v53  ;;  %2283 = vmatprep.subr.bf16.mxu0 %v5204_v9  ;;  %v5622_v53 = vld [vmem:[#allocation2 + $0xc8] sm:$0xff]   ;;  %v7805_v9 = vld [vmem:[#allocation73_spill] sm:$0xff] }
 0x25d   :  { %1610 = vmatmul.mubr.bf16.vlgmr.msra.gmra.mxu0 %v5606_v63  ;;  %1850 = vmatmul.mubr.bf16.vlgmr.msra.gmra.mxu1 %v5608_v32 }
 0x25e   :  { %1931 = vmatpush1.bf16.msra.mxu1 %v5208_v26  ;;  %2284 = vmatpush1.bf16.msra.mxu0 %v5210_v35  ;;  %v7806_v26 = vld [vmem:[#allocation74_spill] sm:$0xff]  ;;  %v7807_v35 = vld [vmem:[#allocation75_spill] sm:$0xff] }
 0x25f   :  { %1932 = vmatprep.subr.bf16.mxu1 %v5244_v34  ;;  %2285 = vmatprep.subr.bf16.mxu0 %v5246_v27  ;;  %v5636_v34 = vld [vmem:[#allocation2 + $0x10] sm:$0xff]  }
 0x260   :  { %1619 = vmatprep.mubr.bf16.mxu0 %v7804_v33  ;;  %1859 = vmatprep.mubr.bf16.mxu1 %v7804_v33  ;;  %v5638_v27 = vld [vmem:[#allocation2 + $0xd0] sm:$0xff]  }
 0x262   :  { %1933 = vmatpush1.bf16.msra.mxu1 %v5252_v22  ;;  %2286 = vmatpush1.bf16.msra.mxu0 %v5262_v16  ;;  %v7808_v22 = vld [vmem:[#allocation76_spill] sm:$0xff]  ;;  %v7809_v16 = vld [vmem:[#allocation71_spill] sm:$0xff] }
 0x263   :  { %1934 = vmatprep.subr.bf16.mxu1 %v5332_v37  ;;  %2287 = vmatprep.subr.bf16.mxu0 %v5334_v51  ;;  %v7810_v37 = vld [vmem:[#allocation77_spill] sm:$0xff]  ;;  %v7811_v51 = vld [vmem:[#allocation78_spill] sm:$0xff] }
 0x265   :  { %1620 = vmatmul.mubr.bf16.gmra.mxu0 %v5620_v57  ;;  %1860 = vmatmul.mubr.bf16.gmra.mxu1 %v5622_v53 }
 0x266   :  { %1935 = vmatpush1.bf16.msra.mxu1 %v5336_v3  ;;  %2288 = vmatpush1.bf16.msra.mxu0 %v7805_v9  ;;  %v7812_v3 = vld [vmem:[#allocation66_spill] sm:$0xff] }
 0x267   :  { %1936 = vmatprep.subr.bf16.mxu1 %v7806_v26  ;;  %2289 = vmatprep.subr.bf16.mxu0 %v7807_v35  ;;  %v843_v13 = vmul.f32 %v5585_v14, %v7812_v3  ;;  %v837_v14 = vmul.f32 %v5540_v18, %v7821_v43  ;;  %v1156_v18 = vmax.f32 %v1044_v20, 0.0  ;;  %v7822_v9 = vld [vmem:[#allocation70_spill] sm:$0xff]  ;;  %v5707_v26 = vld [vmem:[#allocation2 + $0x30] sm:$0xff]  }
 0x268   :  { %1629 = vmatprep.mubr.bf16.mxu0 %v7804_v33  ;;  %1869 = vmatprep.mubr.bf16.mxu1 %v7804_v33  ;;  %v5709_v35 = vld [vmem:[#allocation2 + $0xf0] sm:$0xff]   ;;  %v5731_v3 = vld [vmem:[#allocation2 + $0x48] sm:$0xff]  }
 0x269   :  { %v1051_v15 = vadd.f32 %v5597_v42, %v843_v13  ;;  %v1045_v7 = vadd.f32 %v5565_v61, %v837_v14  ;;  %v5741_v13 = vld [vmem:[#allocation2 + $0x50] sm:$0xff]  }
 0x26a   :  { %1937 = vmatpush1.bf16.msra.mxu1 %v7808_v22  ;;  %2290 = vmatpush1.bf16.msra.mxu0 %v7809_v16  ;;  %v5715_v22 = vld [vmem:[#allocation2 + $0x38] sm:$0xff]  }
 0x26b   :  { %1938 = vmatprep.subr.bf16.mxu1 %v7810_v37  ;;  %2291 = vmatprep.subr.bf16.mxu0 %v7811_v51  ;;  %v1163_v49 = vmax.f32 %v1051_v15, 0.0  ;;  %v1157_v61 = vmax.f32 %v1045_v7, 0.0  ;;  %v5717_v16 = vld [vmem:[#allocation2 + $0xf8] sm:$0xff]   ;;  %v5723_v37 = vld [vmem:[#allocation2 + $0x40] sm:$0xff]   ;;  %v5816_v15 = vld [vmem:[#allocation2 + $0xa8] sm:$0xff]  }
 0x26c   :  { %v7823_v51 = vld [vmem:[#allocation72_spill] sm:$0xff] }
 0x26d   :  { %1630 = vmatmul.mubr.bf16.gmra.mxu0 %v5636_v34  ;;  %1870 = vmatmul.mubr.bf16.gmra.mxu1 %v5638_v27  ;;  %v1268_v45 = vpack.c.bf16 %v1163_v49, %v1156_v18 }
 0x26e   :  { %1939 = vmatpush1.bf16.msra.mxu1 %v7816_v1  ;;  %2292 = vmatpush1.bf16.msra.mxu0 %v7817_v62 }
 0x26f   :  { %1940 = vmatprep.subr.bf16.mxu1 %v5506_v8  ;;  %2293 = vmatprep.subr.bf16.mxu0 %v5508_v12  ;;  %v1052_v8 = vadd.f32 %v5597_v42, %v844_v21  ;;  %v5676_v12 = vld [vmem:[#allocation2 + $0xd8] sm:$0xff]   ;;  %v1158_v42 = vmax.f32 %v1046_v38, 0.0 }
 0x270   :  { %1639 = vmatprep.mubr.bf16.mxu0 %v7804_v33  ;;  %1879 = vmatprep.mubr.bf16.mxu1 %v7804_v33 }
 0x271   :  { %v1164_v4 = vmax.f32 %v1052_v8, 0.0 }
 0x272   :  { %1941 = vmatpush1.bf16.msra.mxu1 %v5512_v28  ;;  %2294 = vmatpush1.bf16.msra.mxu0 %v5514_v56  ;;  %v1270_v28 = vpack.c.bf16 %v1165_v40, %v1158_v42  ;;  %v1155_v56 = vmax.f32 %v1043_v30, 0.0 }
 0x273   :  { %1942 = vmatprep.subr.bf16.mxu1 %v5530_v44  ;;  %2295 = vmatprep.subr.bf16.mxu0 %v5532_v47  ;;  %v1269_v47 = vpack.c.bf16 %v1164_v4, %v1157_v61 }
 0x274   :  { %v1267_v44 = vpack.c.bf16 %v1162_v59, %v1155_v56 }
 0x275   :  { %1640 = vmatmul.mubr.bf16.gmra.mxu0 %v5674_v11  ;;  %1880 = vmatmul.mubr.bf16.gmra.mxu1 %v5676_v12 }
 0x276   :  { %1943 = vmatpush1.bf16.msra.mxu1 %v5534_v24  ;;  %2296 = vmatpush1.bf16.msra.mxu0 %v5536_v0  ;;  %v5699_v24 = vld [vmem:[#allocation2 + $0x28] sm:$0xff]  }
 0x277   :  { %1944 = vmatprep.subr.bf16.mxu1 %v1268_v45  ;;  %2297 = vmatprep.subr.bf16.mxu0 %v1270_v28  ;;  %v5701_v0 = vld [vmem:[#allocation2 + $0xe8] sm:$0xff]  }
 0x278   :  { %1649 = vmatprep.mubr.bf16.mxu0 %v7804_v33  ;;  %1889 = vmatprep.mubr.bf16.mxu1 %v7804_v33 }
 0x27a   :  { %1945 = vmatpush1.bf16.msra.mxu1 %v1267_v44  ;;  %2298 = vmatpush1.bf16.msra.mxu0 %v1269_v47 }
 0x27b   :  { %3450 = vmatprep.subr.bf16.mxu1 %v7822_v9 }
 0x27d   :  { %1650 = vmatmul.mubr.bf16.gmra.mxu0 %v5690_v54  ;;  %1890 = vmatmul.mubr.bf16.gmra.mxu1 %v5692_v25 }
 0x27e   :  { %1659 = vmatprep.mubr.bf16.mxu0 %v7804_v33  ;;  %1899 = vmatprep.mubr.bf16.mxu1 %v7804_v33 }
 0x285   :  { %1660 = vmatmul.mubr.bf16.gmra.mxu0 %v5699_v24  ;;  %1900 = vmatmul.mubr.bf16.gmra.mxu1 %v5701_v0 }
 0x286   :  { %1669 = vmatprep.mubr.bf16.mxu0 %v7804_v33  ;;  %1909 = vmatprep.mubr.bf16.mxu1 %v7804_v33 }
 0x28d   :  { %1670 = vmatmul.mubr.bf16.gmra.mxu0 %v5707_v26  ;;  %1910 = vmatmul.mubr.bf16.gmra.mxu1 %v5709_v35 }
 0x28e   :  { %1679 = vmatprep.mubr.bf16.mxu0 %v7804_v33  ;;  %1919 = vmatprep.mubr.bf16.mxu1 %v7804_v33 }
 0x295   :  { %1680 = vmatmul.mubr.bf16.gmra.mxu0 %v5715_v22  ;;  %1920 = vmatmul.mubr.bf16.gmra.mxu1 %v5717_v16 }
 0x296   :  { %1689 = vmatprep.mubr.bf16.mxu0 %v7804_v33  ;;  %1962 = vmatprep.mubr.bf16.mxu1 %v7804_v33 }
 0x29d   :  { %1690 = vmatmul.mubr.bf16.gmra.mxu0 %v5723_v37  ;;  %1963 = vmatmul.mubr.bf16.vlgmr.msra.gmra.mxu1 %v5606_v63 }
 0x29e   :  { %3451 = vmatpush3.bf16.msra.mxu1 %v7822_v9  ;;  %1699 = vmatprep.mubr.bf16.mxu0 %v7804_v33 }
 0x29f   :  { %3452 = vmatprep.subr.bf16.mxu1 %v7823_v51  ;;  %1972 = vmatprep.mubr.bf16.mxu1 %v7804_v33 }
 0x2a2   :  { %3453 = vmatpush3.bf16.msra.mxu1 %v7823_v51 }
 0x2a3   :  { %3454 = vmatprep.subr.bf16.mxu1 %v5567_v2 }
 0x2a5   :  { %1700 = vmatmul.mubr.bf16.gmra.mxu0 %v5731_v3  ;;  %1973 = vmatmul.mubr.bf16.gmra.mxu1 %v5620_v57 }
 0x2a6   :  { %3455 = vmatpush3.bf16.msra.mxu1 %v5567_v2  ;;  %1709 = vmatprep.mubr.bf16.mxu0 %v7804_v33  ;;  %v5751_v2 = vld [vmem:[#allocation2 + $0x58] sm:$0xff]  }
 0x2a7   :  { %3456 = vmatprep.subr.bf16.mxu1 %v5572_v23  ;;  %1982 = vmatprep.mubr.bf16.mxu1 %v7804_v33 }
 0x2aa   :  { %3457 = vmatpush3.bf16.msra.mxu1 %v5572_v23  ;;  %v5761_v23 = vld [vmem:[#allocation2 + $0x60] sm:$0xff]  }
 0x2ab   :  { %3458 = vmatprep.subr.bf16.mxu1 %v5577_v39 }
 0x2ad   :  { %1710 = vmatmul.mubr.bf16.gmra.mxu0 %v5741_v13  ;;  %1983 = vmatmul.mubr.bf16.gmra.mxu1 %v5636_v34 }
 0x2ae   :  { %3459 = vmatpush3.bf16.msra.mxu1 %v5577_v39  ;;  %1719 = vmatprep.mubr.bf16.mxu0 %v7804_v33  ;;  %v5768_v39 = vld [vmem:[#allocation2 + $0x68] sm:$0xff]  }
 0x2af   :  { %3460 = vmatprep.subr.bf16.mxu1 %v5581_v52  ;;  %1992 = vmatprep.mubr.bf16.mxu1 %v7804_v33 }
 0x2b2   :  { %3461 = vmatpush3.bf16.msra.mxu1 %v5581_v52  ;;  %v5774_v52 = vld [vmem:[#allocation2 + $0x70] sm:$0xff]  }
 0x2b3   :  { %3462 = vmatprep.subr.bf16.mxu1 %v5583_v29 }
 0x2b5   :  { %1720 = vmatmul.mubr.bf16.gmra.mxu0 %v5751_v2  ;;  %1993 = vmatmul.mubr.bf16.gmra.mxu1 %v5674_v11 }
 0x2b6   :  { %3463 = vmatpush3.bf16.msra.mxu1 %v5583_v29  ;;  %1729 = vmatprep.mubr.bf16.mxu0 %v7804_v33  ;;  %v5780_v29 = vld [vmem:[#allocation2 + $0x78] sm:$0xff]  }
 0x2b7   :  { %3464 = vmatprep.subr.bf16.mxu1 %v5604_v60  ;;  %2002 = vmatprep.mubr.bf16.mxu1 %v7804_v33 }
 0x2ba   :  { %3465 = vmatpush3.bf16.msra.mxu1 %v5604_v60  ;;  %v5786_v60 = vld [vmem:[#allocation2 + $0x80] sm:$0xff]  }
 0x2bd   :  { %1730 = vmatmul.mubr.bf16.gmra.mxu0 %v5761_v23  ;;  %2003 = vmatmul.mubr.bf16.gmra.mxu1 %v5690_v54 }
 0x2be   :  { %1739 = vmatprep.mubr.bf16.mxu0 %v7804_v33  ;;  %2012 = vmatprep.mubr.bf16.mxu1 %v7804_v33 }
 0x2c5   :  { %1740 = vmatmul.mubr.bf16.gmra.mxu0 %v5768_v39  ;;  %2013 = vmatmul.mubr.bf16.gmra.mxu1 %v5699_v24 }
 0x2c6   :  { %1749 = vmatprep.mubr.bf16.mxu0 %v7804_v33  ;;  %2022 = vmatprep.mubr.bf16.mxu1 %v7804_v33 }
 0x2cd   :  { %1750 = vmatmul.mubr.bf16.gmra.mxu0 %v5774_v52  ;;  %2023 = vmatmul.mubr.bf16.gmra.mxu1 %v5707_v26 }
 0x2ce   :  { %1759 = vmatprep.mubr.bf16.mxu0 %v7804_v33  ;;  %2032 = vmatprep.mubr.bf16.mxu1 %v7804_v33 }
 0x2d5   :  { %1760 = vmatmul.mubr.bf16.gmra.mxu0 %v5780_v29  ;;  %2033 = vmatmul.mubr.bf16.gmra.mxu1 %v5715_v22 }
 0x2d6   :  { %1769 = vmatprep.mubr.bf16.mxu0 %v7804_v33  ;;  %2042 = vmatprep.mubr.bf16.mxu1 %v7804_v33 }
 0x2dd   :  { %1770 = vmatmul.mubr.bf16.gmra.mxu0 %v5786_v60  ;;  %2043 = vmatmul.mubr.bf16.gmra.mxu1 %v5723_v37 }
 0x2de   :  { %1779 = vmatprep.mubr.bf16.mxu0 %v7804_v33  ;;  %2052 = vmatprep.mubr.bf16.mxu1 %v7804_v33 }
 0x2e5   :  { %1780 = vmatmul.mubr.bf16.gmra.mxu0 %v5792_v19  ;;  %2053 = vmatmul.mubr.bf16.gmra.mxu1 %v5731_v3 }
 0x2e6   :  { %1789 = vmatprep.mubr.bf16.mxu0 %v7804_v33  ;;  %2062 = vmatprep.mubr.bf16.mxu1 %v7804_v33 }
 0x2ed   :  { %1790 = vmatmul.mubr.bf16.gmra.mxu0 %v5798_v6  ;;  %2063 = vmatmul.mubr.bf16.gmra.mxu1 %v5741_v13 }
 0x2ee   :  { %1799 = vmatprep.mubr.bf16.mxu0 %v7804_v33  ;;  %2072 = vmatprep.mubr.bf16.mxu1 %v7804_v33 }
 0x2f5   :  { %1800 = vmatmul.mubr.bf16.gmra.mxu0 %v5804_v58  ;;  %2073 = vmatmul.mubr.bf16.gmra.mxu1 %v5751_v2 }
 0x2f6   :  { %1809 = vmatprep.mubr.bf16.mxu0 %v7804_v33  ;;  %2082 = vmatprep.mubr.bf16.mxu1 %v7804_v33 }
 0x2fd   :  { %1810 = vmatmul.mubr.bf16.gmra.mxu0 %v5810_v31  ;;  %2083 = vmatmul.mubr.bf16.gmra.mxu1 %v5761_v23 }
 0x2fe   :  { %1819 = vmatprep.mubr.bf16.mxu0 %v7804_v33  ;;  %2092 = vmatprep.mubr.bf16.mxu1 %v7804_v33 }
 0x305   :  { %1820 = vmatmul.mubr.bf16.gmra.mxu0 %v5816_v15  ;;  %2093 = vmatmul.mubr.bf16.gmra.mxu1 %v5768_v39 }
 0x306   :  { %1829 = vmatprep.mubr.bf16.mxu0 %v7804_v33  ;;  %2102 = vmatprep.mubr.bf16.mxu1 %v7804_v33 }
 0x30d   :  { %1830 = vmatmul.mubr.bf16.gmra.mxu0 %v5822_v46  ;;  %2103 = vmatmul.mubr.bf16.gmra.mxu1 %v5774_v52 }
 0x30e   :  { %1839 = vmatprep.mubr.bf16.mxu0 %v7804_v33  ;;  %2112 = vmatprep.mubr.bf16.mxu1 %v7804_v33 }
 0x315   :  { %1840 = vmatmul.mubr.bf16.gmra.mxu0 %v5828_v48  ;;  %2113 = vmatmul.mubr.bf16.gmra.mxu1 %v5780_v29 }
 0x316   :  { %2122 = vmatprep.mubr.bf16.mxu1 %v7804_v33  ;;  %2315 = vmatprep.mubr.bf16.mxu0 %v7804_v33 }
 0x31d   :  { %v1611_v55 = vpop.f32.mrf.mxu0  ;;  %v1851_v1 = vpop.f32.mrf.mxu1  ;;  %2123 = vmatmul.mubr.bf16.gmra.mxu1 %v5786_v60  ;;  %2316 = vmatmul.mubr.bf16.vlgmr.msra.gmra.mxu0 %v5606_v63 }
 0x31e   :  { %2925 = vst [vmem:[%s7355_s4] sm:$0xff] %v1611_v55  ;;  %3261 = vst [vmem:[%s7355_s4 + $0xa80] sm:$0xff] %v1851_v1  ;;  %2132 = vmatprep.mubr.bf16.mxu1 %v7804_v33  ;;  %2325 = vmatprep.mubr.bf16.mxu0 %v7804_v33 }
 0x31f   :  { %v1613_v62 = vpop.f32.mrf.mxu0  ;;  %v1853_v41 = vpop.f32.mrf.mxu1 }
 0x320   :  { %2926 = vst [vmem:[%s7355_s4 + $0x8] sm:$0xff] %v1613_v62  ;;  %3262 = vst [vmem:[%s7355_s4 + $0xa88] sm:$0xff] %v1853_v41 }
 0x321   :  { %v1615_v63 = vpop.f32.mrf.mxu0  ;;  %v1855_v36 = vpop.f32.mrf.mxu1 }
 0x322   :  { %2932 = vst [vmem:[%s7355_s4 + $0x38] sm:$0xff] %v1615_v63  ;;  %3268 = vst [vmem:[%s7355_s4 + $0xab8] sm:$0xff] %v1855_v36 }
 0x323   :  { %v1617_v10 = vpop.f32.mrf.mxu0  ;;  %v1857_v21 = vpop.f32.mrf.mxu1 }
 0x324   :  { %2933 = vst [vmem:[%s7355_s4 + $0x40] sm:$0xff] %v1617_v10  ;;  %3269 = vst [vmem:[%s7355_s4 + $0xac0] sm:$0xff] %v1857_v21 }
 0x325   :  { %v1621_v20 = vpop.f32.mrf.mxu0  ;;  %v1861_v38 = vpop.f32.mrf.mxu1  ;;  %2133 = vmatmul.mubr.bf16.gmra.mxu1 %v5792_v19  ;;  %2326 = vmatmul.mubr.bf16.gmra.mxu0 %v5620_v57 }
 0x326   :  { %2939 = vst [vmem:[%s7355_s4 + $0x70] sm:$0xff] %v1621_v20  ;;  %3275 = vst [vmem:[%s7355_s4 + $0xaf0] sm:$0xff] %v1861_v38  ;;  %2142 = vmatprep.mubr.bf16.mxu1 %v7804_v33  ;;  %2335 = vmatprep.mubr.bf16.mxu0 %v7804_v33 }
 0x327   :  { %v1623_v5 = vpop.f32.mrf.mxu0  ;;  %v1863_v17 = vpop.f32.mrf.mxu1 }
 0x328   :  { %2940 = vst [vmem:[%s7355_s4 + $0x78] sm:$0xff] %v1623_v5  ;;  %3276 = vst [vmem:[%s7355_s4 + $0xaf8] sm:$0xff] %v1863_v17 }
 0x329   :  { %v1625_v57 = vpop.f32.mrf.mxu0  ;;  %v1865_v50 = vpop.f32.mrf.mxu1 }
 0x32a   :  { %2946 = vst [vmem:[%s7355_s4 + $0xa8] sm:$0xff] %v1625_v57  ;;  %3282 = vst [vmem:[%s7355_s4 + $0xb28] sm:$0xff] %v1865_v50 }
 0x32b   :  { %v1627_v43 = vpop.f32.mrf.mxu0  ;;  %v1867_v14 = vpop.f32.mrf.mxu1 }
 0x32c   :  { %2947 = vst [vmem:[%s7355_s4 + $0xb0] sm:$0xff] %v1627_v43  ;;  %3283 = vst [vmem:[%s7355_s4 + $0xb30] sm:$0xff] %v1867_v14 }
 0x32d   :  { %v1631_v8 = vpop.f32.mrf.mxu0  ;;  %v1871_v49 = vpop.f32.mrf.mxu1  ;;  %2143 = vmatmul.mubr.bf16.gmra.mxu1 %v5798_v6  ;;  %2336 = vmatmul.mubr.bf16.gmra.mxu0 %v5636_v34 }
 0x32e   :  { %2953 = vst [vmem:[%s7355_s4 + $0xe0] sm:$0xff] %v1631_v8  ;;  %3289 = vst [vmem:[%s7355_s4 + $0xb60] sm:$0xff] %v1871_v49  ;;  %2152 = vmatprep.mubr.bf16.mxu1 %v7804_v33  ;;  %2345 = vmatprep.mubr.bf16.mxu0 %v7804_v33 }
 0x32f   :  { %v1633_v40 = vpop.f32.mrf.mxu0  ;;  %v1873_v30 = vpop.f32.mrf.mxu1 }
 0x330   :  { %2954 = vst [vmem:[%s7355_s4 + $0xe8] sm:$0xff] %v1633_v40  ;;  %3290 = vst [vmem:[%s7355_s4 + $0xb68] sm:$0xff] %v1873_v30 }
 0x331   :  { %v1635_v7 = vpop.f32.mrf.mxu0  ;;  %v1875_v18 = vpop.f32.mrf.mxu1 }
 0x332   :  { %2960 = vst [vmem:[%s7355_s4 + $0x118] sm:$0xff] %v1635_v7  ;;  %3296 = vst [vmem:[%s7355_s4 + $0xb98] sm:$0xff] %v1875_v18 }
 0x333   :  { %v1637_v42 = vpop.f32.mrf.mxu0  ;;  %v1877_v59 = vpop.f32.mrf.mxu1 }
 0x334   :  { %2961 = vst [vmem:[%s7355_s4 + $0x120] sm:$0xff] %v1637_v42  ;;  %3297 = vst [vmem:[%s7355_s4 + $0xba0] sm:$0xff] %v1877_v59 }
 0x335   :  { %v1641_v4 = vpop.f32.mrf.mxu0  ;;  %v1881_v45 = vpop.f32.mrf.mxu1  ;;  %2153 = vmatmul.mubr.bf16.gmra.mxu1 %v5804_v58  ;;  %2346 = vmatmul.mubr.bf16.gmra.mxu0 %v5674_v11 }
 0x336   :  { %2967 = vst [vmem:[%s7355_s4 + $0x150] sm:$0xff] %v1641_v4  ;;  %3303 = vst [vmem:[%s7355_s4 + $0xbd0] sm:$0xff] %v1881_v45  ;;  %2162 = vmatprep.mubr.bf16.mxu1 %v7804_v33  ;;  %2355 = vmatprep.mubr.bf16.mxu0 %v7804_v33 }
 0x337   :  { %v1643_v28 = vpop.f32.mrf.mxu0  ;;  %v1883_v56 = vpop.f32.mrf.mxu1 }
 0x338   :  { %2968 = vst [vmem:[%s7355_s4 + $0x158] sm:$0xff] %v1643_v28  ;;  %3304 = vst [vmem:[%s7355_s4 + $0xbd8] sm:$0xff] %v1883_v56 }
 0x339   :  { %v1645_v61 = vpop.f32.mrf.mxu0  ;;  %v1885_v44 = vpop.f32.mrf.mxu1 }
 0x33a   :  { %2974 = vst [vmem:[%s7355_s4 + $0x188] sm:$0xff] %v1645_v61  ;;  %3310 = vst [vmem:[%s7355_s4 + $0xc08] sm:$0xff] %v1885_v44 }
 0x33b   :  { %v1647_v47 = vpop.f32.mrf.mxu0  ;;  %v1887_v9 = vpop.f32.mrf.mxu1 }
 0x33c   :  { %2975 = vst [vmem:[%s7355_s4 + $0x190] sm:$0xff] %v1647_v47  ;;  %3311 = vst [vmem:[%s7355_s4 + $0xc10] sm:$0xff] %v1887_v9 }
 0x33d   :  { %v1651_v51 = vpop.f32.mrf.mxu0  ;;  %v1891_v55 = vpop.f32.mrf.mxu1  ;;  %2163 = vmatmul.mubr.bf16.gmra.mxu1 %v5810_v31  ;;  %2356 = vmatmul.mubr.bf16.gmra.mxu0 %v5690_v54 }
 0x33e   :  { %2981 = vst [vmem:[%s7355_s4 + $0x1c0] sm:$0xff] %v1651_v51  ;;  %3317 = vst [vmem:[%s7355_s4 + $0xc40] sm:$0xff] %v1891_v55  ;;  %2172 = vmatprep.mubr.bf16.mxu1 %v7804_v33  ;;  %2365 = vmatprep.mubr.bf16.mxu0 %v7804_v33 }
 0x33f   :  { %v1653_v1 = vpop.f32.mrf.mxu0  ;;  %v1893_v62 = vpop.f32.mrf.mxu1 }
 0x340   :  { %2982 = vst [vmem:[%s7355_s4 + $0x1c8] sm:$0xff] %v1653_v1  ;;  %3318 = vst [vmem:[%s7355_s4 + $0xc48] sm:$0xff] %v1893_v62 }
 0x341   :  { %v1655_v41 = vpop.f32.mrf.mxu0  ;;  %v1895_v63 = vpop.f32.mrf.mxu1 }
 0x342   :  { %2988 = vst [vmem:[%s7355_s4 + $0x1f8] sm:$0xff] %v1655_v41  ;;  %3324 = vst [vmem:[%s7355_s4 + $0xc78] sm:$0xff] %v1895_v63 }
 0x343   :  { %v1657_v36 = vpop.f32.mrf.mxu0  ;;  %v1897_v10 = vpop.f32.mrf.mxu1 }
 0x344   :  { %2989 = vst [vmem:[%s7355_s4 + $0x200] sm:$0xff] %v1657_v36  ;;  %3325 = vst [vmem:[%s7355_s4 + $0xc80] sm:$0xff] %v1897_v10 }
 0x345   :  { %v1661_v21 = vpop.f32.mrf.mxu0  ;;  %v1901_v20 = vpop.f32.mrf.mxu1  ;;  %2173 = vmatmul.mubr.bf16.gmra.mxu1 %v5816_v15  ;;  %2366 = vmatmul.mubr.bf16.gmra.mxu0 %v5699_v24 }
 0x346   :  { %2995 = vst [vmem:[%s7355_s4 + $0x230] sm:$0xff] %v1661_v21  ;;  %3331 = vst [vmem:[%s7355_s4 + $0xcb0] sm:$0xff] %v1901_v20  ;;  %2182 = vmatprep.mubr.bf16.mxu1 %v7804_v33  ;;  %2375 = vmatprep.mubr.bf16.mxu0 %v7804_v33 }
 0x347   :  { %v1663_v38 = vpop.f32.mrf.mxu0  ;;  %v1903_v5 = vpop.f32.mrf.mxu1 }
 0x348   :  { %2996 = vst [vmem:[%s7355_s4 + $0x238] sm:$0xff] %v1663_v38  ;;  %3332 = vst [vmem:[%s7355_s4 + $0xcb8] sm:$0xff] %v1903_v5 }
 0x349   :  { %v1665_v17 = vpop.f32.mrf.mxu0  ;;  %v1905_v57 = vpop.f32.mrf.mxu1 }
 0x34a   :  { %3002 = vst [vmem:[%s7355_s4 + $0x268] sm:$0xff] %v1665_v17  ;;  %3338 = vst [vmem:[%s7355_s4 + $0xce8] sm:$0xff] %v1905_v57 }
 0x34b   :  { %v1667_v50 = vpop.f32.mrf.mxu0  ;;  %v1907_v43 = vpop.f32.mrf.mxu1 }
 0x34c   :  { %3003 = vst [vmem:[%s7355_s4 + $0x270] sm:$0xff] %v1667_v50  ;;  %3339 = vst [vmem:[%s7355_s4 + $0xcf0] sm:$0xff] %v1907_v43 }
 0x34d   :  { %v1671_v14 = vpop.f32.mrf.mxu0  ;;  %v1911_v8 = vpop.f32.mrf.mxu1  ;;  %2183 = vmatmul.mubr.bf16.gmra.mxu1 %v5822_v46  ;;  %2376 = vmatmul.mubr.bf16.gmra.mxu0 %v5707_v26 }
 0x34e   :  { %3009 = vst [vmem:[%s7355_s4 + $0x2a0] sm:$0xff] %v1671_v14  ;;  %3345 = vst [vmem:[%s7355_s4 + $0xd20] sm:$0xff] %v1911_v8  ;;  %2192 = vmatprep.mubr.bf16.mxu1 %v7804_v33  ;;  %2385 = vmatprep.mubr.bf16.mxu0 %v7804_v33 }
 0x34f   :  { %v1673_v49 = vpop.f32.mrf.mxu0  ;;  %v1913_v40 = vpop.f32.mrf.mxu1 }
 0x350   :  { %3010 = vst [vmem:[%s7355_s4 + $0x2a8] sm:$0xff] %v1673_v49  ;;  %3346 = vst [vmem:[%s7355_s4 + $0xd28] sm:$0xff] %v1913_v40 }
 0x351   :  { %v1675_v30 = vpop.f32.mrf.mxu0  ;;  %v1915_v7 = vpop.f32.mrf.mxu1 }
 0x352   :  { %3016 = vst [vmem:[%s7355_s4 + $0x2d8] sm:$0xff] %v1675_v30  ;;  %3352 = vst [vmem:[%s7355_s4 + $0xd58] sm:$0xff] %v1915_v7 }
 0x353   :  { %v1677_v18 = vpop.f32.mrf.mxu0  ;;  %v1917_v42 = vpop.f32.mrf.mxu1 }
 0x354   :  { %3017 = vst [vmem:[%s7355_s4 + $0x2e0] sm:$0xff] %v1677_v18  ;;  %3353 = vst [vmem:[%s7355_s4 + $0xd60] sm:$0xff] %v1917_v42 }
 0x355   :  { %v1681_v59 = vpop.f32.mrf.mxu0  ;;  %v1921_v4 = vpop.f32.mrf.mxu1  ;;  %2193 = vmatmul.mubr.bf16.gmra.mxu1 %v5828_v48  ;;  %2386 = vmatmul.mubr.bf16.gmra.mxu0 %v5715_v22 }
 0x356   :  { %3023 = vst [vmem:[%s7355_s4 + $0x310] sm:$0xff] %v1681_v59  ;;  %3359 = vst [vmem:[%s7355_s4 + $0xd90] sm:$0xff] %v1921_v4  ;;  %2202 = vmatprep.mubr.bf16.mxu1 %v7804_v33  ;;  %2395 = vmatprep.mubr.bf16.mxu0 %v7804_v33 }
 0x357   :  { %v1683_v45 = vpop.f32.mrf.mxu0  ;;  %v1923_v28 = vpop.f32.mrf.mxu1 }
 0x358   :  { %3024 = vst [vmem:[%s7355_s4 + $0x318] sm:$0xff] %v1683_v45  ;;  %3360 = vst [vmem:[%s7355_s4 + $0xd98] sm:$0xff] %v1923_v28 }
 0x359   :  { %v1685_v56 = vpop.f32.mrf.mxu0  ;;  %v1925_v61 = vpop.f32.mrf.mxu1 }
 0x35a   :  { %3030 = vst [vmem:[%s7355_s4 + $0x348] sm:$0xff] %v1685_v56  ;;  %3366 = vst [vmem:[%s7355_s4 + $0xdc8] sm:$0xff] %v1925_v61 }
 0x35b   :  { %v1687_v44 = vpop.f32.mrf.mxu0  ;;  %v1927_v47 = vpop.f32.mrf.mxu1 }
 0x35c   :  { %3031 = vst [vmem:[%s7355_s4 + $0x350] sm:$0xff] %v1687_v44  ;;  %3367 = vst [vmem:[%s7355_s4 + $0xdd0] sm:$0xff] %v1927_v47 }
 0x35d   :  { %v1691_v9 = vpop.f32.mrf.mxu0  ;;  %v1964_v51 = vpop.f32.mrf.mxu1  ;;  %2203 = vmatmul.mubr.bf16.gmra.mxu1 %v5608_v32  ;;  %2396 = vmatmul.mubr.bf16.gmra.mxu0 %v5723_v37 }
 0x35e   :  { %3037 = vst [vmem:[%s7355_s4 + $0x380] sm:$0xff] %v1691_v9  ;;  %2927 = vst [vmem:[%s7355_s4 + $0x10] sm:$0xff] %v1964_v51  ;;  %2212 = vmatprep.mubr.bf16.mxu1 %v7804_v33  ;;  %2405 = vmatprep.mubr.bf16.mxu0 %v7804_v33 }
 0x35f   :  { %v1693_v55 = vpop.f32.mrf.mxu0  ;;  %v1966_v1 = vpop.f32.mrf.mxu1 }
 0x360   :  { %3038 = vst [vmem:[%s7355_s4 + $0x388] sm:$0xff] %v1693_v55  ;;  %2928 = vst [vmem:[%s7355_s4 + $0x18] sm:$0xff] %v1966_v1 }
 0x361   :  { %v1695_v32 = vpop.f32.mrf.mxu0  ;;  %v1968_v62 = vpop.f32.mrf.mxu1 }
 0x362   :  { %3044 = vst [vmem:[%s7355_s4 + $0x3b8] sm:$0xff] %v1695_v32  ;;  %2934 = vst [vmem:[%s7355_s4 + $0x48] sm:$0xff] %v1968_v62 }
 0x363   :  { %v1697_v41 = vpop.f32.mrf.mxu0  ;;  %v1970_v63 = vpop.f32.mrf.mxu1 }
 0x364   :  { %3045 = vst [vmem:[%s7355_s4 + $0x3c0] sm:$0xff] %v1697_v41  ;;  %2935 = vst [vmem:[%s7355_s4 + $0x50] sm:$0xff] %v1970_v63 }
 0x365   :  { %v1701_v36 = vpop.f32.mrf.mxu0  ;;  %v1974_v10 = vpop.f32.mrf.mxu1  ;;  %2213 = vmatmul.mubr.bf16.gmra.mxu1 %v5622_v53  ;;  %2406 = vmatmul.mubr.bf16.gmra.mxu0 %v5731_v3 }
 0x366   :  { %3051 = vst [vmem:[%s7355_s4 + $0x3f0] sm:$0xff] %v1701_v36  ;;  %2941 = vst [vmem:[%s7355_s4 + $0x80] sm:$0xff] %v1974_v10  ;;  %2222 = vmatprep.mubr.bf16.mxu1 %v7804_v33  ;;  %2415 = vmatprep.mubr.bf16.mxu0 %v7804_v33 }
 0x367   :  { %v1703_v21 = vpop.f32.mrf.mxu0  ;;  %v1976_v20 = vpop.f32.mrf.mxu1 }
 0x368   :  { %3052 = vst [vmem:[%s7355_s4 + $0x3f8] sm:$0xff] %v1703_v21  ;;  %2942 = vst [vmem:[%s7355_s4 + $0x88] sm:$0xff] %v1976_v20 }
 0x369   :  { %v1705_v53 = vpop.f32.mrf.mxu0  ;;  %v1978_v38 = vpop.f32.mrf.mxu1 }
 0x36a   :  { %3058 = vst [vmem:[%s7355_s4 + $0x428] sm:$0xff] %v1705_v53  ;;  %2948 = vst [vmem:[%s7355_s4 + $0xb8] sm:$0xff] %v1978_v38 }
 0x36b   :  { %v1707_v5 = vpop.f32.mrf.mxu0  ;;  %v1980_v17 = vpop.f32.mrf.mxu1 }
 0x36c   :  { %3059 = vst [vmem:[%s7355_s4 + $0x430] sm:$0xff] %v1707_v5  ;;  %2949 = vst [vmem:[%s7355_s4 + $0xc0] sm:$0xff] %v1980_v17 }
 0x36d   :  { %v1711_v57 = vpop.f32.mrf.mxu0  ;;  %v1984_v50 = vpop.f32.mrf.mxu1  ;;  %2223 = vmatmul.mubr.bf16.gmra.mxu1 %v5638_v27  ;;  %2416 = vmatmul.mubr.bf16.gmra.mxu0 %v5741_v13 }
 0x36e   :  { %3065 = vst [vmem:[%s7355_s4 + $0x460] sm:$0xff] %v1711_v57  ;;  %2955 = vst [vmem:[%s7355_s4 + $0xf0] sm:$0xff] %v1984_v50  ;;  %2232 = vmatprep.mubr.bf16.mxu1 %v7804_v33  ;;  %2425 = vmatprep.mubr.bf16.mxu0 %v7804_v33 }
 0x36f   :  { %v1713_v43 = vpop.f32.mrf.mxu0  ;;  %v1986_v14 = vpop.f32.mrf.mxu1 }
 0x370   :  { %3066 = vst [vmem:[%s7355_s4 + $0x468] sm:$0xff] %v1713_v43  ;;  %2956 = vst [vmem:[%s7355_s4 + $0xf8] sm:$0xff] %v1986_v14  ;;  %v3616_v43 = vld [vmem:[#allocation2] sm:$0xff]  }
 0x371   :  { %v1715_v27 = vpop.f32.mrf.mxu0  ;;  %v1988_v8 = vpop.f32.mrf.mxu1 }
 0x372   :  { %3072 = vst [vmem:[%s7355_s4 + $0x498] sm:$0xff] %v1715_v27  ;;  %2962 = vst [vmem:[%s7355_s4 + $0x128] sm:$0xff] %v1988_v8 }
 0x373   :  { %v1717_v49 = vpop.f32.mrf.mxu0  ;;  %v1990_v40 = vpop.f32.mrf.mxu1 }
 0x374   :  { %3073 = vst [vmem:[%s7355_s4 + $0x4a0] sm:$0xff] %v1717_v49  ;;  %2963 = vst [vmem:[%s7355_s4 + $0x130] sm:$0xff] %v1990_v40 }
 0x375   :  { %v1721_v30 = vpop.f32.mrf.mxu0  ;;  %v1994_v7 = vpop.f32.mrf.mxu1  ;;  %2233 = vmatmul.mubr.bf16.gmra.mxu1 %v5676_v12  ;;  %2426 = vmatmul.mubr.bf16.gmra.mxu0 %v5751_v2 }
 0x376   :  { %3079 = vst [vmem:[%s7355_s4 + $0x4d0] sm:$0xff] %v1721_v30  ;;  %2969 = vst [vmem:[%s7355_s4 + $0x160] sm:$0xff] %v1994_v7  ;;  %2242 = vmatprep.mubr.bf16.mxu1 %v7804_v33  ;;  %2435 = vmatprep.mubr.bf16.mxu0 %v7804_v33 }
 0x377   :  { %v1723_v18 = vpop.f32.mrf.mxu0  ;;  %v1996_v42 = vpop.f32.mrf.mxu1 }
 0x378   :  { %3080 = vst [vmem:[%s7355_s4 + $0x4d8] sm:$0xff] %v1723_v18  ;;  %2970 = vst [vmem:[%s7355_s4 + $0x168] sm:$0xff] %v1996_v42  ;;  %v3617_v18 = vld [vmem:[#allocation2 + $0x8] sm:$0xff]  }
 0x379   :  { %v1725_v12 = vpop.f32.mrf.mxu0  ;;  %v1998_v59 = vpop.f32.mrf.mxu1 }
 0x37a   :  { %3086 = vst [vmem:[%s7355_s4 + $0x508] sm:$0xff] %v1725_v12  ;;  %2976 = vst [vmem:[%s7355_s4 + $0x198] sm:$0xff] %v1998_v59 }
 0x37b   :  { %v1727_v4 = vpop.f32.mrf.mxu0  ;;  %v2000_v45 = vpop.f32.mrf.mxu1 }
 0x37c   :  { %3087 = vst [vmem:[%s7355_s4 + $0x510] sm:$0xff] %v1727_v4  ;;  %2977 = vst [vmem:[%s7355_s4 + $0x1a0] sm:$0xff] %v2000_v45 }
 0x37d   :  { %v1731_v28 = vpop.f32.mrf.mxu0  ;;  %v2004_v56 = vpop.f32.mrf.mxu1  ;;  %2243 = vmatmul.mubr.bf16.gmra.mxu1 %v5692_v25  ;;  %2436 = vmatmul.mubr.bf16.gmra.mxu0 %v5761_v23 }
 0x37e   :  { %3093 = vst [vmem:[%s7355_s4 + $0x540] sm:$0xff] %v1731_v28  ;;  %2983 = vst [vmem:[%s7355_s4 + $0x1d0] sm:$0xff] %v2004_v56  ;;  %2252 = vmatprep.mubr.bf16.mxu1 %v7804_v33  ;;  %2445 = vmatprep.mubr.bf16.mxu0 %v7804_v33 }
 0x37f   :  { %v1733_v61 = vpop.f32.mrf.mxu0  ;;  %v2006_v44 = vpop.f32.mrf.mxu1 }
 0x380   :  { %3094 = vst [vmem:[%s7355_s4 + $0x548] sm:$0xff] %v1733_v61  ;;  %2984 = vst [vmem:[%s7355_s4 + $0x1d8] sm:$0xff] %v2006_v44 }
 0x381   :  { %v1735_v25 = vpop.f32.mrf.mxu0  ;;  %v2008_v47 = vpop.f32.mrf.mxu1 }
 0x382   :  { %3100 = vst [vmem:[%s7355_s4 + $0x578] sm:$0xff] %v1735_v25  ;;  %2990 = vst [vmem:[%s7355_s4 + $0x208] sm:$0xff] %v2008_v47 }
 0x383   :  { %v1737_v9 = vpop.f32.mrf.mxu0  ;;  %v2010_v51 = vpop.f32.mrf.mxu1 }
 0x384   :  { %3101 = vst [vmem:[%s7355_s4 + $0x580] sm:$0xff] %v1737_v9  ;;  %2991 = vst [vmem:[%s7355_s4 + $0x210] sm:$0xff] %v2010_v51 }
 0x385   :  { %v1741_v55 = vpop.f32.mrf.mxu0  ;;  %v2014_v1 = vpop.f32.mrf.mxu1  ;;  %2253 = vmatmul.mubr.bf16.gmra.mxu1 %v5701_v0  ;;  %2446 = vmatmul.mubr.bf16.gmra.mxu0 %v5768_v39 }
 0x386   :  { %3107 = vst [vmem:[%s7355_s4 + $0x5b0] sm:$0xff] %v1741_v55  ;;  %2997 = vst [vmem:[%s7355_s4 + $0x240] sm:$0xff] %v2014_v1  ;;  %2262 = vmatprep.mubr.bf16.mxu1 %v7804_v33  ;;  %2455 = vmatprep.mubr.bf16.mxu0 %v7804_v33 }
 0x387   :  { %v1743_v32 = vpop.f32.mrf.mxu0  ;;  %v2016_v62 = vpop.f32.mrf.mxu1 }
 0x388   :  { %3108 = vst [vmem:[%s7355_s4 + $0x5b8] sm:$0xff] %v1743_v32  ;;  %2998 = vst [vmem:[%s7355_s4 + $0x248] sm:$0xff] %v2016_v62 }
 0x389   :  { %v1745_v0 = vpop.f32.mrf.mxu0  ;;  %v2018_v41 = vpop.f32.mrf.mxu1 }
 0x38a   :  { %3114 = vst [vmem:[%s7355_s4 + $0x5e8] sm:$0xff] %v1745_v0  ;;  %3004 = vst [vmem:[%s7355_s4 + $0x278] sm:$0xff] %v2018_v41 }
 0x38b   :  { %v1747_v63 = vpop.f32.mrf.mxu0  ;;  %v2020_v36 = vpop.f32.mrf.mxu1 }
 0x38c   :  { %3115 = vst [vmem:[%s7355_s4 + $0x5f0] sm:$0xff] %v1747_v63  ;;  %3005 = vst [vmem:[%s7355_s4 + $0x280] sm:$0xff] %v2020_v36 }
 0x38d   :  { %v1751_v10 = vpop.f32.mrf.mxu0  ;;  %v2024_v21 = vpop.f32.mrf.mxu1  ;;  %2263 = vmatmul.mubr.bf16.gmra.mxu1 %v5709_v35  ;;  %2456 = vmatmul.mubr.bf16.gmra.mxu0 %v5774_v52 }
 0x38e   :  { %3121 = vst [vmem:[%s7355_s4 + $0x620] sm:$0xff] %v1751_v10  ;;  %3011 = vst [vmem:[%s7355_s4 + $0x2b0] sm:$0xff] %v2024_v21  ;;  %2272 = vmatprep.mubr.bf16.mxu1 %v7804_v33  ;;  %2465 = vmatprep.mubr.bf16.mxu0 %v7804_v33 }
 0x38f   :  { %v1753_v20 = vpop.f32.mrf.mxu0  ;;  %v2026_v53 = vpop.f32.mrf.mxu1 }
 0x390   :  { %3122 = vst [vmem:[%s7355_s4 + $0x628] sm:$0xff] %v1753_v20  ;;  %3012 = vst [vmem:[%s7355_s4 + $0x2b8] sm:$0xff] %v2026_v53 }
 0x391   :  { %v1755_v35 = vpop.f32.mrf.mxu0  ;;  %v2028_v38 = vpop.f32.mrf.mxu1 }
 0x392   :  { %3128 = vst [vmem:[%s7355_s4 + $0x658] sm:$0xff] %v1755_v35  ;;  %3018 = vst [vmem:[%s7355_s4 + $0x2e8] sm:$0xff] %v2028_v38 }
 0x393   :  { %v1757_v5 = vpop.f32.mrf.mxu0  ;;  %v2030_v17 = vpop.f32.mrf.mxu1 }
 0x394   :  { %3129 = vst [vmem:[%s7355_s4 + $0x660] sm:$0xff] %v1757_v5  ;;  %3019 = vst [vmem:[%s7355_s4 + $0x2f0] sm:$0xff] %v2030_v17 }
 0x395   :  { %v1761_v57 = vpop.f32.mrf.mxu0  ;;  %v2034_v50 = vpop.f32.mrf.mxu1  ;;  %2273 = vmatmul.mubr.bf16.gmra.mxu1 %v5717_v16  ;;  %2466 = vmatmul.mubr.bf16.gmra.mxu0 %v5780_v29 }
 0x396   :  { %3135 = vst [vmem:[%s7355_s4 + $0x690] sm:$0xff] %v1761_v57  ;;  %3025 = vst [vmem:[%s7355_s4 + $0x320] sm:$0xff] %v2034_v50  ;;  %2475 = vmatprep.mubr.bf16.mxu0 %v7804_v33  ;;  %3466 = vmatprep.mubr.bf16.mxu1 %v3616_v43 }
 0x397   :  { %v1763_v14 = vpop.f32.mrf.mxu0  ;;  %v2036_v27 = vpop.f32.mrf.mxu1 }
 0x398   :  { %3136 = vst [vmem:[%s7355_s4 + $0x698] sm:$0xff] %v1763_v14  ;;  %3026 = vst [vmem:[%s7355_s4 + $0x328] sm:$0xff] %v2036_v27 }
 0x399   :  { %v1765_v16 = vpop.f32.mrf.mxu0  ;;  %v2038_v8 = vpop.f32.mrf.mxu1 }
 0x39a   :  { %3142 = vst [vmem:[%s7355_s4 + $0x6c8] sm:$0xff] %v1765_v16  ;;  %3032 = vst [vmem:[%s7355_s4 + $0x358] sm:$0xff] %v2038_v8 }
 0x39b   :  { %v1767_v49 = vpop.f32.mrf.mxu0  ;;  %v2040_v40 = vpop.f32.mrf.mxu1 }
 0x39c   :  { %3143 = vst [vmem:[%s7355_s4 + $0x6d0] sm:$0xff] %v1767_v49  ;;  %3033 = vst [vmem:[%s7355_s4 + $0x360] sm:$0xff] %v2040_v40 }
 0x39d   :  { %v1771_v30 = vpop.f32.mrf.mxu0  ;;  %v2044_v7 = vpop.f32.mrf.mxu1  ;;  %2476 = vmatmul.mubr.bf16.gmra.mxu0 %v5786_v60  ;;  %3467 = vmatmul.mubr.bf16.vlgmr.msra.gmra.mxu1 %v3617_v18 }
 0x39e   :  { %3149 = vst [vmem:[%s7355_s4 + $0x700] sm:$0xff] %v1771_v30  ;;  %3039 = vst [vmem:[%s7355_s4 + $0x390] sm:$0xff] %v2044_v7  ;;  %2485 = vmatprep.mubr.bf16.mxu0 %v7804_v33  ;;  %3470 = vmatprep.mubr.bf16.mxu1 %v5636_v34 }
 0x39f   :  { %v1773_v42 = vpop.f32.mrf.mxu0  ;;  %v2046_v12 = vpop.f32.mrf.mxu1 }
 0x3a0   :  { %3150 = vst [vmem:[%s7355_s4 + $0x708] sm:$0xff] %v1773_v42  ;;  %3040 = vst [vmem:[%s7355_s4 + $0x398] sm:$0xff] %v2046_v12  ;;  %v6504_v12 = vld [vmem:[#allocation2 + $0xc0] sm:$0xff]  }
 0x3a1   :  { %v1775_v59 = vpop.f32.mrf.mxu0  ;;  %v2048_v4 = vpop.f32.mrf.mxu1 }
 0x3a2   :  { %3156 = vst [vmem:[%s7355_s4 + $0x738] sm:$0xff] %v1775_v59  ;;  %3046 = vst [vmem:[%s7355_s4 + $0x3c8] sm:$0xff] %v2048_v4  ;;  %v3619_v59 = vld [vmem:[#allocation2 + $0x88] sm:$0xff]   ;;  %v3620_v4 = vld [vmem:[#allocation2 + $0x90] sm:$0xff]  }
 0x3a3   :  { %v1777_v34 = vpop.f32.mrf.mxu0  ;;  %v2050_v45 = vpop.f32.mrf.mxu1 }
 0x3a4   :  { %3157 = vst [vmem:[%s7355_s4 + $0x740] sm:$0xff] %v1777_v34  ;;  %3047 = vst [vmem:[%s7355_s4 + $0x3d0] sm:$0xff] %v2050_v45 }
 0x3a5   :  { %v1781_v28 = vpop.f32.mrf.mxu0  ;;  %v2054_v56 = vpop.f32.mrf.mxu1  ;;  %2486 = vmatmul.mubr.bf16.gmra.mxu0 %v5792_v19  ;;  %3471 = vmatmul.mubr.bf16.gmra.mxu1 %v5674_v11 }
 0x3a6   :  { %3163 = vst [vmem:[%s7355_s4 + $0x770] sm:$0xff] %v1781_v28  ;;  %3053 = vst [vmem:[%s7355_s4 + $0x400] sm:$0xff] %v2054_v56  ;;  %2495 = vmatprep.mubr.bf16.mxu0 %v7804_v33  ;;  %3474 = vmatprep.mubr.bf16.mxu1 %v5690_v54 }
 0x3a7   :  { %v1783_v61 = vpop.f32.mrf.mxu0  ;;  %v2056_v44 = vpop.f32.mrf.mxu1 }
 0x3a8   :  { %3164 = vst [vmem:[%s7355_s4 + $0x778] sm:$0xff] %v1783_v61  ;;  %3054 = vst [vmem:[%s7355_s4 + $0x408] sm:$0xff] %v2056_v44 }
 0x3a9   :  { %v1785_v11 = vpop.f32.mrf.mxu0  ;;  %v2058_v19 = vpop.f32.mrf.mxu1 }
 0x3aa   :  { %3170 = vst [vmem:[%s7355_s4 + $0x7a8] sm:$0xff] %v1785_v11  ;;  %3060 = vst [vmem:[%s7355_s4 + $0x438] sm:$0xff] %v2058_v19 }
 0x3ab   :  { %v1787_v54 = vpop.f32.mrf.mxu0  ;;  %v2060_v25 = vpop.f32.mrf.mxu1 }
 0x3ac   :  { %3171 = vst [vmem:[%s7355_s4 + $0x7b0] sm:$0xff] %v1787_v54  ;;  %3061 = vst [vmem:[%s7355_s4 + $0x440] sm:$0xff] %v2060_v25  ;;  %v6532_v54 = vld [vmem:[#allocation2 + $0xc8] sm:$0xff]   ;;  %v3622_v25 = vld [vmem:[#allocation2 + $0x98] sm:$0xff]  }
 0x3ad   :  { %v1791_v47 = vpop.f32.mrf.mxu0  ;;  %v2064_v9 = vpop.f32.mrf.mxu1  ;;  %2496 = vmatmul.mubr.bf16.gmra.mxu0 %v5798_v6  ;;  %3475 = vmatmul.mubr.bf16.gmra.mxu1 %v5699_v24 }
 0x3ae   :  { %3177 = vst [vmem:[%s7355_s4 + $0x7e0] sm:$0xff] %v1791_v47  ;;  %3067 = vst [vmem:[%s7355_s4 + $0x470] sm:$0xff] %v2064_v9  ;;  %2505 = vmatprep.mubr.bf16.mxu0 %v7804_v33  ;;  %3478 = vmatprep.mubr.bf16.mxu1 %v5707_v26  ;;  %v3623_v47 = vld [vmem:[#allocation2 + $0xa0] sm:$0xff]  }
 0x3af   :  { %v1793_v51 = vpop.f32.mrf.mxu0  ;;  %v2066_v55 = vpop.f32.mrf.mxu1 }
 0x3b0   :  { %3178 = vst [vmem:[%s7355_s4 + $0x7e8] sm:$0xff] %v1793_v51  ;;  %3068 = vst [vmem:[%s7355_s4 + $0x478] sm:$0xff] %v2066_v55 }
 0x3b1   :  { %v1795_v24 = vpop.f32.mrf.mxu0  ;;  %v2068_v6 = vpop.f32.mrf.mxu1 }
 0x3b2   :  { %3184 = vst [vmem:[%s7355_s4 + $0x818] sm:$0xff] %v1795_v24  ;;  %3074 = vst [vmem:[%s7355_s4 + $0x4a8] sm:$0xff] %v2068_v6 }
 0x3b3   :  { %v1797_v26 = vpop.f32.mrf.mxu0  ;;  %v2070_v1 = vpop.f32.mrf.mxu1 }
 0x3b4   :  { %3185 = vst [vmem:[%s7355_s4 + $0x820] sm:$0xff] %v1797_v26  ;;  %3075 = vst [vmem:[%s7355_s4 + $0x4b0] sm:$0xff] %v2070_v1 }
 0x3b5   :  { %v1801_v32 = vpop.f32.mrf.mxu0  ;;  %v2074_v62 = vpop.f32.mrf.mxu1  ;;  %2506 = vmatmul.mubr.bf16.gmra.mxu0 %v5804_v58  ;;  %3479 = vmatmul.mubr.bf16.gmra.mxu1 %v5715_v22 }
 0x3b6   :  { %3191 = vst [vmem:[%s7355_s4 + $0x850] sm:$0xff] %v1801_v32  ;;  %3081 = vst [vmem:[%s7355_s4 + $0x4e0] sm:$0xff] %v2074_v62  ;;  %2515 = vmatprep.mubr.bf16.mxu0 %v7804_v33  ;;  %3482 = vmatprep.mubr.bf16.mxu1 %v5723_v37  ;;  %v3624_v62 = vld [vmem:[#allocation2 + $0xd0] sm:$0xff]  }
 0x3b7   :  { %v1803_v0 = vpop.f32.mrf.mxu0  ;;  %v2076_v41 = vpop.f32.mrf.mxu1 }
 0x3b8   :  { %3192 = vst [vmem:[%s7355_s4 + $0x858] sm:$0xff] %v1803_v0  ;;  %3082 = vst [vmem:[%s7355_s4 + $0x4e8] sm:$0xff] %v2076_v41  ;;  %v3625_v0 = vld [vmem:[#allocation2 + $0xa8] sm:$0xff]   ;;  %v3626_v41 = vld [vmem:[#allocation2 + $0xb0] sm:$0xff]  }
 0x3b9   :  { %v1805_v22 = vpop.f32.mrf.mxu0  ;;  %v2078_v58 = vpop.f32.mrf.mxu1 }
 0x3ba   :  { %3198 = vst [vmem:[%s7355_s4 + $0x888] sm:$0xff] %v1805_v22  ;;  %3088 = vst [vmem:[%s7355_s4 + $0x518] sm:$0xff] %v2078_v58 }
 0x3bb   :  { %v1807_v37 = vpop.f32.mrf.mxu0  ;;  %v2080_v63 = vpop.f32.mrf.mxu1 }
 0x3bc   :  { %3199 = vst [vmem:[%s7355_s4 + $0x890] sm:$0xff] %v1807_v37  ;;  %3089 = vst [vmem:[%s7355_s4 + $0x520] sm:$0xff] %v2080_v63 }
 0x3bd   :  { %v1811_v36 = vpop.f32.mrf.mxu0  ;;  %v2084_v10 = vpop.f32.mrf.mxu1  ;;  %2516 = vmatmul.mubr.bf16.gmra.mxu0 %v5810_v31  ;;  %3483 = vmatmul.mubr.bf16.gmra.mxu1 %v5731_v3 }
 0x3be   :  { %3205 = vst [vmem:[%s7355_s4 + $0x8c0] sm:$0xff] %v1811_v36  ;;  %3095 = vst [vmem:[%s7355_s4 + $0x550] sm:$0xff] %v2084_v10  ;;  %2525 = vmatprep.mubr.bf16.mxu0 %v7804_v33  ;;  %3486 = vmatprep.mubr.bf16.mxu1 %v5741_v13 }
 0x3bf   :  { %v1813_v21 = vpop.f32.mrf.mxu0  ;;  %v2086_v20 = vpop.f32.mrf.mxu1 }
 0x3c0   :  { %3206 = vst [vmem:[%s7355_s4 + $0x8c8] sm:$0xff] %v1813_v21  ;;  %3096 = vst [vmem:[%s7355_s4 + $0x558] sm:$0xff] %v2086_v20 }
 0x3c1   :  { %v1815_v3 = vpop.f32.mrf.mxu0  ;;  %v2088_v31 = vpop.f32.mrf.mxu1 }
 0x3c2   :  { %3212 = vst [vmem:[%s7355_s4 + $0x8f8] sm:$0xff] %v1815_v3  ;;  %3102 = vst [vmem:[%s7355_s4 + $0x588] sm:$0xff] %v2088_v31  ;;  %v3627_v3 = vld [vmem:[#allocation2 + $0xd8] sm:$0xff]  }
 0x3c3   :  { %v1817_v13 = vpop.f32.mrf.mxu0  ;;  %v2090_v53 = vpop.f32.mrf.mxu1  ;;  %v3628_v31 = vld [vmem:[#allocation2 + $0xb8] sm:$0xff]  }
 0x3c4   :  { %3213 = vst [vmem:[%s7355_s4 + $0x900] sm:$0xff] %v1817_v13  ;;  %3103 = vst [vmem:[%s7355_s4 + $0x590] sm:$0xff] %v2090_v53 }
 0x3c5   :  { %v1821_v35 = vpop.f32.mrf.mxu0  ;;  %v2094_v38 = vpop.f32.mrf.mxu1  ;;  %2526 = vmatmul.mubr.bf16.gmra.mxu0 %v5816_v15  ;;  %3487 = vmatmul.mubr.bf16.gmra.mxu1 %v5751_v2 }
 0x3c6   :  { %3219 = vst [vmem:[%s7355_s4 + $0x930] sm:$0xff] %v1821_v35  ;;  %3109 = vst [vmem:[%s7355_s4 + $0x5c0] sm:$0xff] %v2094_v38  ;;  %2535 = vmatprep.mubr.bf16.mxu0 %v7804_v33  ;;  %3490 = vmatprep.mubr.bf16.mxu1 %v5761_v23 }
 0x3c7   :  { %v1823_v5 = vpop.f32.mrf.mxu0  ;;  %v2096_v17 = vpop.f32.mrf.mxu1 }
 0x3c8   :  { %3220 = vst [vmem:[%s7355_s4 + $0x938] sm:$0xff] %v1823_v5  ;;  %3110 = vst [vmem:[%s7355_s4 + $0x5c8] sm:$0xff] %v2096_v17 }
 0x3c9   :  { %v1825_v2 = vpop.f32.mrf.mxu0  ;;  %v2098_v15 = vpop.f32.mrf.mxu1 }
 0x3ca   :  { %3226 = vst [vmem:[%s7355_s4 + $0x968] sm:$0xff] %v1825_v2  ;;  %3116 = vst [vmem:[%s7355_s4 + $0x5f8] sm:$0xff] %v2098_v15 }
 0x3cb   :  { %v1827_v23 = vpop.f32.mrf.mxu0  ;;  %v2100_v57 = vpop.f32.mrf.mxu1 }
 0x3cc   :  { %3227 = vst [vmem:[%s7355_s4 + $0x970] sm:$0xff] %v1827_v23  ;;  %3117 = vst [vmem:[%s7355_s4 + $0x600] sm:$0xff] %v2100_v57  ;;  %v3629_v23 = vld [vmem:[#allocation2 + $0xe0] sm:$0xff]  }
 0x3cd   :  { %v1831_v50 = vpop.f32.mrf.mxu0  ;;  %v2104_v43 = vpop.f32.mrf.mxu1  ;;  %2536 = vmatmul.mubr.bf16.gmra.mxu0 %v5822_v46  ;;  %3491 = vmatmul.mubr.bf16.gmra.mxu1 %v5768_v39 }
 0x3ce   :  { %3233 = vst [vmem:[%s7355_s4 + $0x9a0] sm:$0xff] %v1831_v50  ;;  %3123 = vst [vmem:[%s7355_s4 + $0x630] sm:$0xff] %v2104_v43  ;;  %2545 = vmatprep.mubr.bf16.mxu0 %v7804_v33  ;;  %3494 = vmatprep.mubr.bf16.mxu1 %v5774_v52 }
 0x3cf   :  { %v1833_v14 = vpop.f32.mrf.mxu0  ;;  %v2106_v27 = vpop.f32.mrf.mxu1 }
 0x3d0   :  { %3234 = vst [vmem:[%s7355_s4 + $0x9a8] sm:$0xff] %v1833_v14  ;;  %3124 = vst [vmem:[%s7355_s4 + $0x638] sm:$0xff] %v2106_v27 }
 0x3d1   :  { %v1835_v39 = vpop.f32.mrf.mxu0  ;;  %v2108_v46 = vpop.f32.mrf.mxu1 }
 0x3d2   :  { %3240 = vst [vmem:[%s7355_s4 + $0x9d8] sm:$0xff] %v1835_v39  ;;  %3130 = vst [vmem:[%s7355_s4 + $0x668] sm:$0xff] %v2108_v46 }
 0x3d3   :  { %v1837_v52 = vpop.f32.mrf.mxu0  ;;  %v2110_v16 = vpop.f32.mrf.mxu1 }
 0x3d4   :  { %3241 = vst [vmem:[%s7355_s4 + $0x9e0] sm:$0xff] %v1837_v52  ;;  %3131 = vst [vmem:[%s7355_s4 + $0x670] sm:$0xff] %v2110_v16  ;;  %v3630_v16 = vld [vmem:[#allocation2 + $0xe8] sm:$0xff]  }
 0x3d5   :  { %v1841_v8 = vpop.f32.mrf.mxu0  ;;  %v2114_v49 = vpop.f32.mrf.mxu1  ;;  %2546 = vmatmul.mubr.bf16.gmra.mxu0 %v5828_v48  ;;  %3495 = vmatmul.mubr.bf16.gmra.mxu1 %v5780_v29 }
 0x3d6   :  { %3247 = vst [vmem:[%s7355_s4 + $0xa10] sm:$0xff] %v1841_v8  ;;  %3137 = vst [vmem:[%s7355_s4 + $0x6a0] sm:$0xff] %v2114_v49  ;;  %2555 = vmatprep.mubr.bf16.mxu0 %v7804_v33  ;;  %3498 = vmatprep.mubr.bf16.mxu1 %v5786_v60 }
 0x3d7   :  { %v1843_v40 = vpop.f32.mrf.mxu0  ;;  %v2116_v30 = vpop.f32.mrf.mxu1 }
 0x3d8   :  { %3248 = vst [vmem:[%s7355_s4 + $0xa18] sm:$0xff] %v1843_v40  ;;  %3138 = vst [vmem:[%s7355_s4 + $0x6a8] sm:$0xff] %v2116_v30 }
 0x3d9   :  { %v1845_v29 = vpop.f32.mrf.mxu0  ;;  %v2118_v48 = vpop.f32.mrf.mxu1 }
 0x3da   :  { %3254 = vst [vmem:[%s7355_s4 + $0xa48] sm:$0xff] %v1845_v29  ;;  %3144 = vst [vmem:[%s7355_s4 + $0x6d8] sm:$0xff] %v2118_v48 }
 0x3db   :  { %v1847_v60 = vpop.f32.mrf.mxu0  ;;  %v2120_v7 = vpop.f32.mrf.mxu1 }
 0x3dc   :  { %3255 = vst [vmem:[%s7355_s4 + $0xa50] sm:$0xff] %v1847_v60  ;;  %3145 = vst [vmem:[%s7355_s4 + $0x6e0] sm:$0xff] %v2120_v7 }
 0x3dd   :  { %v2124_v18 = vpop.f32.mrf.mxu1  ;;  %v2317_v42 = vpop.f32.mrf.mxu0  ;;  %2556 = vmatmul.mubr.bf16.gmra.mxu0 %v6504_v12  ;;  %3499 = vmatmul.mubr.bf16.gmra.mxu1 %v3619_v59 }
 0x3de   :  { %3151 = vst [vmem:[%s7355_s4 + $0x710] sm:$0xff] %v2124_v18  ;;  %2929 = vst [vmem:[%s7355_s4 + $0x20] sm:$0xff] %v2317_v42  ;;  %2565 = vmatprep.mubr.bf16.mxu0 %v7804_v33  ;;  %3502 = vmatprep.mubr.bf16.mxu1 %v3620_v4  ;;  %v3631_v18 = vld [vmem:[#allocation2 + $0xf0] sm:$0xff]  }
 0x3df   :  { %v2126_v34 = vpop.f32.mrf.mxu1  ;;  %v2319_v45 = vpop.f32.mrf.mxu0 }
 0x3e0   :  { %3152 = vst [vmem:[%s7355_s4 + $0x718] sm:$0xff] %v2126_v34  ;;  %2930 = vst [vmem:[%s7355_s4 + $0x28] sm:$0xff] %v2319_v45 }
 0x3e1   :  { %v2128_v28 = vpop.f32.mrf.mxu1  ;;  %v2321_v56 = vpop.f32.mrf.mxu0 }
 0x3e2   :  { %3158 = vst [vmem:[%s7355_s4 + $0x748] sm:$0xff] %v2128_v28  ;;  %2936 = vst [vmem:[%s7355_s4 + $0x58] sm:$0xff] %v2321_v56  ;;  %v3632_v56 = vld [vmem:[#allocation2 + $0xf8] sm:$0xff]  }
 0x3e3   :  { %v2130_v61 = vpop.f32.mrf.mxu1  ;;  %v2323_v44 = vpop.f32.mrf.mxu0 }
 0x3e4   :  { %3159 = vst [vmem:[%s7355_s4 + $0x750] sm:$0xff] %v2130_v61  ;;  %2937 = vst [vmem:[%s7355_s4 + $0x60] sm:$0xff] %v2323_v44 }
 0x3e5   :  { %v2134_v11 = vpop.f32.mrf.mxu1  ;;  %v2327_v19 = vpop.f32.mrf.mxu0  ;;  %2566 = vmatmul.mubr.bf16.gmra.mxu0 %v6532_v54  ;;  %3503 = vmatmul.mubr.bf16.gmra.mxu1 %v3622_v25 }
 0x3e6   :  { %3165 = vst [vmem:[%s7355_s4 + $0x780] sm:$0xff] %v2134_v11  ;;  %2943 = vst [vmem:[%s7355_s4 + $0x90] sm:$0xff] %v2327_v19  ;;  %2575 = vmatprep.mubr.bf16.mxu0 %v7804_v33  ;;  %3506 = vmatprep.mubr.bf16.mxu1 %v3623_v47 }
 0x3e7   :  { %v2136_v9 = vpop.f32.mrf.mxu1  ;;  %v2329_v51 = vpop.f32.mrf.mxu0 }
 0x3e8   :  { %3166 = vst [vmem:[%s7355_s4 + $0x788] sm:$0xff] %v2136_v9  ;;  %2944 = vst [vmem:[%s7355_s4 + $0x98] sm:$0xff] %v2329_v51 }
 0x3e9   :  { %v2138_v55 = vpop.f32.mrf.mxu1  ;;  %v2331_v24 = vpop.f32.mrf.mxu0 }
 0x3ea   :  { %3172 = vst [vmem:[%s7355_s4 + $0x7b8] sm:$0xff] %v2138_v55  ;;  %2950 = vst [vmem:[%s7355_s4 + $0xc8] sm:$0xff] %v2331_v24 }
 0x3eb   :  { %v2140_v6 = vpop.f32.mrf.mxu1  ;;  %v2333_v26 = vpop.f32.mrf.mxu0 }
 0x3ec   :  { %3173 = vst [vmem:[%s7355_s4 + $0x7c0] sm:$0xff] %v2140_v6  ;;  %2951 = vst [vmem:[%s7355_s4 + $0xd0] sm:$0xff] %v2333_v26 }
 0x3ed   :  { %v2144_v1 = vpop.f32.mrf.mxu1  ;;  %v2337_v32 = vpop.f32.mrf.mxu0  ;;  %2576 = vmatmul.mubr.bf16.gmra.mxu0 %v3624_v62  ;;  %3507 = vmatmul.mubr.bf16.gmra.mxu1 %v3625_v0 }
 0x3ee   :  { %3179 = vst [vmem:[%s7355_s4 + $0x7f0] sm:$0xff] %v2144_v1  ;;  %2957 = vst [vmem:[%s7355_s4 + $0x100] sm:$0xff] %v2337_v32  ;;  %2585 = vmatprep.mubr.bf16.mxu0 %v7804_v33  ;;  %3510 = vmatprep.mubr.bf16.mxu1 %v3626_v41 }
 0x3ef   :  { %v2146_v22 = vpop.f32.mrf.mxu1  ;;  %v2339_v58 = vpop.f32.mrf.mxu0 }
 0x3f0   :  { %3180 = vst [vmem:[%s7355_s4 + $0x7f8] sm:$0xff] %v2146_v22  ;;  %2958 = vst [vmem:[%s7355_s4 + $0x108] sm:$0xff] %v2339_v58 }
 0x3f1   :  { %v2148_v37 = vpop.f32.mrf.mxu1  ;;  %v2341_v63 = vpop.f32.mrf.mxu0 }
 0x3f2   :  { %3186 = vst [vmem:[%s7355_s4 + $0x828] sm:$0xff] %v2148_v37  ;;  %2964 = vst [vmem:[%s7355_s4 + $0x138] sm:$0xff] %v2341_v63 }
 0x3f3   :  { %v2150_v36 = vpop.f32.mrf.mxu1  ;;  %v2343_v10 = vpop.f32.mrf.mxu0 }
 0x3f4   :  { %3187 = vst [vmem:[%s7355_s4 + $0x830] sm:$0xff] %v2150_v36  ;;  %2965 = vst [vmem:[%s7355_s4 + $0x140] sm:$0xff] %v2343_v10 }
 0x3f5   :  { %v2154_v21 = vpop.f32.mrf.mxu1  ;;  %v2347_v20 = vpop.f32.mrf.mxu0  ;;  %2586 = vmatmul.mubr.bf16.gmra.mxu0 %v3627_v3  ;;  %3511 = vmatmul.mubr.bf16.gmra.mxu1 %v3628_v31 }
 0x3f6   :  { %3193 = vst [vmem:[%s7355_s4 + $0x860] sm:$0xff] %v2154_v21  ;;  %2971 = vst [vmem:[%s7355_s4 + $0x170] sm:$0xff] %v2347_v20  ;;  %2595 = vmatprep.mubr.bf16.mxu0 %v7804_v33  ;;  %3514 = vmatprep.mubr.bf16.mxu1 %v6504_v12 }
 0x3f7   :  { %v2156_v13 = vpop.f32.mrf.mxu1  ;;  %v2349_v53 = vpop.f32.mrf.mxu0 }
 0x3f8   :  { %3194 = vst [vmem:[%s7355_s4 + $0x868] sm:$0xff] %v2156_v13  ;;  %2972 = vst [vmem:[%s7355_s4 + $0x178] sm:$0xff] %v2349_v53 }
 0x3f9   :  { %v2158_v35 = vpop.f32.mrf.mxu1  ;;  %v2351_v38 = vpop.f32.mrf.mxu0 }
 0x3fa   :  { %3200 = vst [vmem:[%s7355_s4 + $0x898] sm:$0xff] %v2158_v35  ;;  %2978 = vst [vmem:[%s7355_s4 + $0x1a8] sm:$0xff] %v2351_v38 }
 0x3fb   :  { %v2160_v5 = vpop.f32.mrf.mxu1  ;;  %v2353_v17 = vpop.f32.mrf.mxu0 }
 0x3fc   :  { %3201 = vst [vmem:[%s7355_s4 + $0x8a0] sm:$0xff] %v2160_v5  ;;  %2979 = vst [vmem:[%s7355_s4 + $0x1b0] sm:$0xff] %v2353_v17 }
 0x3fd   :  { %v2164_v2 = vpop.f32.mrf.mxu1  ;;  %v2357_v15 = vpop.f32.mrf.mxu0  ;;  %2596 = vmatmul.mubr.bf16.gmra.mxu0 %v3629_v23  ;;  %3515 = vmatmul.mubr.bf16.gmra.mxu1 %v6532_v54 }
 0x3fe   :  { %3207 = vst [vmem:[%s7355_s4 + $0x8d0] sm:$0xff] %v2164_v2  ;;  %2985 = vst [vmem:[%s7355_s4 + $0x1e0] sm:$0xff] %v2357_v15  ;;  %2605 = vmatprep.mubr.bf16.mxu0 %v7804_v33  ;;  %3518 = vmatprep.mubr.bf16.mxu1 %v3624_v62 }
 0x3ff   :  { %v2166_v57 = vpop.f32.mrf.mxu1  ;;  %v2359_v50 = vpop.f32.mrf.mxu0 }
 0x400   :  { %3208 = vst [vmem:[%s7355_s4 + $0x8d8] sm:$0xff] %v2166_v57  ;;  %2986 = vst [vmem:[%s7355_s4 + $0x1e8] sm:$0xff] %v2359_v50 }
 0x401   :  { %v2168_v43 = vpop.f32.mrf.mxu1  ;;  %v2361_v14 = vpop.f32.mrf.mxu0 }
 0x402   :  { %3214 = vst [vmem:[%s7355_s4 + $0x908] sm:$0xff] %v2168_v43  ;;  %2992 = vst [vmem:[%s7355_s4 + $0x218] sm:$0xff] %v2361_v14 }
 0x403   :  { %v2170_v27 = vpop.f32.mrf.mxu1  ;;  %v2363_v39 = vpop.f32.mrf.mxu0 }
 0x404   :  { %3215 = vst [vmem:[%s7355_s4 + $0x910] sm:$0xff] %v2170_v27  ;;  %2993 = vst [vmem:[%s7355_s4 + $0x220] sm:$0xff] %v2363_v39 }
 0x405   :  { %v2174_v46 = vpop.f32.mrf.mxu1  ;;  %v2367_v52 = vpop.f32.mrf.mxu0  ;;  %2606 = vmatmul.mubr.bf16.gmra.mxu0 %v3630_v16  ;;  %3519 = vmatmul.mubr.bf16.gmra.mxu1 %v3627_v3 }
 0x406   :  { %3221 = vst [vmem:[%s7355_s4 + $0x940] sm:$0xff] %v2174_v46  ;;  %2999 = vst [vmem:[%s7355_s4 + $0x250] sm:$0xff] %v2367_v52  ;;  %2615 = vmatprep.mubr.bf16.mxu0 %v7804_v33  ;;  %3522 = vmatprep.mubr.bf16.mxu1 %v3629_v23 }
 0x407   :  { %v2176_v8 = vpop.f32.mrf.mxu1  ;;  %v2369_v49 = vpop.f32.mrf.mxu0 }
 0x408   :  { %3222 = vst [vmem:[%s7355_s4 + $0x948] sm:$0xff] %v2176_v8  ;;  %3000 = vst [vmem:[%s7355_s4 + $0x258] sm:$0xff] %v2369_v49 }
 0x409   :  { %v2178_v40 = vpop.f32.mrf.mxu1  ;;  %v2371_v30 = vpop.f32.mrf.mxu0 }
 0x40a   :  { %3228 = vst [vmem:[%s7355_s4 + $0x978] sm:$0xff] %v2178_v40  ;;  %3006 = vst [vmem:[%s7355_s4 + $0x288] sm:$0xff] %v2371_v30 }
 0x40b   :  { %v2180_v29 = vpop.f32.mrf.mxu1  ;;  %v2373_v48 = vpop.f32.mrf.mxu0 }
 0x40c   :  { %3229 = vst [vmem:[%s7355_s4 + $0x980] sm:$0xff] %v2180_v29  ;;  %3007 = vst [vmem:[%s7355_s4 + $0x290] sm:$0xff] %v2373_v48 }
 0x40d   :  { %v2184_v60 = vpop.f32.mrf.mxu1  ;;  %v2377_v7 = vpop.f32.mrf.mxu0  ;;  %2616 = vmatmul.mubr.bf16.gmra.mxu0 %v3631_v18  ;;  %3523 = vmatmul.mubr.bf16.gmra.mxu1 %v3630_v16 }
 0x40e   :  { %3235 = vst [vmem:[%s7355_s4 + $0x9b0] sm:$0xff] %v2184_v60  ;;  %3013 = vst [vmem:[%s7355_s4 + $0x2c0] sm:$0xff] %v2377_v7  ;;  %2625 = vmatprep.mubr.bf16.mxu0 %v7804_v33  ;;  %3526 = vmatprep.mubr.bf16.mxu1 %v3631_v18 }
 0x40f   :  { %v2186_v42 = vpop.f32.mrf.mxu1  ;;  %v2379_v12 = vpop.f32.mrf.mxu0 }
 0x410   :  { %3236 = vst [vmem:[%s7355_s4 + $0x9b8] sm:$0xff] %v2186_v42  ;;  %3014 = vst [vmem:[%s7355_s4 + $0x2c8] sm:$0xff] %v2379_v12 }
 0x411   :  { %v2188_v59 = vpop.f32.mrf.mxu1  ;;  %v2381_v4 = vpop.f32.mrf.mxu0 }
 0x412   :  { %3242 = vst [vmem:[%s7355_s4 + $0x9e8] sm:$0xff] %v2188_v59  ;;  %3020 = vst [vmem:[%s7355_s4 + $0x2f8] sm:$0xff] %v2381_v4 }
 0x413   :  { %v2190_v33 = vpop.f32.mrf.mxu1  ;;  %v2383_v34 = vpop.f32.mrf.mxu0 }
 0x414   :  { %3243 = vst [vmem:[%s7355_s4 + $0x9f0] sm:$0xff] %v2190_v33  ;;  %3021 = vst [vmem:[%s7355_s4 + $0x300] sm:$0xff] %v2383_v34 }
 0x415   :  { %v2194_v45 = vpop.f32.mrf.mxu1  ;;  %v2387_v28 = vpop.f32.mrf.mxu0  ;;  %2626 = vmatmul.mubr.bf16.gmra.mxu0 %v3632_v56  ;;  %3527 = vmatmul.mubr.bf16.gmra.mxu1 %v3632_v56 }
 0x416   :  { %3249 = vst [vmem:[%s7355_s4 + $0xa20] sm:$0xff] %v2194_v45  ;;  %3027 = vst [vmem:[%s7355_s4 + $0x330] sm:$0xff] %v2387_v28 }
 0x417   :  { %v2196_v61 = vpop.f32.mrf.mxu1  ;;  %v2389_v44 = vpop.f32.mrf.mxu0 }
 0x418   :  { %3250 = vst [vmem:[%s7355_s4 + $0xa28] sm:$0xff] %v2196_v61  ;;  %3028 = vst [vmem:[%s7355_s4 + $0x338] sm:$0xff] %v2389_v44 }
 0x419   :  { %v2198_v11 = vpop.f32.mrf.mxu1  ;;  %v2391_v19 = vpop.f32.mrf.mxu0 }
 0x41a   :  { %3256 = vst [vmem:[%s7355_s4 + $0xa58] sm:$0xff] %v2198_v11  ;;  %3034 = vst [vmem:[%s7355_s4 + $0x368] sm:$0xff] %v2391_v19 }
 0x41b   :  { %v2200_v54 = vpop.f32.mrf.mxu1  ;;  %v2393_v25 = vpop.f32.mrf.mxu0 }
 0x41c   :  { %3257 = vst [vmem:[%s7355_s4 + $0xa60] sm:$0xff] %v2200_v54  ;;  %3035 = vst [vmem:[%s7355_s4 + $0x370] sm:$0xff] %v2393_v25 }
 0x41d   :  { %v2204_v47 = vpop.f32.mrf.mxu1  ;;  %v2397_v9 = vpop.f32.mrf.mxu0 }
 0x41e   :  { %3263 = vst [vmem:[%s7355_s4 + $0xa90] sm:$0xff] %v2204_v47  ;;  %3041 = vst [vmem:[%s7355_s4 + $0x3a0] sm:$0xff] %v2397_v9 }
 0x41f   :  { %v2206_v51 = vpop.f32.mrf.mxu1  ;;  %v2399_v55 = vpop.f32.mrf.mxu0 }
 0x420   :  { %3264 = vst [vmem:[%s7355_s4 + $0xa98] sm:$0xff] %v2206_v51  ;;  %3042 = vst [vmem:[%s7355_s4 + $0x3a8] sm:$0xff] %v2399_v55 }
 0x421   :  { %v2208_v24 = vpop.f32.mrf.mxu1  ;;  %v2401_v6 = vpop.f32.mrf.mxu0 }
 0x422   :  { %3270 = vst [vmem:[%s7355_s4 + $0xac8] sm:$0xff] %v2208_v24  ;;  %3048 = vst [vmem:[%s7355_s4 + $0x3d8] sm:$0xff] %v2401_v6 }
 0x423   :  { %v2210_v26 = vpop.f32.mrf.mxu1  ;;  %v2403_v1 = vpop.f32.mrf.mxu0 }
 0x424   :  { %3271 = vst [vmem:[%s7355_s4 + $0xad0] sm:$0xff] %v2210_v26  ;;  %3049 = vst [vmem:[%s7355_s4 + $0x3e0] sm:$0xff] %v2403_v1 }
 0x425   :  { %v2214_v32 = vpop.f32.mrf.mxu1  ;;  %v2407_v62 = vpop.f32.mrf.mxu0 }
 0x426   :  { %3277 = vst [vmem:[%s7355_s4 + $0xb00] sm:$0xff] %v2214_v32  ;;  %3055 = vst [vmem:[%s7355_s4 + $0x410] sm:$0xff] %v2407_v62 }
 0x427   :  { %v2216_v0 = vpop.f32.mrf.mxu1  ;;  %v2409_v41 = vpop.f32.mrf.mxu0 }
 0x428   :  { %3278 = vst [vmem:[%s7355_s4 + $0xb08] sm:$0xff] %v2216_v0  ;;  %3056 = vst [vmem:[%s7355_s4 + $0x418] sm:$0xff] %v2409_v41 }
 0x429   :  { %v2218_v22 = vpop.f32.mrf.mxu1  ;;  %v2411_v58 = vpop.f32.mrf.mxu0 }
 0x42a   :  { %3284 = vst [vmem:[%s7355_s4 + $0xb38] sm:$0xff] %v2218_v22  ;;  %3062 = vst [vmem:[%s7355_s4 + $0x448] sm:$0xff] %v2411_v58 }
 0x42b   :  { %v2220_v37 = vpop.f32.mrf.mxu1  ;;  %v2413_v63 = vpop.f32.mrf.mxu0 }
 0x42c   :  { %3285 = vst [vmem:[%s7355_s4 + $0xb40] sm:$0xff] %v2220_v37  ;;  %3063 = vst [vmem:[%s7355_s4 + $0x450] sm:$0xff] %v2413_v63 }
 0x42d   :  { %v2224_v36 = vpop.f32.mrf.mxu1  ;;  %v2417_v10 = vpop.f32.mrf.mxu0 }
 0x42e   :  { %3291 = vst [vmem:[%s7355_s4 + $0xb70] sm:$0xff] %v2224_v36  ;;  %3069 = vst [vmem:[%s7355_s4 + $0x480] sm:$0xff] %v2417_v10 }
 0x42f   :  { %v2226_v21 = vpop.f32.mrf.mxu1  ;;  %v2419_v20 = vpop.f32.mrf.mxu0 }
 0x430   :  { %3292 = vst [vmem:[%s7355_s4 + $0xb78] sm:$0xff] %v2226_v21  ;;  %3070 = vst [vmem:[%s7355_s4 + $0x488] sm:$0xff] %v2419_v20 }
 0x431   :  { %v2228_v3 = vpop.f32.mrf.mxu1  ;;  %v2421_v31 = vpop.f32.mrf.mxu0 }
 0x432   :  { %3298 = vst [vmem:[%s7355_s4 + $0xba8] sm:$0xff] %v2228_v3  ;;  %3076 = vst [vmem:[%s7355_s4 + $0x4b8] sm:$0xff] %v2421_v31 }
 0x433   :  { %v2230_v13 = vpop.f32.mrf.mxu1  ;;  %v2423_v53 = vpop.f32.mrf.mxu0 }
 0x434   :  { %3299 = vst [vmem:[%s7355_s4 + $0xbb0] sm:$0xff] %v2230_v13  ;;  %3077 = vst [vmem:[%s7355_s4 + $0x4c0] sm:$0xff] %v2423_v53 }
 0x435   :  { %v2234_v35 = vpop.f32.mrf.mxu1  ;;  %v2427_v38 = vpop.f32.mrf.mxu0 }
 0x436   :  { %3305 = vst [vmem:[%s7355_s4 + $0xbe0] sm:$0xff] %v2234_v35  ;;  %3083 = vst [vmem:[%s7355_s4 + $0x4f0] sm:$0xff] %v2427_v38 }
 0x437   :  { %v2236_v5 = vpop.f32.mrf.mxu1  ;;  %v2429_v17 = vpop.f32.mrf.mxu0 }
 0x438   :  { %3306 = vst [vmem:[%s7355_s4 + $0xbe8] sm:$0xff] %v2236_v5  ;;  %3084 = vst [vmem:[%s7355_s4 + $0x4f8] sm:$0xff] %v2429_v17 }
 0x439   :  { %v2238_v2 = vpop.f32.mrf.mxu1  ;;  %v2431_v15 = vpop.f32.mrf.mxu0 }
 0x43a   :  { %3312 = vst [vmem:[%s7355_s4 + $0xc18] sm:$0xff] %v2238_v2  ;;  %3090 = vst [vmem:[%s7355_s4 + $0x528] sm:$0xff] %v2431_v15 }
 0x43b   :  { %v2240_v23 = vpop.f32.mrf.mxu1  ;;  %v2433_v57 = vpop.f32.mrf.mxu0 }
 0x43c   :  { %3313 = vst [vmem:[%s7355_s4 + $0xc20] sm:$0xff] %v2240_v23  ;;  %3091 = vst [vmem:[%s7355_s4 + $0x530] sm:$0xff] %v2433_v57 }
 0x43d   :  { %v2244_v50 = vpop.f32.mrf.mxu1  ;;  %v2437_v43 = vpop.f32.mrf.mxu0 }
 0x43e   :  { %3319 = vst [vmem:[%s7355_s4 + $0xc50] sm:$0xff] %v2244_v50  ;;  %3097 = vst [vmem:[%s7355_s4 + $0x560] sm:$0xff] %v2437_v43 }
 0x43f   :  { %v2246_v14 = vpop.f32.mrf.mxu1  ;;  %v2439_v27 = vpop.f32.mrf.mxu0 }
 0x440   :  { %3320 = vst [vmem:[%s7355_s4 + $0xc58] sm:$0xff] %v2246_v14  ;;  %3098 = vst [vmem:[%s7355_s4 + $0x568] sm:$0xff] %v2439_v27 }
 0x441   :  { %v2248_v39 = vpop.f32.mrf.mxu1  ;;  %v2441_v46 = vpop.f32.mrf.mxu0 }
 0x442   :  { %3326 = vst [vmem:[%s7355_s4 + $0xc88] sm:$0xff] %v2248_v39  ;;  %3104 = vst [vmem:[%s7355_s4 + $0x598] sm:$0xff] %v2441_v46 }
 0x443   :  { %v2250_v52 = vpop.f32.mrf.mxu1  ;;  %v2443_v16 = vpop.f32.mrf.mxu0 }
 0x444   :  { %3327 = vst [vmem:[%s7355_s4 + $0xc90] sm:$0xff] %v2250_v52  ;;  %3105 = vst [vmem:[%s7355_s4 + $0x5a0] sm:$0xff] %v2443_v16 }
 0x445   :  { %v2254_v8 = vpop.f32.mrf.mxu1  ;;  %v2447_v49 = vpop.f32.mrf.mxu0 }
 0x446   :  { %3333 = vst [vmem:[%s7355_s4 + $0xcc0] sm:$0xff] %v2254_v8  ;;  %3111 = vst [vmem:[%s7355_s4 + $0x5d0] sm:$0xff] %v2447_v49 }
 0x447   :  { %v2256_v40 = vpop.f32.mrf.mxu1  ;;  %v2449_v30 = vpop.f32.mrf.mxu0 }
 0x448   :  { %3334 = vst [vmem:[%s7355_s4 + $0xcc8] sm:$0xff] %v2256_v40  ;;  %3112 = vst [vmem:[%s7355_s4 + $0x5d8] sm:$0xff] %v2449_v30 }
 0x449   :  { %v2258_v29 = vpop.f32.mrf.mxu1  ;;  %v2451_v48 = vpop.f32.mrf.mxu0 }
 0x44a   :  { %3340 = vst [vmem:[%s7355_s4 + $0xcf8] sm:$0xff] %v2258_v29  ;;  %3118 = vst [vmem:[%s7355_s4 + $0x608] sm:$0xff] %v2451_v48 }
 0x44b   :  { %v2260_v60 = vpop.f32.mrf.mxu1  ;;  %v2453_v7 = vpop.f32.mrf.mxu0 }
 0x44c   :  { %3341 = vst [vmem:[%s7355_s4 + $0xd00] sm:$0xff] %v2260_v60  ;;  %3119 = vst [vmem:[%s7355_s4 + $0x610] sm:$0xff] %v2453_v7 }
 0x44d   :  { %v2264_v18 = vpop.f32.mrf.mxu1  ;;  %v2457_v42 = vpop.f32.mrf.mxu0 }
 0x44e   :  { %3347 = vst [vmem:[%s7355_s4 + $0xd30] sm:$0xff] %v2264_v18  ;;  %3125 = vst [vmem:[%s7355_s4 + $0x640] sm:$0xff] %v2457_v42 }
 0x44f   :  { %v2266_v12 = vpop.f32.mrf.mxu1  ;;  %v2459_v59 = vpop.f32.mrf.mxu0 }
 0x450   :  { %3348 = vst [vmem:[%s7355_s4 + $0xd38] sm:$0xff] %v2266_v12  ;;  %3126 = vst [vmem:[%s7355_s4 + $0x648] sm:$0xff] %v2459_v59 }
 0x451   :  { %v2268_v4 = vpop.f32.mrf.mxu1  ;;  %v2461_v33 = vpop.f32.mrf.mxu0 }
 0x452   :  { %3354 = vst [vmem:[%s7355_s4 + $0xd68] sm:$0xff] %v2268_v4  ;;  %3132 = vst [vmem:[%s7355_s4 + $0x678] sm:$0xff] %v2461_v33 }
 0x453   :  { %v2270_v34 = vpop.f32.mrf.mxu1  ;;  %v2463_v45 = vpop.f32.mrf.mxu0 }
 0x454   :  { %3355 = vst [vmem:[%s7355_s4 + $0xd70] sm:$0xff] %v2270_v34  ;;  %3133 = vst [vmem:[%s7355_s4 + $0x680] sm:$0xff] %v2463_v45 }
 0x455   :  { %v2274_v28 = vpop.f32.mrf.mxu1  ;;  %v2467_v56 = vpop.f32.mrf.mxu0 }
 0x456   :  { %3361 = vst [vmem:[%s7355_s4 + $0xda0] sm:$0xff] %v2274_v28  ;;  %3139 = vst [vmem:[%s7355_s4 + $0x6b0] sm:$0xff] %v2467_v56 }
 0x457   :  { %v2276_v61 = vpop.f32.mrf.mxu1  ;;  %v2469_v44 = vpop.f32.mrf.mxu0 }
 0x458   :  { %3362 = vst [vmem:[%s7355_s4 + $0xda8] sm:$0xff] %v2276_v61  ;;  %3140 = vst [vmem:[%s7355_s4 + $0x6b8] sm:$0xff] %v2469_v44 }
 0x459   :  { %v2278_v11 = vpop.f32.mrf.mxu1  ;;  %v2471_v19 = vpop.f32.mrf.mxu0 }
 0x45a   :  { %3368 = vst [vmem:[%s7355_s4 + $0xdd8] sm:$0xff] %v2278_v11  ;;  %3146 = vst [vmem:[%s7355_s4 + $0x6e8] sm:$0xff] %v2471_v19 }
 0x45b   :  { %v2280_v54 = vpop.f32.mrf.mxu1  ;;  %v2473_v25 = vpop.f32.mrf.mxu0 }
 0x45c   :  { %3369 = vst [vmem:[%s7355_s4 + $0xde0] sm:$0xff] %v2280_v54  ;;  %3147 = vst [vmem:[%s7355_s4 + $0x6f0] sm:$0xff] %v2473_v25 }
 0x45d   :  { %v2477_v47 = vpop.f32.mrf.mxu0  ;;  %v3468_v9 = vpop.f32.mrf.mxu1 }
 0x45e   :  { %3153 = vst [vmem:[%s7355_s4 + $0x720] sm:$0xff] %v2477_v47  ;;  %2945 = vst.msk [vmem:[%s7355_s4 + $0xa0] sm:$0xff] %vm149_vm0, %v3468_v9 }
 0x45f   :  { %v2479_v51 = vpop.f32.mrf.mxu0  ;;  %v2670_v55 = vpop.f32.mrf.mxu1 }
 0x460   :  { %3154 = vst [vmem:[%s7355_s4 + $0x728] sm:$0xff] %v2479_v51  ;;  %2931 = vst.msk [vmem:[%s7355_s4 + $0x30] sm:$0xff] %vm149_vm0, %v2670_v55 }
 0x461   :  { %v2481_v24 = vpop.f32.mrf.mxu0  ;;  %v3469_v6 = vpop.f32.mrf.mxu1 }
 0x462   :  { %3160 = vst [vmem:[%s7355_s4 + $0x758] sm:$0xff] %v2481_v24  ;;  %2952 = vst.msk [vmem:[%s7355_s4 + $0xd8] sm:$0xff] %vm149_vm0, %v3469_v6 }
 0x463   :  { %v2483_v26 = vpop.f32.mrf.mxu0  ;;  %v2673_v1 = vpop.f32.mrf.mxu1 }
 0x464   :  { %3161 = vst [vmem:[%s7355_s4 + $0x760] sm:$0xff] %v2483_v26  ;;  %2938 = vst.msk [vmem:[%s7355_s4 + $0x68] sm:$0xff] %vm149_vm0, %v2673_v1 }
 0x465   :  { %v2487_v32 = vpop.f32.mrf.mxu0  ;;  %v3472_v62 = vpop.f32.mrf.mxu1 }
 0x466   :  { %3167 = vst [vmem:[%s7355_s4 + $0x790] sm:$0xff] %v2487_v32  ;;  %2973 = vst.msk [vmem:[%s7355_s4 + $0x180] sm:$0xff] %vm149_vm0, %v3472_v62 }
 0x467   :  { %v2489_v0 = vpop.f32.mrf.mxu0  ;;  %v2686_v41 = vpop.f32.mrf.mxu1 }
 0x468   :  { %3168 = vst [vmem:[%s7355_s4 + $0x798] sm:$0xff] %v2489_v0  ;;  %2959 = vst.msk [vmem:[%s7355_s4 + $0x110] sm:$0xff] %vm149_vm0, %v2686_v41 }
 0x469   :  { %v2491_v22 = vpop.f32.mrf.mxu0  ;;  %v3473_v58 = vpop.f32.mrf.mxu1 }
 0x46a   :  { %3174 = vst [vmem:[%s7355_s4 + $0x7c8] sm:$0xff] %v2491_v22  ;;  %2980 = vst.msk [vmem:[%s7355_s4 + $0x1b8] sm:$0xff] %vm149_vm0, %v3473_v58 }
 0x46b   :  { %v2493_v37 = vpop.f32.mrf.mxu0  ;;  %v2689_v63 = vpop.f32.mrf.mxu1 }
 0x46c   :  { %3175 = vst [vmem:[%s7355_s4 + $0x7d0] sm:$0xff] %v2493_v37  ;;  %2966 = vst.msk [vmem:[%s7355_s4 + $0x148] sm:$0xff] %vm149_vm0, %v2689_v63 }
 0x46d   :  { %v2497_v36 = vpop.f32.mrf.mxu0  ;;  %v3476_v10 = vpop.f32.mrf.mxu1 }
 0x46e   :  { %3181 = vst [vmem:[%s7355_s4 + $0x800] sm:$0xff] %v2497_v36  ;;  %3001 = vst.msk [vmem:[%s7355_s4 + $0x260] sm:$0xff] %vm149_vm0, %v3476_v10 }
 0x46f   :  { %v2499_v21 = vpop.f32.mrf.mxu0  ;;  %v2702_v20 = vpop.f32.mrf.mxu1 }
 0x470   :  { %3182 = vst [vmem:[%s7355_s4 + $0x808] sm:$0xff] %v2499_v21  ;;  %2987 = vst.msk [vmem:[%s7355_s4 + $0x1f0] sm:$0xff] %vm149_vm0, %v2702_v20 }
 0x471   :  { %v2501_v3 = vpop.f32.mrf.mxu0  ;;  %v3477_v31 = vpop.f32.mrf.mxu1 }
 0x472   :  { %3188 = vst [vmem:[%s7355_s4 + $0x838] sm:$0xff] %v2501_v3  ;;  %3008 = vst.msk [vmem:[%s7355_s4 + $0x298] sm:$0xff] %vm149_vm0, %v3477_v31 }
 0x473   :  { %v2503_v13 = vpop.f32.mrf.mxu0  ;;  %v2705_v53 = vpop.f32.mrf.mxu1 }
 0x474   :  { %3189 = vst [vmem:[%s7355_s4 + $0x840] sm:$0xff] %v2503_v13  ;;  %2994 = vst.msk [vmem:[%s7355_s4 + $0x228] sm:$0xff] %vm149_vm0, %v2705_v53 }
 0x475   :  { %v2507_v35 = vpop.f32.mrf.mxu0  ;;  %v3480_v38 = vpop.f32.mrf.mxu1 }
 0x476   :  { %3195 = vst [vmem:[%s7355_s4 + $0x870] sm:$0xff] %v2507_v35  ;;  %3029 = vst.msk [vmem:[%s7355_s4 + $0x340] sm:$0xff] %vm149_vm0, %v3480_v38 }
 0x477   :  { %v2509_v5 = vpop.f32.mrf.mxu0  ;;  %v2718_v17 = vpop.f32.mrf.mxu1 }
 0x478   :  { %3196 = vst [vmem:[%s7355_s4 + $0x878] sm:$0xff] %v2509_v5  ;;  %3015 = vst.msk [vmem:[%s7355_s4 + $0x2d0] sm:$0xff] %vm149_vm0, %v2718_v17 }
 0x479   :  { %v2511_v2 = vpop.f32.mrf.mxu0  ;;  %v3481_v15 = vpop.f32.mrf.mxu1 }
 0x47a   :  { %3202 = vst [vmem:[%s7355_s4 + $0x8a8] sm:$0xff] %v2511_v2  ;;  %3036 = vst.msk [vmem:[%s7355_s4 + $0x378] sm:$0xff] %vm149_vm0, %v3481_v15 }
 0x47b   :  { %v2513_v23 = vpop.f32.mrf.mxu0  ;;  %v2721_v57 = vpop.f32.mrf.mxu1 }
 0x47c   :  { %3203 = vst [vmem:[%s7355_s4 + $0x8b0] sm:$0xff] %v2513_v23  ;;  %3022 = vst.msk [vmem:[%s7355_s4 + $0x308] sm:$0xff] %vm149_vm0, %v2721_v57 }
 0x47d   :  { %v2517_v50 = vpop.f32.mrf.mxu0  ;;  %v3484_v43 = vpop.f32.mrf.mxu1 }
 0x47e   :  { %3209 = vst [vmem:[%s7355_s4 + $0x8e0] sm:$0xff] %v2517_v50  ;;  %3057 = vst.msk [vmem:[%s7355_s4 + $0x420] sm:$0xff] %vm149_vm0, %v3484_v43 }
 0x47f   :  { %v2519_v14 = vpop.f32.mrf.mxu0  ;;  %v2734_v27 = vpop.f32.mrf.mxu1 }
 0x480   :  { %3210 = vst [vmem:[%s7355_s4 + $0x8e8] sm:$0xff] %v2519_v14  ;;  %3043 = vst.msk [vmem:[%s7355_s4 + $0x3b0] sm:$0xff] %vm149_vm0, %v2734_v27 }
 0x481   :  { %v2521_v39 = vpop.f32.mrf.mxu0  ;;  %v3485_v46 = vpop.f32.mrf.mxu1 }
 0x482   :  { %3216 = vst [vmem:[%s7355_s4 + $0x918] sm:$0xff] %v2521_v39  ;;  %3064 = vst.msk [vmem:[%s7355_s4 + $0x458] sm:$0xff] %vm149_vm0, %v3485_v46 }
 0x483   :  { %v2523_v52 = vpop.f32.mrf.mxu0  ;;  %v2737_v16 = vpop.f32.mrf.mxu1 }
 0x484   :  { %3217 = vst [vmem:[%s7355_s4 + $0x920] sm:$0xff] %v2523_v52  ;;  %3050 = vst.msk [vmem:[%s7355_s4 + $0x3e8] sm:$0xff] %vm149_vm0, %v2737_v16 }
 0x485   :  { %v2527_v8 = vpop.f32.mrf.mxu0  ;;  %v3488_v49 = vpop.f32.mrf.mxu1 }
 0x486   :  { %3223 = vst [vmem:[%s7355_s4 + $0x950] sm:$0xff] %v2527_v8  ;;  %3085 = vst.msk [vmem:[%s7355_s4 + $0x500] sm:$0xff] %vm149_vm0, %v3488_v49 }
 0x487   :  { %v2529_v40 = vpop.f32.mrf.mxu0  ;;  %v2750_v30 = vpop.f32.mrf.mxu1 }
 0x488   :  { %3224 = vst [vmem:[%s7355_s4 + $0x958] sm:$0xff] %v2529_v40  ;;  %3071 = vst.msk [vmem:[%s7355_s4 + $0x490] sm:$0xff] %vm149_vm0, %v2750_v30 }
 0x489   :  { %v2531_v29 = vpop.f32.mrf.mxu0  ;;  %v3489_v48 = vpop.f32.mrf.mxu1 }
 0x48a   :  { %3230 = vst [vmem:[%s7355_s4 + $0x988] sm:$0xff] %v2531_v29  ;;  %3092 = vst.msk [vmem:[%s7355_s4 + $0x538] sm:$0xff] %vm149_vm0, %v3489_v48 }
 0x48b   :  { %v2533_v60 = vpop.f32.mrf.mxu0  ;;  %v2753_v7 = vpop.f32.mrf.mxu1 }
 0x48c   :  { %3231 = vst [vmem:[%s7355_s4 + $0x990] sm:$0xff] %v2533_v60  ;;  %3078 = vst.msk [vmem:[%s7355_s4 + $0x4c8] sm:$0xff] %vm149_vm0, %v2753_v7 }
 0x48d   :  { %v2537_v18 = vpop.f32.mrf.mxu0  ;;  %v3492_v42 = vpop.f32.mrf.mxu1 }
 0x48e   :  { %3237 = vst [vmem:[%s7355_s4 + $0x9c0] sm:$0xff] %v2537_v18  ;;  %3113 = vst.msk [vmem:[%s7355_s4 + $0x5e0] sm:$0xff] %vm149_vm0, %v3492_v42 }
 0x48f   :  { %v2539_v12 = vpop.f32.mrf.mxu0  ;;  %v2766_v59 = vpop.f32.mrf.mxu1 }
 0x490   :  { %3238 = vst [vmem:[%s7355_s4 + $0x9c8] sm:$0xff] %v2539_v12  ;;  %3099 = vst.msk [vmem:[%s7355_s4 + $0x570] sm:$0xff] %vm149_vm0, %v2766_v59 }
 0x491   :  { %v2541_v4 = vpop.f32.mrf.mxu0  ;;  %v3493_v33 = vpop.f32.mrf.mxu1 }
 0x492   :  { %3244 = vst [vmem:[%s7355_s4 + $0x9f8] sm:$0xff] %v2541_v4  ;;  %3120 = vst.msk [vmem:[%s7355_s4 + $0x618] sm:$0xff] %vm149_vm0, %v3493_v33 }
 0x493   :  { %v2543_v34 = vpop.f32.mrf.mxu0  ;;  %v2769_v45 = vpop.f32.mrf.mxu1 }
 0x494   :  { %3245 = vst [vmem:[%s7355_s4 + $0xa00] sm:$0xff] %v2543_v34  ;;  %3106 = vst.msk [vmem:[%s7355_s4 + $0x5a8] sm:$0xff] %vm149_vm0, %v2769_v45 }
 0x495   :  { %v2547_v28 = vpop.f32.mrf.mxu0  ;;  %v3496_v56 = vpop.f32.mrf.mxu1 }
 0x496   :  { %3251 = vst [vmem:[%s7355_s4 + $0xa30] sm:$0xff] %v2547_v28  ;;  %3141 = vst.msk [vmem:[%s7355_s4 + $0x6c0] sm:$0xff] %vm149_vm0, %v3496_v56 }
 0x497   :  { %v2549_v61 = vpop.f32.mrf.mxu0  ;;  %v2782_v44 = vpop.f32.mrf.mxu1 }
 0x498   :  { %3252 = vst [vmem:[%s7355_s4 + $0xa38] sm:$0xff] %v2549_v61  ;;  %3127 = vst.msk [vmem:[%s7355_s4 + $0x650] sm:$0xff] %vm149_vm0, %v2782_v44 }
 0x499   :  { %v2551_v11 = vpop.f32.mrf.mxu0  ;;  %v3497_v19 = vpop.f32.mrf.mxu1 }
 0x49a   :  { %3258 = vst [vmem:[%s7355_s4 + $0xa68] sm:$0xff] %v2551_v11  ;;  %3148 = vst.msk [vmem:[%s7355_s4 + $0x6f8] sm:$0xff] %vm149_vm0, %v3497_v19 }
 0x49b   :  { %v2553_v54 = vpop.f32.mrf.mxu0  ;;  %v2785_v25 = vpop.f32.mrf.mxu1 }
 0x49c   :  { %3259 = vst [vmem:[%s7355_s4 + $0xa70] sm:$0xff] %v2553_v54  ;;  %3134 = vst.msk [vmem:[%s7355_s4 + $0x688] sm:$0xff] %vm149_vm0, %v2785_v25 }
 0x49d   :  { %v2557_v47 = vpop.f32.mrf.mxu0  ;;  %v3500_v9 = vpop.f32.mrf.mxu1 }
 0x49e   :  { %3265 = vst [vmem:[%s7355_s4 + $0xaa0] sm:$0xff] %v2557_v47  ;;  %3169 = vst.msk [vmem:[%s7355_s4 + $0x7a0] sm:$0xff] %vm149_vm0, %v3500_v9 }
 0x49f   :  { %v2559_v51 = vpop.f32.mrf.mxu0  ;;  %v2798_v55 = vpop.f32.mrf.mxu1 }
 0x4a0   :  { %3266 = vst [vmem:[%s7355_s4 + $0xaa8] sm:$0xff] %v2559_v51  ;;  %3155 = vst.msk [vmem:[%s7355_s4 + $0x730] sm:$0xff] %vm149_vm0, %v2798_v55 }
 0x4a1   :  { %v2561_v24 = vpop.f32.mrf.mxu0  ;;  %v3501_v6 = vpop.f32.mrf.mxu1 }
 0x4a2   :  { %3272 = vst [vmem:[%s7355_s4 + $0xad8] sm:$0xff] %v2561_v24  ;;  %3176 = vst.msk [vmem:[%s7355_s4 + $0x7d8] sm:$0xff] %vm149_vm0, %v3501_v6 }
 0x4a3   :  { %v2563_v26 = vpop.f32.mrf.mxu0  ;;  %v2801_v1 = vpop.f32.mrf.mxu1 }
 0x4a4   :  { %3273 = vst [vmem:[%s7355_s4 + $0xae0] sm:$0xff] %v2563_v26  ;;  %3162 = vst.msk [vmem:[%s7355_s4 + $0x768] sm:$0xff] %vm149_vm0, %v2801_v1 }
 0x4a5   :  { %v2567_v32 = vpop.f32.mrf.mxu0  ;;  %v3504_v62 = vpop.f32.mrf.mxu1 }
 0x4a6   :  { %3279 = vst [vmem:[%s7355_s4 + $0xb10] sm:$0xff] %v2567_v32  ;;  %3197 = vst.msk [vmem:[%s7355_s4 + $0x880] sm:$0xff] %vm149_vm0, %v3504_v62 }
 0x4a7   :  { %v2569_v0 = vpop.f32.mrf.mxu0  ;;  %v2814_v41 = vpop.f32.mrf.mxu1 }
 0x4a8   :  { %3280 = vst [vmem:[%s7355_s4 + $0xb18] sm:$0xff] %v2569_v0  ;;  %3183 = vst.msk [vmem:[%s7355_s4 + $0x810] sm:$0xff] %vm149_vm0, %v2814_v41 }
 0x4a9   :  { %v2571_v22 = vpop.f32.mrf.mxu0  ;;  %v3505_v58 = vpop.f32.mrf.mxu1 }
 0x4aa   :  { %3286 = vst [vmem:[%s7355_s4 + $0xb48] sm:$0xff] %v2571_v22  ;;  %3204 = vst.msk [vmem:[%s7355_s4 + $0x8b8] sm:$0xff] %vm149_vm0, %v3505_v58 }
 0x4ab   :  { %v2573_v37 = vpop.f32.mrf.mxu0  ;;  %v2817_v63 = vpop.f32.mrf.mxu1 }
 0x4ac   :  { %3287 = vst [vmem:[%s7355_s4 + $0xb50] sm:$0xff] %v2573_v37  ;;  %3190 = vst.msk [vmem:[%s7355_s4 + $0x848] sm:$0xff] %vm149_vm0, %v2817_v63 }
 0x4ad   :  { %v2577_v36 = vpop.f32.mrf.mxu0  ;;  %v3508_v10 = vpop.f32.mrf.mxu1 }
 0x4ae   :  { %3293 = vst [vmem:[%s7355_s4 + $0xb80] sm:$0xff] %v2577_v36  ;;  %3225 = vst.msk [vmem:[%s7355_s4 + $0x960] sm:$0xff] %vm149_vm0, %v3508_v10 }
 0x4af   :  { %v2579_v21 = vpop.f32.mrf.mxu0  ;;  %v2830_v20 = vpop.f32.mrf.mxu1 }
 0x4b0   :  { %3294 = vst [vmem:[%s7355_s4 + $0xb88] sm:$0xff] %v2579_v21  ;;  %3211 = vst.msk [vmem:[%s7355_s4 + $0x8f0] sm:$0xff] %vm149_vm0, %v2830_v20 }
 0x4b1   :  { %v2581_v3 = vpop.f32.mrf.mxu0  ;;  %v3509_v31 = vpop.f32.mrf.mxu1 }
 0x4b2   :  { %3300 = vst [vmem:[%s7355_s4 + $0xbb8] sm:$0xff] %v2581_v3  ;;  %3232 = vst.msk [vmem:[%s7355_s4 + $0x998] sm:$0xff] %vm149_vm0, %v3509_v31 }
 0x4b3   :  { %v2583_v13 = vpop.f32.mrf.mxu0  ;;  %v2833_v53 = vpop.f32.mrf.mxu1 }
 0x4b4   :  { %3301 = vst [vmem:[%s7355_s4 + $0xbc0] sm:$0xff] %v2583_v13  ;;  %3218 = vst.msk [vmem:[%s7355_s4 + $0x928] sm:$0xff] %vm149_vm0, %v2833_v53 }
 0x4b5   :  { %v2587_v35 = vpop.f32.mrf.mxu0  ;;  %v3512_v38 = vpop.f32.mrf.mxu1 }
 0x4b6   :  { %3307 = vst [vmem:[%s7355_s4 + $0xbf0] sm:$0xff] %v2587_v35  ;;  %3253 = vst.msk [vmem:[%s7355_s4 + $0xa40] sm:$0xff] %vm149_vm0, %v3512_v38 }
 0x4b7   :  { %v2589_v5 = vpop.f32.mrf.mxu0  ;;  %v2846_v17 = vpop.f32.mrf.mxu1 }
 0x4b8   :  { %3308 = vst [vmem:[%s7355_s4 + $0xbf8] sm:$0xff] %v2589_v5  ;;  %3239 = vst.msk [vmem:[%s7355_s4 + $0x9d0] sm:$0xff] %vm149_vm0, %v2846_v17 }
 0x4b9   :  { %v2591_v2 = vpop.f32.mrf.mxu0  ;;  %v3513_v15 = vpop.f32.mrf.mxu1 }
 0x4ba   :  { %3314 = vst [vmem:[%s7355_s4 + $0xc28] sm:$0xff] %v2591_v2  ;;  %3260 = vst.msk [vmem:[%s7355_s4 + $0xa78] sm:$0xff] %vm149_vm0, %v3513_v15 }
 0x4bb   :  { %v2593_v23 = vpop.f32.mrf.mxu0  ;;  %v2849_v57 = vpop.f32.mrf.mxu1 }
 0x4bc   :  { %3315 = vst [vmem:[%s7355_s4 + $0xc30] sm:$0xff] %v2593_v23  ;;  %3246 = vst.msk [vmem:[%s7355_s4 + $0xa08] sm:$0xff] %vm149_vm0, %v2849_v57 }
 0x4bd   :  { %v2597_v50 = vpop.f32.mrf.mxu0  ;;  %v3516_v43 = vpop.f32.mrf.mxu1 }
 0x4be   :  { %3321 = vst [vmem:[%s7355_s4 + $0xc60] sm:$0xff] %v2597_v50  ;;  %3281 = vst.msk [vmem:[%s7355_s4 + $0xb20] sm:$0xff] %vm149_vm0, %v3516_v43 }
 0x4bf   :  { %v2599_v14 = vpop.f32.mrf.mxu0  ;;  %v2862_v27 = vpop.f32.mrf.mxu1 }
 0x4c0   :  { %3322 = vst [vmem:[%s7355_s4 + $0xc68] sm:$0xff] %v2599_v14  ;;  %3267 = vst.msk [vmem:[%s7355_s4 + $0xab0] sm:$0xff] %vm149_vm0, %v2862_v27 }
 0x4c1   :  { %v2601_v39 = vpop.f32.mrf.mxu0  ;;  %v3517_v46 = vpop.f32.mrf.mxu1 }
 0x4c2   :  { %3328 = vst [vmem:[%s7355_s4 + $0xc98] sm:$0xff] %v2601_v39  ;;  %3288 = vst.msk [vmem:[%s7355_s4 + $0xb58] sm:$0xff] %vm149_vm0, %v3517_v46 }
 0x4c3   :  { %v2603_v52 = vpop.f32.mrf.mxu0  ;;  %v2865_v16 = vpop.f32.mrf.mxu1 }
 0x4c4   :  { %3329 = vst [vmem:[%s7355_s4 + $0xca0] sm:$0xff] %v2603_v52  ;;  %3274 = vst.msk [vmem:[%s7355_s4 + $0xae8] sm:$0xff] %vm149_vm0, %v2865_v16 }
 0x4c5   :  { %v2607_v8 = vpop.f32.mrf.mxu0  ;;  %v3520_v49 = vpop.f32.mrf.mxu1 }
 0x4c6   :  { %3335 = vst [vmem:[%s7355_s4 + $0xcd0] sm:$0xff] %v2607_v8  ;;  %3309 = vst.msk [vmem:[%s7355_s4 + $0xc00] sm:$0xff] %vm149_vm0, %v3520_v49 }
 0x4c7   :  { %v2609_v40 = vpop.f32.mrf.mxu0  ;;  %v2878_v30 = vpop.f32.mrf.mxu1 }
 0x4c8   :  { %3336 = vst [vmem:[%s7355_s4 + $0xcd8] sm:$0xff] %v2609_v40  ;;  %3295 = vst.msk [vmem:[%s7355_s4 + $0xb90] sm:$0xff] %vm149_vm0, %v2878_v30 }
 0x4c9   :  { %v2611_v29 = vpop.f32.mrf.mxu0  ;;  %v3521_v48 = vpop.f32.mrf.mxu1 }
 0x4ca   :  { %3342 = vst [vmem:[%s7355_s4 + $0xd08] sm:$0xff] %v2611_v29  ;;  %3316 = vst.msk [vmem:[%s7355_s4 + $0xc38] sm:$0xff] %vm149_vm0, %v3521_v48 }
 0x4cb   :  { %v2613_v60 = vpop.f32.mrf.mxu0  ;;  %v2881_v7 = vpop.f32.mrf.mxu1 }
 0x4cc   :  { %3343 = vst [vmem:[%s7355_s4 + $0xd10] sm:$0xff] %v2613_v60  ;;  %3302 = vst.msk [vmem:[%s7355_s4 + $0xbc8] sm:$0xff] %vm149_vm0, %v2881_v7 }
 0x4cd   :  { %v2617_v18 = vpop.f32.mrf.mxu0  ;;  %v3524_v42 = vpop.f32.mrf.mxu1 }
 0x4ce   :  { %3349 = vst [vmem:[%s7355_s4 + $0xd40] sm:$0xff] %v2617_v18  ;;  %3337 = vst.msk [vmem:[%s7355_s4 + $0xce0] sm:$0xff] %vm149_vm0, %v3524_v42 }
 0x4cf   :  { %v2619_v12 = vpop.f32.mrf.mxu0  ;;  %v2894_v59 = vpop.f32.mrf.mxu1 }
 0x4d0   :  { %3350 = vst [vmem:[%s7355_s4 + $0xd48] sm:$0xff] %v2619_v12  ;;  %3323 = vst.msk [vmem:[%s7355_s4 + $0xc70] sm:$0xff] %vm149_vm0, %v2894_v59 }
 0x4d1   :  { %v2621_v4 = vpop.f32.mrf.mxu0  ;;  %v3525_v33 = vpop.f32.mrf.mxu1 }
 0x4d2   :  { %3356 = vst [vmem:[%s7355_s4 + $0xd78] sm:$0xff] %v2621_v4  ;;  %3344 = vst.msk [vmem:[%s7355_s4 + $0xd18] sm:$0xff] %vm149_vm0, %v3525_v33 }
 0x4d3   :  { %v2623_v34 = vpop.f32.mrf.mxu0  ;;  %v2897_v45 = vpop.f32.mrf.mxu1 }
 0x4d4   :  { %3357 = vst [vmem:[%s7355_s4 + $0xd80] sm:$0xff] %v2623_v34  ;;  %3330 = vst.msk [vmem:[%s7355_s4 + $0xca8] sm:$0xff] %vm149_vm0, %v2897_v45 }
 0x4d5   :  { %v2627_v28 = vpop.f32.mrf.mxu0  ;;  %v3528_v56 = vpop.f32.mrf.mxu1 }
 0x4d6   :  { %3363 = vst [vmem:[%s7355_s4 + $0xdb0] sm:$0xff] %v2627_v28  ;;  %3365 = vst.msk [vmem:[%s7355_s4 + $0xdc0] sm:$0xff] %vm149_vm0, %v3528_v56 }
 0x4d7   :  { %v2629_v61 = vpop.f32.mrf.mxu0  ;;  %v2910_v44 = vpop.f32.mrf.mxu1 }
 0x4d8   :  { %3364 = vst [vmem:[%s7355_s4 + $0xdb8] sm:$0xff] %v2629_v61  ;;  %3351 = vst.msk [vmem:[%s7355_s4 + $0xd50] sm:$0xff] %vm149_vm0, %v2910_v44 }
 0x4d9   :  { %v2631_v11 = vpop.f32.mrf.mxu0  ;;  %v3529_v19 = vpop.f32.mrf.mxu1 }
 0x4da   :  { %3370 = vst [vmem:[%s7355_s4 + $0xde8] sm:$0xff] %v2631_v11  ;;  %3372 = vst.msk [vmem:[%s7355_s4 + $0xdf8] sm:$0xff] %vm149_vm0, %v3529_v19 }
 0x4db   :  { %v2633_v54 = vpop.f32.mrf.mxu0  ;;  %v2913_v25 = vpop.f32.mrf.mxu1 }
 0x4dc   :  { %3371 = vst [vmem:[%s7355_s4 + $0xdf0] sm:$0xff] %v2633_v54  ;;  %3358 = vst.msk [vmem:[%s7355_s4 + $0xd88] sm:$0xff] %vm149_vm0, %v2913_v25 }
 0x4dd   :  { %3377 = vsyncpa [#allocation3], 1 }

</bundles_post_ra>
